<compile_context>
chip_gen: v7x
topology: tpu7x:2x2x1
jax: 0.10.0
libtpu: 0.0.40
codegen_flags: <defaults>
</compile_context>

<pallas_src>
import functools

import jax
import jax.numpy as jnp
from jax import lax
from jax.experimental import pallas as pl
from jax.experimental.pallas import tpu as pltpu


def _bottleneck_ir_kernel(x_ref, w1_ref, w2_ref, wsc_ref,
                          bn1_s_ref, bn1_b_ref, alpha_ref,
                          bn2_s_ref, bn2_b_ref, bnsc_s_ref, bnsc_b_ref,
                          out_ref, pad1_ref, pad2_ref, *, stride):
    _, H, W, Cin = x_ref.shape
    _, Ho, Wo, D = out_ref.shape
    s = stride
    cdt = w1_ref.dtype                      # matmul-input (compute) dtype

    # ---- border-only zeroing of the padded scratches ------------------------
    # The (H, W) interior is fully overwritten below, so only the 1-pixel ring
    # needs zeros.  Done per grid step (cheap) instead of once per core.
    def zero_border(ref):
        P0, P1, C = ref.shape
        ref[0:1, :, :] = jnp.zeros((1, P1, C), ref.dtype)
        ref[P0 - 1:P0, :, :] = jnp.zeros((1, P1, C), ref.dtype)
        ref[:, 0:1, :] = jnp.zeros((P0, 1, C), ref.dtype)
        ref[:, P1 - 1:P1, :] = jnp.zeros((P0, 1, C), ref.dtype)

    zero_border(pad1_ref)
    zero_border(pad2_ref)

    x = x_ref[...].reshape(H, W, Cin).astype(jnp.float32)

    # ---- res branch: BN1 -> conv3x3 (s=1) -> PReLU -> conv3x3 (stride) -> BN2
    y1 = x * bn1_s_ref[...] + bn1_b_ref[...]           # eval-mode BN1 (f32)
    pad1_ref[1:H + 1, 1:W + 1, :] = y1

    # conv1 as one im2col matmul: (H*W, 9*Cin) @ (9*Cin, D), f32 accumulation
    slab1 = jnp.concatenate(
        [pad1_ref[ky:ky + H, kx:kx + W, :].reshape(H * W, Cin)
         for ky in range(3) for kx in range(3)], axis=-1)
    acc1 = jnp.dot(slab1.astype(cdt), w1_ref[...],
                   preferred_element_type=jnp.float32)

    # PReLU (per-channel alpha), f32
    z = jnp.where(acc1 > 0, acc1, alpha_ref[...] * acc1)
    pad2_ref[1:H + 1, 1:W + 1, :] = z.reshape(H, W, D)

    # conv2 as one *strided* im2col matmul evaluated only at output positions:
    # (Ho*Wo, 9*D) @ (9*D, D).  Stride applied via strided pl.ds reads.
    slab2 = jnp.concatenate(
        [pad2_ref[pl.ds(ky, Ho, stride=s), pl.ds(kx, Wo, stride=s), :]
             .reshape(Ho * Wo, D)
         for ky in range(3) for kx in range(3)], axis=-1)
    res = jnp.dot(slab2.astype(cdt), w2_ref[...],
                  preferred_element_type=jnp.float32)
    res = res * bn2_s_ref[...] + bn2_b_ref[...]        # eval-mode BN2

    # ---- shortcut branch: strided 1x1 conv + BN ------------------------------
    xs = x_ref[:, pl.ds(0, Ho, stride=s), pl.ds(0, Wo, stride=s), :]
    xs = xs.reshape(Ho * Wo, Cin).astype(cdt)
    sc = jnp.dot(xs, wsc_ref[...], preferred_element_type=jnp.float32)
    sc = sc * bnsc_s_ref[...] + bnsc_b_ref[...]

    out_ref[...] = (res + sc).reshape(1, Ho, Wo, D).astype(out_ref.dtype)


def bottleneck_ir(x_nhwc, params, stride, *, compute_dtype=jnp.bfloat16):
    """ArcFace bottleneck_IR forward (eval-mode BN) as a Pallas kernel."""
    N, H, W, Cin = x_nhwc.shape
    D = params["w1_hwio"].shape[-1]
    Ho = (H - 1) // stride + 1
    Wo = (W - 1) // stride + 1

    # im2col weight layouts: row index = (ky*3 + kx)*C + c  (matches the slab)
    w1 = params["w1_hwio"].reshape(9 * Cin, D).astype(compute_dtype)
    w2 = params["w2_hwio"].reshape(9 * D, D).astype(compute_dtype)
    wsc = params["wsc"].astype(compute_dtype)          # (Cin, D)
    # Note: if in_channel == depth, pass wsc = identity and
    # bnsc = (ones, zeros, zeros, ones) to reproduce MaxPool2d(1, stride).

    def fold(gamma, beta, mean, var, eps=1e-5):
        sc = gamma / jnp.sqrt(var + eps)
        return sc, beta - mean * sc

    bn1_s, bn1_b = fold(*params["bn1"])
    bn2_s, bn2_b = fold(*params["bn2"])
    bnsc_s, bnsc_b = fold(*params["bnsc"])

    def full(shape):
        return pl.BlockSpec(shape, lambda n: (0,) * len(shape))

    kernel = functools.partial(_bottleneck_ir_kernel, stride=stride)

    out = pl.pallas_call(
        kernel,
        out_shape=jax.ShapeDtypeStruct((N, Ho, Wo, D), x_nhwc.dtype),
        grid=(N,),
        in_specs=[
            pl.BlockSpec((1, H, W, Cin), lambda n: (n, 0, 0, 0)),
            full((9 * Cin, D)),                        # conv1 weight (im2col)
            full((9 * D, D)),                          # conv2 weight (im2col)
            full((Cin, D)),                            # shortcut 1x1 weight
            full((1, Cin)), full((1, Cin)),            # BN1 scale / bias
            full((1, D)),                              # PReLU alpha
            full((1, D)), full((1, D)),                # BN2 scale / bias
            full((1, D)), full((1, D)),                # shortcut BN scale/bias
        ],
        out_specs=pl.BlockSpec((1, Ho, Wo, D), lambda n: (n, 0, 0, 0)),
        scratch_shapes=[
            pltpu.VMEM((H + 2, W + 2, Cin), jnp.float32),   # padded BN1(x)
            pltpu.VMEM((H + 2, W + 2, D), jnp.float32),     # padded PReLU out
        ],
        compiler_params=pltpu.CompilerParams(
            dimension_semantics=("parallel",)),
    )(x_nhwc, w1, w2, wsc,
      bn1_s.reshape(1, Cin), bn1_b.reshape(1, Cin),
      params["alpha"].reshape(1, D).astype(jnp.float32),
      bn2_s.reshape(1, D), bn2_b.reshape(1, D),
      bnsc_s.reshape(1, D), bnsc_b.reshape(1, D))
    return out


def reference_forward(x_nhwc, params, stride):
    """Pure-JAX NHWC reference mirroring the PyTorch forward (eval-mode BN)."""
    def bn_apply(y, p):
        gamma, beta, mean, var = p
        return (y - mean) * gamma / jnp.sqrt(var + 1e-5) + beta

    dn = ('NHWC', 'HWIO', 'NHWC')
    hi = lax.Precision.HIGHEST
    y = bn_apply(x_nhwc, params["bn1"])
    y = lax.conv_general_dilated(y, params["w1_hwio"], (1, 1), ((1, 1), (1, 1)),
                                 dimension_numbers=dn, precision=hi)
    y = jnp.where(y > 0, y, params["alpha"] * y)
    y = lax.conv_general_dilated(y, params["w2_hwio"], (stride, stride),
                                 ((1, 1), (1, 1)), dimension_numbers=dn,
                                 precision=hi)
    res = bn_apply(y, params["bn2"])

    xs = x_nhwc[:, ::stride, ::stride, :]
    sc = bn_apply(jnp.einsum('nhwc,cd->nhwd', xs, params["wsc"], precision=hi),
                  params["bnsc"])
    return res + sc


if __name__ == "__main__":
    # Module config (small): in_channel=4, depth=8, stride=2, 16x16 input.
    N, Cin, D, H, W, stride = 2, 4, 8, 16, 16, 2

    key = jax.random.PRNGKey(0)
    ks = jax.random.split(key, 16)

    # PyTorch-layout input (NCHW) and weights (OIHW), deterministic init.
    x_nchw = jax.random.normal(ks[0], (N, Cin, H, W), jnp.float32)
    w1_oihw = 0.1 * jax.random.normal(ks[1], (D, Cin, 3, 3), jnp.float32)
    w2_oihw = 0.1 * jax.random.normal(ks[2], (D, D, 3, 3), jnp.float32)
    wsc_oihw = 0.1 * jax.random.normal(ks[3], (D, Cin, 1, 1), jnp.float32)

    def bn_init(kg, kb, km, kv, C):
        gamma = 1.0 + 0.1 * jax.random.normal(kg, (C,), jnp.float32)
        beta = 0.1 * jax.random.normal(kb, (C,), jnp.float32)
        mean = 0.1 * jax.random.normal(km, (C,), jnp.float32)
        var = 1.0 + 0.1 * jax.random.uniform(kv, (C,), jnp.float32)
        return gamma, beta, mean, var

    bn1 = bn_init(ks[4], ks[5], ks[6], ks[7], Cin)
    bn2 = bn_init(ks[8], ks[9], ks[10], ks[11], D)
    bnsc = bn_init(ks[12], ks[13], ks[14], ks[15], D)
    alpha = jnp.full((D,), 0.25, jnp.float32)            # PReLU default init

    # Convert to kernel layout.
    x_nhwc = jnp.transpose(x_nchw, (0, 2, 3, 1))                  # NHWC
    params = {
        "w1_hwio": jnp.transpose(w1_oihw, (2, 3, 1, 0)),          # (3,3,Cin,D)
        "w2_hwio": jnp.transpose(w2_oihw, (2, 3, 1, 0)),          # (3,3,D,D)
        "wsc": wsc_oihw[:, :, 0, 0].T,                            # (Cin,D)
        "alpha": alpha,
        "bn1": bn1, "bn2": bn2, "bnsc": bnsc,
    }

    # Performance path: bf16 MXU inputs, f32 accumulation.
    out_bf16 = bottleneck_ir(x_nhwc, params, stride)
    # Checking path: all-f32 matmuls (tight tolerance catches layout bugs).
    out_f32 = bottleneck_ir(x_nhwc, params, stride, compute_dtype=jnp.float32)
    out_bf16, out_f32 = jax.block_until_ready((out_bf16, out_f32))

    ref = reference_forward(x_nhwc, params, stride)
    Ho = (H - 1) // stride + 1
    Wo = (W - 1) // stride + 1
    assert out_bf16.shape == (N, Ho, Wo, D)
    assert out_f32.shape == (N, Ho, Wo, D)

    diff_f32 = float(jnp.max(jnp.abs(out_f32 - ref)))
    diff_bf16 = float(jnp.max(jnp.abs(out_bf16 - ref)))
    assert diff_f32 < 2e-3, f"f32 kernel mismatch vs reference: {diff_f32}"
    assert diff_bf16 < 5e-2, f"bf16 kernel mismatch vs reference: {diff_bf16}"

    # back to PyTorch NCHW output convention, for documentation only
    out_nchw = jnp.transpose(out_bf16, (0, 3, 1, 2))
    _ = jax.block_until_ready(out_nchw)

    print("KERNEL_OK")
</pallas_src>

<mosaic_0001>
module attributes {stable_mosaic.version = 11 : i64} {
  func.func @_bottleneck_ir_kernel(%arg0: i32, %arg1: memref<1x16x16x4xf32, #tpu.memory_space<vmem>>, %arg2: memref<36x8xbf16, #tpu.memory_space<vmem>>, %arg3: memref<72x8xbf16, #tpu.memory_space<vmem>>, %arg4: memref<4x8xbf16, #tpu.memory_space<vmem>>, %arg5: memref<1x4xf32, #tpu.memory_space<vmem>>, %arg6: memref<1x4xf32, #tpu.memory_space<vmem>>, %arg7: memref<1x8xf32, #tpu.memory_space<vmem>>, %arg8: memref<1x8xf32, #tpu.memory_space<vmem>>, %arg9: memref<1x8xf32, #tpu.memory_space<vmem>>, %arg10: memref<1x8xf32, #tpu.memory_space<vmem>>, %arg11: memref<1x8xf32, #tpu.memory_space<vmem>>, %arg12: memref<1x8x8x8xf32, #tpu.memory_space<vmem>>, %arg13: memref<18x18x4xf32, #tpu.memory_space<vmem>>, %arg14: memref<18x18x8xf32, #tpu.memory_space<vmem>>) attributes {dimension_semantics = [#tpu.dimension_semantics<parallel>], iteration_bounds = array<i64: 2>, scalar_prefetch = 0 : i64, scratch_operands = 2 : i64, tpu.core_type = #tpu.core_type<tc>, window_params = [{transform_indices = @transform_0, window_bounds = array<i64: 1, 16, 16, 4>}, {pipeline_mode = #tpu.pipeline_mode<synchronous>, transform_indices = @transform_1, window_bounds = array<i64: 36, 8>}, {pipeline_mode = #tpu.pipeline_mode<synchronous>, transform_indices = @transform_2, window_bounds = array<i64: 72, 8>}, {pipeline_mode = #tpu.pipeline_mode<synchronous>, transform_indices = @transform_3, window_bounds = array<i64: 4, 8>}, {pipeline_mode = #tpu.pipeline_mode<synchronous>, transform_indices = @transform_4, window_bounds = array<i64: 1, 4>}, {pipeline_mode = #tpu.pipeline_mode<synchronous>, transform_indices = @transform_5, window_bounds = array<i64: 1, 4>}, {pipeline_mode = #tpu.pipeline_mode<synchronous>, transform_indices = @transform_6, window_bounds = array<i64: 1, 8>}, {pipeline_mode = #tpu.pipeline_mode<synchronous>, transform_indices = @transform_7, window_bounds = array<i64: 1, 8>}, {pipeline_mode = #tpu.pipeline_mode<synchronous>, transform_indices = @transform_8, window_bounds = array<i64: 1, 8>}, {pipeline_mode = #tpu.pipeline_mode<synchronous>, transform_indices = @transform_9, window_bounds = array<i64: 1, 8>}, {pipeline_mode = #tpu.pipeline_mode<synchronous>, transform_indices = @transform_10, window_bounds = array<i64: 1, 8>}, {transform_indices = @transform_11, window_bounds = array<i64: 1, 8, 8, 8>}]} {
    %cst = arith.constant 0.000000e+00 : f32
    %0 = vector.broadcast %cst : f32 to vector<1x18x4xf32>
    %c0 = arith.constant 0 : index
    %c0_0 = arith.constant 0 : index
    %c0_1 = arith.constant 0 : index
    %1 = vector.load %arg13[%c0, %c0_0, %c0_1] : memref<18x18x4xf32, #tpu.memory_space<vmem>>, vector<1x18x4xf32>
    tpu.vector_store %arg13[%c0, %c0_0, %c0_1], %0 {strides = array<i32>} : memref<18x18x4xf32, #tpu.memory_space<vmem>>, vector<1x18x4xf32>,
    %cst_2 = arith.constant 0.000000e+00 : f32
    %2 = vector.broadcast %cst_2 : f32 to vector<1x18x4xf32>
    %c17 = arith.constant 17 : index
    %c0_3 = arith.constant 0 : index
    %c0_4 = arith.constant 0 : index
    %3 = vector.load %arg13[%c17, %c0_3, %c0_4] : memref<18x18x4xf32, #tpu.memory_space<vmem>>, vector<1x18x4xf32>
    tpu.vector_store %arg13[%c17, %c0_3, %c0_4], %2 {strides = array<i32>} : memref<18x18x4xf32, #tpu.memory_space<vmem>>, vector<1x18x4xf32>,
    %cst_5 = arith.constant 0.000000e+00 : f32
    %4 = vector.broadcast %cst_5 : f32 to vector<18x1x4xf32>
    %c0_6 = arith.constant 0 : index
    %c0_7 = arith.constant 0 : index
    %c0_8 = arith.constant 0 : index
    %5 = vector.load %arg13[%c0_6, %c0_7, %c0_8] : memref<18x18x4xf32, #tpu.memory_space<vmem>>, vector<18x1x4xf32>
    tpu.vector_store %arg13[%c0_6, %c0_7, %c0_8], %4 {strides = array<i32>} : memref<18x18x4xf32, #tpu.memory_space<vmem>>, vector<18x1x4xf32>,
    %cst_9 = arith.constant 0.000000e+00 : f32
    %6 = vector.broadcast %cst_9 : f32 to vector<18x1x4xf32>
    %c0_10 = arith.constant 0 : index
    %c17_11 = arith.constant 17 : index
    %c0_12 = arith.constant 0 : index
    %7 = vector.load %arg13[%c0_10, %c17_11, %c0_12] : memref<18x18x4xf32, #tpu.memory_space<vmem>>, vector<18x1x4xf32>
    tpu.vector_store %arg13[%c0_10, %c17_11, %c0_12], %6 {strides = array<i32>} : memref<18x18x4xf32, #tpu.memory_space<vmem>>, vector<18x1x4xf32>,
    %cst_13 = arith.constant 0.000000e+00 : f32
    %8 = vector.broadcast %cst_13 : f32 to vector<1x18x8xf32>
    %c0_14 = arith.constant 0 : index
    %c0_15 = arith.constant 0 : index
    %c0_16 = arith.constant 0 : index
    %9 = vector.load %arg14[%c0_14, %c0_15, %c0_16] : memref<18x18x8xf32, #tpu.memory_space<vmem>>, vector<1x18x8xf32>
    tpu.vector_store %arg14[%c0_14, %c0_15, %c0_16], %8 {strides = array<i32>} : memref<18x18x8xf32, #tpu.memory_space<vmem>>, vector<1x18x8xf32>,
    %cst_17 = arith.constant 0.000000e+00 : f32
    %10 = vector.broadcast %cst_17 : f32 to vector<1x18x8xf32>
    %c17_18 = arith.constant 17 : index
    %c0_19 = arith.constant 0 : index
    %c0_20 = arith.constant 0 : index
    %11 = vector.load %arg14[%c17_18, %c0_19, %c0_20] : memref<18x18x8xf32, #tpu.memory_space<vmem>>, vector<1x18x8xf32>
    tpu.vector_store %arg14[%c17_18, %c0_19, %c0_20], %10 {strides = array<i32>} : memref<18x18x8xf32, #tpu.memory_space<vmem>>, vector<1x18x8xf32>,
    %cst_21 = arith.constant 0.000000e+00 : f32
    %12 = vector.broadcast %cst_21 : f32 to vector<18x1x8xf32>
    %c0_22 = arith.constant 0 : index
    %c0_23 = arith.constant 0 : index
    %c0_24 = arith.constant 0 : index
    %13 = vector.load %arg14[%c0_22, %c0_23, %c0_24] : memref<18x18x8xf32, #tpu.memory_space<vmem>>, vector<18x1x8xf32>
    tpu.vector_store %arg14[%c0_22, %c0_23, %c0_24], %12 {strides = array<i32>} : memref<18x18x8xf32, #tpu.memory_space<vmem>>, vector<18x1x8xf32>,
    %cst_25 = arith.constant 0.000000e+00 : f32
    %14 = vector.broadcast %cst_25 : f32 to vector<18x1x8xf32>
    %c0_26 = arith.constant 0 : index
    %c17_27 = arith.constant 17 : index
    %c0_28 = arith.constant 0 : index
    %15 = vector.load %arg14[%c0_26, %c17_27, %c0_28] : memref<18x18x8xf32, #tpu.memory_space<vmem>>, vector<18x1x8xf32>
    tpu.vector_store %arg14[%c0_26, %c17_27, %c0_28], %14 {strides = array<i32>} : memref<18x18x8xf32, #tpu.memory_space<vmem>>, vector<18x1x8xf32>,
    %c0_29 = arith.constant 0 : index
    %c0_30 = arith.constant 0 : index
    %c0_31 = arith.constant 0 : index
    %c0_32 = arith.constant 0 : index
    %16 = vector.load %arg1[%c0_29, %c0_30, %c0_31, %c0_32] : memref<1x16x16x4xf32, #tpu.memory_space<vmem>>, vector<1x16x16x4xf32>
    %17 = vector.shape_cast %16 : vector<1x16x16x4xf32> to vector<16x16x4xf32>
    %c0_33 = arith.constant 0 : index
    %c0_34 = arith.constant 0 : index
    %18 = vector.load %arg5[%c0_33, %c0_34] : memref<1x4xf32, #tpu.memory_space<vmem>>, vector<1x4xf32>
    %19 = vector.shape_cast %18 : vector<1x4xf32> to vector<1x1x4xf32>
    %20 = vector.broadcast %19 : vector<1x1x4xf32> to vector<16x16x4xf32>
    %21 = arith.mulf %17, %20 : vector<16x16x4xf32>
    %c0_35 = arith.constant 0 : index
    %c0_36 = arith.constant 0 : index
    %22 = vector.load %arg6[%c0_35, %c0_36] : memref<1x4xf32, #tpu.memory_space<vmem>>, vector<1x4xf32>
    %23 = vector.shape_cast %22 : vector<1x4xf32> to vector<1x1x4xf32>
    %24 = vector.broadcast %23 : vector<1x1x4xf32> to vector<16x16x4xf32>
    %25 = arith.addf %21, %24 : vector<16x16x4xf32>
    %c1 = arith.constant 1 : index
    %c1_37 = arith.constant 1 : index
    %c0_38 = arith.constant 0 : index
    %26 = vector.load %arg13[%c1, %c1_37, %c0_38] : memref<18x18x4xf32, #tpu.memory_space<vmem>>, vector<16x16x4xf32>
    tpu.vector_store %arg13[%c1, %c1_37, %c0_38], %25 {strides = array<i32>} : memref<18x18x4xf32, #tpu.memory_space<vmem>>, vector<16x16x4xf32>,
    %c0_39 = arith.constant 0 : index
    %c0_40 = arith.constant 0 : index
    %c0_41 = arith.constant 0 : index
    %27 = vector.load %arg13[%c0_39, %c0_40, %c0_41] : memref<18x18x4xf32, #tpu.memory_space<vmem>>, vector<16x16x4xf32>
    %28 = vector.shape_cast %27 : vector<16x16x4xf32> to vector<256x4xf32>
    %c0_42 = arith.constant 0 : index
    %c1_43 = arith.constant 1 : index
    %c0_44 = arith.constant 0 : index
    %29 = vector.load %arg13[%c0_42, %c1_43, %c0_44] : memref<18x18x4xf32, #tpu.memory_space<vmem>>, vector<16x16x4xf32>
    %30 = vector.shape_cast %29 : vector<16x16x4xf32> to vector<256x4xf32>
    %c0_45 = arith.constant 0 : index
    %c2 = arith.constant 2 : index
    %c0_46 = arith.constant 0 : index
    %31 = vector.load %arg13[%c0_45, %c2, %c0_46] : memref<18x18x4xf32, #tpu.memory_space<vmem>>, vector<16x16x4xf32>
    %32 = vector.shape_cast %31 : vector<16x16x4xf32> to vector<256x4xf32>
    %c1_47 = arith.constant 1 : index
    %c0_48 = arith.constant 0 : index
    %c0_49 = arith.constant 0 : index
    %33 = vector.load %arg13[%c1_47, %c0_48, %c0_49] : memref<18x18x4xf32, #tpu.memory_space<vmem>>, vector<16x16x4xf32>
    %34 = vector.shape_cast %33 : vector<16x16x4xf32> to vector<256x4xf32>
    %c1_50 = arith.constant 1 : index
    %c1_51 = arith.constant 1 : index
    %c0_52 = arith.constant 0 : index
    %35 = vector.load %arg13[%c1_50, %c1_51, %c0_52] : memref<18x18x4xf32, #tpu.memory_space<vmem>>, vector<16x16x4xf32>
    %36 = vector.shape_cast %35 : vector<16x16x4xf32> to vector<256x4xf32>
    %c1_53 = arith.constant 1 : index
    %c2_54 = arith.constant 2 : index
    %c0_55 = arith.constant 0 : index
    %37 = vector.load %arg13[%c1_53, %c2_54, %c0_55] : memref<18x18x4xf32, #tpu.memory_space<vmem>>, vector<16x16x4xf32>
    %38 = vector.shape_cast %37 : vector<16x16x4xf32> to vector<256x4xf32>
    %c2_56 = arith.constant 2 : index
    %c0_57 = arith.constant 0 : index
    %c0_58 = arith.constant 0 : index
    %39 = vector.load %arg13[%c2_56, %c0_57, %c0_58] : memref<18x18x4xf32, #tpu.memory_space<vmem>>, vector<16x16x4xf32>
    %40 = vector.shape_cast %39 : vector<16x16x4xf32> to vector<256x4xf32>
    %c2_59 = arith.constant 2 : index
    %c1_60 = arith.constant 1 : index
    %c0_61 = arith.constant 0 : index
    %41 = vector.load %arg13[%c2_59, %c1_60, %c0_61] : memref<18x18x4xf32, #tpu.memory_space<vmem>>, vector<16x16x4xf32>
    %42 = vector.shape_cast %41 : vector<16x16x4xf32> to vector<256x4xf32>
    %c2_62 = arith.constant 2 : index
    %c2_63 = arith.constant 2 : index
    %c0_64 = arith.constant 0 : index
    %43 = vector.load %arg13[%c2_62, %c2_63, %c0_64] : memref<18x18x4xf32, #tpu.memory_space<vmem>>, vector<16x16x4xf32>
    %44 = vector.shape_cast %43 : vector<16x16x4xf32> to vector<256x4xf32>
    %45 = tpu.concatenate %28, %30, %32, %34, %36, %38, %40, %42, %44 in 1 : vector<256x4xf32>, vector<256x4xf32>, vector<256x4xf32>, vector<256x4xf32>, vector<256x4xf32>, vector<256x4xf32>, vector<256x4xf32>, vector<256x4xf32>, vector<256x4xf32> -> vector<256x36xf32>
    %46 = arith.truncf %45 : vector<256x36xf32> to vector<256x36xbf16>
    %c0_65 = arith.constant 0 : index
    %c0_66 = arith.constant 0 : index
    %47 = vector.load %arg2[%c0_65, %c0_66] : memref<36x8xbf16, #tpu.memory_space<vmem>>, vector<36x8xbf16>
    %cst_67 = arith.constant dense<0.000000e+00> : vector<256x8xf32>
    %48 = tpu.matmul %46, %47, %cst_67 {dimension_numbers = #tpu.dot_dimension_numbers<[1], [0], [0], [1], [0, 0, 1, 1], [], []>} : vector<256x36xbf16>, vector<36x8xbf16>, vector<256x8xf32> -> vector<256x8xf32>
    %cst_68 = arith.constant 0.000000e+00 : f32
    %49 = vector.broadcast %cst_68 : f32 to vector<256x8xf32>
    %50 = arith.cmpf ogt, %48, %49 : vector<256x8xf32>
    %c0_69 = arith.constant 0 : index
    %c0_70 = arith.constant 0 : index
    %51 = vector.load %arg7[%c0_69, %c0_70] : memref<1x8xf32, #tpu.memory_space<vmem>>, vector<1x8xf32>
    %52 = vector.broadcast %51 : vector<1x8xf32> to vector<256x8xf32>
    %53 = arith.mulf %52, %48 : vector<256x8xf32>
    %54 = arith.select %50, %48, %53 : vector<256x8xi1>, vector<256x8xf32>
    %55 = vector.shape_cast %54 : vector<256x8xf32> to vector<16x16x8xf32>
    %c1_71 = arith.constant 1 : index
    %c1_72 = arith.constant 1 : index
    %c0_73 = arith.constant 0 : index
    %56 = vector.load %arg14[%c1_71, %c1_72, %c0_73] : memref<18x18x8xf32, #tpu.memory_space<vmem>>, vector<16x16x8xf32>
    tpu.vector_store %arg14[%c1_71, %c1_72, %c0_73], %55 {strides = array<i32>} : memref<18x18x8xf32, #tpu.memory_space<vmem>>, vector<16x16x8xf32>,
    %c0_74 = arith.constant 0 : index
    %c0_75 = arith.constant 0 : index
    %c0_76 = arith.constant 0 : index
    %57 = tpu.strided_load %arg14[%c0_74, %c0_75, %c0_76] {strides = array<i32: 2, 2, 1>} : memref<18x18x8xf32, #tpu.memory_space<vmem>>, vector<8x8x8xf32>
    %58 = vector.shape_cast %57 : vector<8x8x8xf32> to vector<64x8xf32>
    %c0_77 = arith.constant 0 : index
    %c1_78 = arith.constant 1 : index
    %c0_79 = arith.constant 0 : index
    %59 = tpu.strided_load %arg14[%c0_77, %c1_78, %c0_79] {strides = array<i32: 2, 2, 1>} : memref<18x18x8xf32, #tpu.memory_space<vmem>>, vector<8x8x8xf32>
    %60 = vector.shape_cast %59 : vector<8x8x8xf32> to vector<64x8xf32>
    %c0_80 = arith.constant 0 : index
    %c2_81 = arith.constant 2 : index
    %c0_82 = arith.constant 0 : index
    %61 = tpu.strided_load %arg14[%c0_80, %c2_81, %c0_82] {strides = array<i32: 2, 2, 1>} : memref<18x18x8xf32, #tpu.memory_space<vmem>>, vector<8x8x8xf32>
    %62 = vector.shape_cast %61 : vector<8x8x8xf32> to vector<64x8xf32>
    %c1_83 = arith.constant 1 : index
    %c0_84 = arith.constant 0 : index
    %c0_85 = arith.constant 0 : index
    %63 = tpu.strided_load %arg14[%c1_83, %c0_84, %c0_85] {strides = array<i32: 2, 2, 1>} : memref<18x18x8xf32, #tpu.memory_space<vmem>>, vector<8x8x8xf32>
    %64 = vector.shape_cast %63 : vector<8x8x8xf32> to vector<64x8xf32>
    %c1_86 = arith.constant 1 : index
    %c1_87 = arith.constant 1 : index
    %c0_88 = arith.constant 0 : index
    %65 = tpu.strided_load %arg14[%c1_86, %c1_87, %c0_88] {strides = array<i32: 2, 2, 1>} : memref<18x18x8xf32, #tpu.memory_space<vmem>>, vector<8x8x8xf32>
    %66 = vector.shape_cast %65 : vector<8x8x8xf32> to vector<64x8xf32>
    %c1_89 = arith.constant 1 : index
    %c2_90 = arith.constant 2 : index
    %c0_91 = arith.constant 0 : index
    %67 = tpu.strided_load %arg14[%c1_89, %c2_90, %c0_91] {strides = array<i32: 2, 2, 1>} : memref<18x18x8xf32, #tpu.memory_space<vmem>>, vector<8x8x8xf32>
    %68 = vector.shape_cast %67 : vector<8x8x8xf32> to vector<64x8xf32>
    %c2_92 = arith.constant 2 : index
    %c0_93 = arith.constant 0 : index
    %c0_94 = arith.constant 0 : index
    %69 = tpu.strided_load %arg14[%c2_92, %c0_93, %c0_94] {strides = array<i32: 2, 2, 1>} : memref<18x18x8xf32, #tpu.memory_space<vmem>>, vector<8x8x8xf32>
    %70 = vector.shape_cast %69 : vector<8x8x8xf32> to vector<64x8xf32>
    %c2_95 = arith.constant 2 : index
    %c1_96 = arith.constant 1 : index
    %c0_97 = arith.constant 0 : index
    %71 = tpu.strided_load %arg14[%c2_95, %c1_96, %c0_97] {strides = array<i32: 2, 2, 1>} : memref<18x18x8xf32, #tpu.memory_space<vmem>>, vector<8x8x8xf32>
    %72 = vector.shape_cast %71 : vector<8x8x8xf32> to vector<64x8xf32>
    %c2_98 = arith.constant 2 : index
    %c2_99 = arith.constant 2 : index
    %c0_100 = arith.constant 0 : index
    %73 = tpu.strided_load %arg14[%c2_98, %c2_99, %c0_100] {strides = array<i32: 2, 2, 1>} : memref<18x18x8xf32, #tpu.memory_space<vmem>>, vector<8x8x8xf32>
    %74 = vector.shape_cast %73 : vector<8x8x8xf32> to vector<64x8xf32>
    %75 = tpu.concatenate %58, %60, %62, %64, %66, %68, %70, %72, %74 in 1 : vector<64x8xf32>, vector<64x8xf32>, vector<64x8xf32>, vector<64x8xf32>, vector<64x8xf32>, vector<64x8xf32>, vector<64x8xf32>, vector<64x8xf32>, vector<64x8xf32> -> vector<64x72xf32>
    %76 = arith.truncf %75 : vector<64x72xf32> to vector<64x72xbf16>
    %c0_101 = arith.constant 0 : index
    %c0_102 = arith.constant 0 : index
    %77 = vector.load %arg3[%c0_101, %c0_102] : memref<72x8xbf16, #tpu.memory_space<vmem>>, vector<72x8xbf16>
    %cst_103 = arith.constant dense<0.000000e+00> : vector<64x8xf32>
    %78 = tpu.matmul %76, %77, %cst_103 {dimension_numbers = #tpu.dot_dimension_numbers<[1], [0], [0], [1], [0, 0, 1, 1], [], []>} : vector<64x72xbf16>, vector<72x8xbf16>, vector<64x8xf32> -> vector<64x8xf32>
    %c0_104 = arith.constant 0 : index
    %c0_105 = arith.constant 0 : index
    %79 = vector.load %arg8[%c0_104, %c0_105] : memref<1x8xf32, #tpu.memory_space<vmem>>, vector<1x8xf32>
    %80 = vector.broadcast %79 : vector<1x8xf32> to vector<64x8xf32>
    %81 = arith.mulf %78, %80 : vector<64x8xf32>
    %c0_106 = arith.constant 0 : index
    %c0_107 = arith.constant 0 : index
    %82 = vector.load %arg9[%c0_106, %c0_107] : memref<1x8xf32, #tpu.memory_space<vmem>>, vector<1x8xf32>
    %83 = vector.broadcast %82 : vector<1x8xf32> to vector<64x8xf32>
    %84 = arith.addf %81, %83 : vector<64x8xf32>
    %c0_108 = arith.constant 0 : index
    %c0_109 = arith.constant 0 : index
    %c0_110 = arith.constant 0 : index
    %c0_111 = arith.constant 0 : index
    %85 = tpu.strided_load %arg1[%c0_108, %c0_109, %c0_110, %c0_111] {strides = array<i32: 1, 2, 2, 1>} : memref<1x16x16x4xf32, #tpu.memory_space<vmem>>, vector<1x8x8x4xf32>
    %86 = vector.shape_cast %85 : vector<1x8x8x4xf32> to vector<64x4xf32>
    %87 = arith.truncf %86 : vector<64x4xf32> to vector<64x4xbf16>
    %c0_112 = arith.constant 0 : index
    %c0_113 = arith.constant 0 : index
    %88 = vector.load %arg4[%c0_112, %c0_113] : memref<4x8xbf16, #tpu.memory_space<vmem>>, vector<4x8xbf16>
    %cst_114 = arith.constant dense<0.000000e+00> : vector<64x8xf32>
    %89 = tpu.matmul %87, %88, %cst_114 {dimension_numbers = #tpu.dot_dimension_numbers<[1], [0], [0], [1], [0, 0, 1, 1], [], []>} : vector<64x4xbf16>, vector<4x8xbf16>, vector<64x8xf32> -> vector<64x8xf32>
    %c0_115 = arith.constant 0 : index
    %c0_116 = arith.constant 0 : index
    %90 = vector.load %arg10[%c0_115, %c0_116] : memref<1x8xf32, #tpu.memory_space<vmem>>, vector<1x8xf32>
    %91 = vector.broadcast %90 : vector<1x8xf32> to vector<64x8xf32>
    %92 = arith.mulf %89, %91 : vector<64x8xf32>
    %c0_117 = arith.constant 0 : index
    %c0_118 = arith.constant 0 : index
    %93 = vector.load %arg11[%c0_117, %c0_118] : memref<1x8xf32, #tpu.memory_space<vmem>>, vector<1x8xf32>
    %94 = vector.broadcast %93 : vector<1x8xf32> to vector<64x8xf32>
    %95 = arith.addf %92, %94 : vector<64x8xf32>
    %96 = arith.addf %84, %95 : vector<64x8xf32>
    %97 = vector.shape_cast %96 : vector<64x8xf32> to vector<1x8x8x8xf32>
    %c0_119 = arith.constant 0 : index
    %c0_120 = arith.constant 0 : index
    %c0_121 = arith.constant 0 : index
    %c0_122 = arith.constant 0 : index
    %98 = vector.load %arg12[%c0_119, %c0_120, %c0_121, %c0_122] : memref<1x8x8x8xf32, #tpu.memory_space<vmem>>, vector<1x8x8x8xf32>
    tpu.vector_store %arg12[%c0_119, %c0_120, %c0_121, %c0_122], %97 {strides = array<i32>} : memref<1x8x8x8xf32, #tpu.memory_space<vmem>>, vector<1x8x8x8xf32>,
    return
  }
  func.func @transform_0(%arg0: i32) -> (i32, i32, i32, i32) {
    %c0_i32 = arith.constant 0 : i32
    %c0_i32_0 = arith.constant 0 : i32
    %c0_i32_1 = arith.constant 0 : i32
    %c0_i32_2 = arith.constant 0 : i32
    return %arg0, %c0_i32, %c0_i32_0, %c0_i32_1 : i32, i32, i32, i32
  }
  func.func @transform_1(%arg0: i32) -> (i32, i32) {
    %c0_i32 = arith.constant 0 : i32
    %c0_i32_0 = arith.constant 0 : i32
    %c0_i32_1 = arith.constant 0 : i32
    return %c0_i32, %c0_i32_0 : i32, i32
  }
  func.func @transform_2(%arg0: i32) -> (i32, i32) {
    %c0_i32 = arith.constant 0 : i32
    %c0_i32_0 = arith.constant 0 : i32
    %c0_i32_1 = arith.constant 0 : i32
    return %c0_i32, %c0_i32_0 : i32, i32
  }
  func.func @transform_3(%arg0: i32) -> (i32, i32) {
    %c0_i32 = arith.constant 0 : i32
    %c0_i32_0 = arith.constant 0 : i32
    %c0_i32_1 = arith.constant 0 : i32
    return %c0_i32, %c0_i32_0 : i32, i32
  }
  func.func @transform_4(%arg0: i32) -> (i32, i32) {
    %c0_i32 = arith.constant 0 : i32
    %c0_i32_0 = arith.constant 0 : i32
    %c0_i32_1 = arith.constant 0 : i32
    return %c0_i32, %c0_i32_0 : i32, i32
  }
  func.func @transform_5(%arg0: i32) -> (i32, i32) {
    %c0_i32 = arith.constant 0 : i32
    %c0_i32_0 = arith.constant 0 : i32
    %c0_i32_1 = arith.constant 0 : i32
    return %c0_i32, %c0_i32_0 : i32, i32
  }
  func.func @transform_6(%arg0: i32) -> (i32, i32) {
    %c0_i32 = arith.constant 0 : i32
    %c0_i32_0 = arith.constant 0 : i32
    %c0_i32_1 = arith.constant 0 : i32
    return %c0_i32, %c0_i32_0 : i32, i32
  }
  func.func @transform_7(%arg0: i32) -> (i32, i32) {
    %c0_i32 = arith.constant 0 : i32
    %c0_i32_0 = arith.constant 0 : i32
    %c0_i32_1 = arith.constant 0 : i32
    return %c0_i32, %c0_i32_0 : i32, i32
  }
  func.func @transform_8(%arg0: i32) -> (i32, i32) {
    %c0_i32 = arith.constant 0 : i32
    %c0_i32_0 = arith.constant 0 : i32
    %c0_i32_1 = arith.constant 0 : i32
    return %c0_i32, %c0_i32_0 : i32, i32
  }
  func.func @transform_9(%arg0: i32) -> (i32, i32) {
    %c0_i32 = arith.constant 0 : i32
    %c0_i32_0 = arith.constant 0 : i32
    %c0_i32_1 = arith.constant 0 : i32
    return %c0_i32, %c0_i32_0 : i32, i32
  }
  func.func @transform_10(%arg0: i32) -> (i32, i32) {
    %c0_i32 = arith.constant 0 : i32
    %c0_i32_0 = arith.constant 0 : i32
    %c0_i32_1 = arith.constant 0 : i32
    return %c0_i32, %c0_i32_0 : i32, i32
  }
  func.func @transform_11(%arg0: i32) -> (i32, i32, i32, i32) {
    %c0_i32 = arith.constant 0 : i32
    %c0_i32_0 = arith.constant 0 : i32
    %c0_i32_1 = arith.constant 0 : i32
    %c0_i32_2 = arith.constant 0 : i32
    return %arg0, %c0_i32, %c0_i32_0, %c0_i32_1 : i32, i32, i32, i32
  }
}

</mosaic_0001>

<bundles_post_ra>
// kernel: tpu_custom_call.1
= control target key start
LH: loop header
LB: loop body
LE: loop exit
PB: predicated region body
PF: predicated region fallthrough
CT: control target
= control target key end

     0   :  { %s5973_s0 = inlined_call_operand.vmem [shape: f32[2,16,16,4], index: 0, kind: input, shape index: {}]   ;;  %s5974_s1 = inlined_call_operand.vmem [shape: bf16[36,8], index: 1, kind: input, shape index: {}]   ;;  %s5975_s2 = inlined_call_operand.vmem [shape: bf16[72,8], index: 2, kind: input, shape index: {}]   ;;  %s5976_s3 = inlined_call_operand.vmem [shape: bf16[4,8], index: 3, kind: input, shape index: {}]   ;;  %s5977_s4 = inlined_call_operand.vmem [shape: f32[1,4], index: 4, kind: input, shape index: {}]   ;;  %s5978_s5 = inlined_call_operand.vmem [shape: f32[1,4], index: 5, kind: input, shape index: {}]   ;;  %s5979_s6 = inlined_call_operand.vmem [shape: f32[1,8], index: 6, kind: input, shape index: {}]   ;;  %s5980_s7 = inlined_call_operand.vmem [shape: f32[1,8], index: 7, kind: input, shape index: {}]   ;;  %s5981_s8 = inlined_call_operand.vmem [shape: f32[1,8], index: 8, kind: input, shape index: {}]   ;;  %s5982_s9 = inlined_call_operand.vmem [shape: f32[1,8], index: 9, kind: input, shape index: {}]   ;;  %s5983_s10 = inlined_call_operand.vmem [shape: f32[1,8], index: 10, kind: input, shape index: {}]   ;;  %s5984_s11 = inlined_call_operand.hbm [shape: f32[2,8,8,8], index: 11, kind: output, shape index: {}]  }
   0x1   :  { %5999 = sst [smem:[#allocation7_spill]] %s5973_s0 }
   0x2   :  { %16 = vsyncpa [#allocation5], 0 }
   0x3   :  { %18 = vsyncpa [#allocation5 + $0x1], 0  ;;  %s4634_s17 = smov 0   ;;  %s4636_s18 = smov 0  }
   0x4   :  { %s4638_s19 = smov 0   ;;  %s4640_s20 = smov 0  }
   0x5 LB: > { %s4655_s21 = sadd.s32 4294967295, %s4557_s20   ;;  %s3468_s22 = sadd.s32 4294967294, %s4557_s20   ;;  %s4557_s20 = sphi %s4640_s20, %s6013_s20   ;;  %s4553_s19 = sphi %s4638_s19, %s6012_s19   ;;  %s4549_s18 = sphi %s4636_s18, %s6011_s18   ;;  %s4545_s17 = sphi %s4634_s17, %s6010_s17  }
   0x6   : > { %s4659_s23 = sadd.s32 1, %s4557_s20   ;;  %s267_s24 = sadd.s32 1, %s4553_s19 }
   0x7   : > { %s264_s25 = ssub.s32 %s4557_s20, %s4659_s23  ;;  %p277_p0 = scmp.ne.s32.totalorder %s4553_s19, %s4549_s18 }
   0x8   : > { %p265_p1 = scmp.eq.s32.totalorder %s264_s25, 0  ;;  %p278_p2 = scmp.eq.s32.totalorder %s4655_s21, 1 }
   0x9   : > { %p283_p3 = scmp.ne.s32.totalorder %s4549_s18, %s4545_s17  ;;  %p284_p4 = scmp.eq.s32.totalorder %s3468_s22, 1 }
   0xa   : > { %s4670_s26 = scalar_select %p265_p1, %s4553_s19, %s267_s24  }
   0xb   : > { %p4672_p5 = por %p278_p2, %p277_p0  ;;  %p4676_p6 = por %p284_p4, %p283_p3 }
   0xc   : > { %p3471_p7 = scmp.ge.s32.totalorder %s4557_s20, 1  ;;  %p340_p8 = scmp.lt.s32.totalorder %s4557_s20, 3 }
   0xe   : > { %p341_p9 = pnand %p3471_p7, %p340_p8 }
   0xf   : > { %vm386_vm0 = vcmask (!%p341_p9), 31744   ;;  %vm389_vm1 = vcmask (!%p341_p9), 25600   ;;  %vm395_vm2 = vcmask (!%p341_p9), 24576   ;;  %v4559_v0 = vmov (!%p341_p9), 0.0   ;;  %p380_p10 = scmp.lt.s32.totalorder (!%p341_p9), %s4655_s21, 1  ;;  %s6002_s0 = sld [smem:[#allocation7_spill]] (!%p341_p9) }
  0x10   : > { %344 = sbr.rel (%p341_p9) target bundleno = 1038 (0x40e), region = 64  ;;  %387 = vst.msk [vmem:[#allocation2] sm:$0xff] (!%p341_p9), %vm386_vm0, %v4559_v0  ;;  %388 = vst.msk [vmem:[#allocation2 + $0x8] sm:$0xff] (!%p341_p9), %vm386_vm0, %v4559_v0  ;;  %v4769_v1 = vld [vmem:[%s5977_s4] ss:$0 sm:$0xff] (!%p341_p9)  ;;  %vm432_vm3 = vcmask (!%p341_p9), 64512  }
  0x11   : > { %390 = vst.msk [vmem:[#allocation2 + $0x10] sm:$0x3] (!%p341_p9), %vm389_vm1, %v4559_v0  ;;  %394 = vst.msk [vmem:[#allocation2 + $0x1a8] sm:$0x3] (!%p341_p9), %vm389_vm1, %v4559_v0  ;;  %v4774_v2 = vld [vmem:[%s5978_s5] ss:$0 sm:$0xff] (!%p341_p9) }
  0x12   : > { %392 = vst.msk [vmem:[#allocation2 + $0x198] sm:$0xff] (!%p341_p9), %vm386_vm0, %v4559_v0  ;;  %393 = vst.msk [vmem:[#allocation2 + $0x1a0] sm:$0xff] (!%p341_p9), %vm386_vm0, %v4559_v0  ;;  %s4560_s25 = smov (!%p341_p9), 4   ;;  %s4562_s30 = smov (!%p341_p9), 12   ;;  %vm2281_vm4 = vcmask (!%p341_p9), 1041408   ;;  %vm1998_vm5 = vcmask (!%p341_p9), 97280  }
  0x13   : > { %397 = vst.msk [vmem:[#allocation2 + $0x18] sm:$0x1] (!%p341_p9), %vm395_vm2, %v4559_v0  ;;  %398 = vst.msk [vmem:[#allocation2 + $0x30] sm:$0x1] (!%p341_p9), %vm395_vm2, %v4559_v0  ;;  %s5985_s12 = smov (!%p341_p9), 16   ;;  %s4565_s16 = smov (!%p341_p9), 24  }
  0x14   : > { %399 = vst.msk [vmem:[#allocation2 + $0x48] sm:$0x1] (!%p341_p9), %vm395_vm2, %v4559_v0  ;;  %400 = vst.msk [vmem:[#allocation2 + $0x60] sm:$0x1] (!%p341_p9), %vm395_vm2, %v4559_v0  ;;  %s4566_s15 = smov (!%p341_p9), 28   ;;  %s6004_s22 = smov (!%p341_p9), 20  }
  0x15   : > { %401 = vst.msk [vmem:[#allocation2 + $0x78] sm:$0x1] (!%p341_p9), %vm395_vm2, %v4559_v0  ;;  %402 = vst.msk [vmem:[#allocation2 + $0x90] sm:$0x1] (!%p341_p9), %vm395_vm2, %v4559_v0  ;;  %vm2031_vm6 = vcmask (!%p341_p9), 130048   ;;  %vm2064_vm7 = vcmask (!%p341_p9), 162816  }
  0x16   : > { %403 = vst.msk [vmem:[#allocation2 + $0xa8] sm:$0x1] (!%p341_p9), %vm395_vm2, %v4559_v0  ;;  %404 = vst.msk [vmem:[#allocation2 + $0xc0] sm:$0x1] (!%p341_p9), %vm395_vm2, %v4559_v0  ;;  %vm2097_vm8 = vcmask (!%p341_p9), 195584   ;;  %vm2130_vm9 = vcmask (!%p341_p9), 228352  }
  0x17   : > { %405 = vst.msk [vmem:[#allocation2 + $0xd8] sm:$0x1] %vm395_vm2, %v4559_v0  ;;  %406 = vst.msk [vmem:[#allocation2 + $0xf0] sm:$0x1] %vm395_vm2, %v4559_v0  ;;  %s381_s29 = scalar_select %p380_p10, %s4655_s21, 1  ;;  %v685_v6 = vld [vmem:[#allocation2 + $0x2] sm:$0xff] }
  0x18   : > { %407 = vst.msk [vmem:[#allocation2 + $0x108] sm:$0x1] %vm395_vm2, %v4559_v0  ;;  %408 = vst.msk [vmem:[#allocation2 + $0x120] sm:$0x1] %vm395_vm2, %v4559_v0  ;;  %v653_v7 = vld [vmem:[#allocation2 + $0x1] sm:$0xff]  ;;  %v654_v8 = vld [vmem:[#allocation2 + $0x9] sm:$0xff] }
  0x19   : > { %409 = vst.msk [vmem:[#allocation2 + $0x138] sm:$0x1] %vm395_vm2, %v4559_v0  ;;  %410 = vst.msk [vmem:[#allocation2 + $0x150] sm:$0x1] %vm395_vm2, %v4559_v0  ;;  %s3526_s13 = sshll.u32 %s381_s29, 8  ;;  %v3683_v13 = vpack.i.bf16 %v654_v8, %v653_v7  ;;  %s5989_s29 = smov 8  }
  0x1a   : > { %411 = vst.msk [vmem:[#allocation2 + $0x168] sm:$0x1] %vm395_vm2, %v4559_v0  ;;  %412 = vst.msk [vmem:[#allocation2 + $0x180] sm:$0x1] %vm395_vm2, %v4559_v0  ;;  %s4779_s24 = scalar_lea.vmem %s6002_s0, %s3526_s13  ;;  %s5987_s13 = smov 20   ;;  %vm2163_vm10 = vcmask 261120  }
  0x1b   : > { %415 = vst.msk [vmem:[#allocation2 + $0x29] sm:$0x1] %vm395_vm2, %v4559_v0  ;;  %416 = vst.msk [vmem:[#allocation2 + $0x41] sm:$0x1] %vm395_vm2, %v4559_v0  ;;  %v478_v3 = vld [vmem:[%s4779_s24] sm:$0xff]  ;;  %v479_v4 = vld [vmem:[%s4779_s24 + $0x8] sm:$0xff]  ;;  %3684 = vrot.lane.b32.xlu0 %v3683_v13, %s4560_s25 }
  0x1c   : > { %417 = vst.msk [vmem:[#allocation2 + $0x59] sm:$0x1] %vm395_vm2, %v4559_v0  ;;  %418 = vst.msk [vmem:[#allocation2 + $0x71] sm:$0x1] %vm395_vm2, %v4559_v0  ;;  %v480_v5 = vld [vmem:[%s4779_s24 + $0x10] sm:$0xff]  ;;  %v517_v9 = vmul.f32 %v4769_v1, %v478_v3  ;;  %v518_v10 = vmul.f32 %v4769_v1, %v479_v4  ;;  %v481_v14 = vld [vmem:[%s4779_s24 + $0x18] sm:$0xff] }
  0x1d   : > { %419 = vst.msk [vmem:[#allocation2 + $0x89] sm:$0x1] %vm395_vm2, %v4559_v0  ;;  %420 = vst.msk [vmem:[#allocation2 + $0xa1] sm:$0x1] %vm395_vm2, %v4559_v0  ;;  %v519_v11 = vmul.f32 %v4769_v1, %v480_v5  ;;  %v482_v15 = vld [vmem:[%s4779_s24 + $0x20] sm:$0xff]  ;;  %v520_v19 = vmul.f32 %v4769_v1, %v481_v14  ;;  %v483_v20 = vld [vmem:[%s4779_s24 + $0x28] sm:$0xff] }
  0x1e   : > { %421 = vst.msk [vmem:[#allocation2 + $0xb9] sm:$0x1] %vm395_vm2, %v4559_v0  ;;  %422 = vst.msk [vmem:[#allocation2 + $0xd1] sm:$0x1] %vm395_vm2, %v4559_v0  ;;  %v556_v17 = vadd.f32 %v4774_v2, %v517_v9  ;;  %v557_v18 = vadd.f32 %v4774_v2, %v518_v10  ;;  %v484_v21 = vld [vmem:[%s4779_s24 + $0x30] sm:$0xff]  ;;  %v485_v22 = vld [vmem:[%s4779_s24 + $0x38] sm:$0xff]  ;;  %v521_v24 = vmul.f32 %v4769_v1, %v482_v15 }
  0x1f   : > { %423 = vst.msk [vmem:[#allocation2 + $0xe9] sm:$0x1] %vm395_vm2, %v4559_v0  ;;  %424 = vst.msk [vmem:[#allocation2 + $0x101] sm:$0x1] %vm395_vm2, %v4559_v0  ;;  %v558_v23 = vadd.f32 %v4774_v2, %v519_v11  ;;  %v522_v25 = vmul.f32 %v4769_v1, %v483_v20  ;;  %v523_v26 = vmul.f32 %v4769_v1, %v484_v21  ;;  %v486_v27 = vld [vmem:[%s4779_s24 + $0x40] sm:$0xff]  ;;  %v487_v28 = vld [vmem:[%s4779_s24 + $0x48] sm:$0xff] }
  0x20   : > { %425 = vst.msk [vmem:[#allocation2 + $0x119] sm:$0x1] %vm395_vm2, %v4559_v0  ;;  %426 = vst.msk [vmem:[#allocation2 + $0x131] sm:$0x1] %vm395_vm2, %v4559_v0  ;;  %v488_v29 = vld [vmem:[%s4779_s24 + $0x50] sm:$0xff]  ;;  %v559_v30 = vadd.f32 %v4774_v2, %v520_v19  ;;  %v524_v31 = vmul.f32 %v4769_v1, %v485_v22  ;;  %v525_v32 = vmul.f32 %v4769_v1, %v486_v27  ;;  %v489_v34 = vld [vmem:[%s4779_s24 + $0x58] sm:$0xff] }
  0x21   : > { %427 = vst.msk [vmem:[#allocation2 + $0x149] sm:$0x1] %vm395_vm2, %v4559_v0  ;;  %428 = vst.msk [vmem:[#allocation2 + $0x161] sm:$0x1] %vm395_vm2, %v4559_v0  ;;  %v526_v33 = vmul.f32 %v4769_v1, %v487_v28  ;;  %v490_v35 = vld [vmem:[%s4779_s24 + $0x60] sm:$0xff]  ;;  %v491_v36 = vld [vmem:[%s4779_s24 + $0x68] sm:$0xff]  ;;  %v560_v37 = vadd.f32 %v4774_v2, %v521_v24  ;;  %v561_v38 = vadd.f32 %v4774_v2, %v522_v25 }
  0x22   : > { %429 = vst.msk [vmem:[#allocation2 + $0x179] sm:$0x1] %vm395_vm2, %v4559_v0  ;;  %430 = vst.msk [vmem:[#allocation2 + $0x191] sm:$0x1] %vm395_vm2, %v4559_v0  ;;  %v562_v39 = vadd.f32 %v4774_v2, %v523_v26  ;;  %v527_v40 = vmul.f32 %v4769_v1, %v488_v29  ;;  %v492_v41 = vld [vmem:[%s4779_s24 + $0x70] sm:$0xff]  ;;  %v493_v42 = vld [vmem:[%s4779_s24 + $0x78] sm:$0xff]  ;;  %v563_v43 = vadd.f32 %v4774_v2, %v524_v31 }
  0x23   : > { %414 = vst.msk [vmem:[#allocation2 + $0x11] sm:$0x1] %vm395_vm2, %v4559_v0  ;;  %431 = vst.msk [vmem:[#allocation2 + $0x1a9] sm:$0x1] %vm395_vm2, %v4559_v0  ;;  %v564_v44 = vadd.f32 %v4774_v2, %v525_v32  ;;  %v565_v45 = vadd.f32 %v4774_v2, %v526_v33  ;;  %v528_v46 = vmul.f32 %v4769_v1, %v489_v34  ;;  %v494_v47 = vld [vmem:[%s4779_s24 + $0x80] sm:$0xff]  ;;  %v495_v48 = vld [vmem:[%s4779_s24 + $0x88] sm:$0xff] }
  0x24   : > { %396 = vst.msk [vmem:[#allocation2] sm:$0x1] %vm395_vm2, %v4559_v0  ;;  %413 = vst.msk [vmem:[#allocation2 + $0x198] sm:$0x1] %vm395_vm2, %v4559_v0  ;;  %v566_v49 = vadd.f32 %v4774_v2, %v527_v40  ;;  %v529_v50 = vmul.f32 %v4769_v1, %v490_v35  ;;  %v530_v51 = vmul.f32 %v4769_v1, %v491_v36  ;;  %v496_v53 = vld [vmem:[%s4779_s24 + $0x90] sm:$0xff]  ;;  %v497_v58 = vld [vmem:[%s4779_s24 + $0x98] sm:$0xff] }
  0x25   : > { %433 = vst.msk [vmem:[#allocation3] sm:$0xff] %vm432_vm3, %v4559_v0  ;;  %434 = vst.msk [vmem:[#allocation3 + $0x8] sm:$0xff] %vm432_vm3, %v4559_v0  ;;  %v531_v52 = vmul.f32 %v4769_v1, %v492_v41  ;;  %v567_v54 = vadd.f32 %v4774_v2, %v528_v46  ;;  %v532_v55 = vmul.f32 %v4769_v1, %v493_v42  ;;  %v4483_v31 = vld [vmem:[%s5974_s1] sm:$0xff]   ;;  %v4484_v33 = vld [vmem:[%s5974_s1 + $0x8] sm:$0xff]   ;;  %vm2232_vm11 = vcmask 293888   ;;  %s5997_s14 = smov 48  }
  0x26   : > { %589 = vst.msk [vmem:[#allocation2 + $0x19] sm:$0xff] %vm386_vm0, %v556_v17  ;;  %590 = vst.msk [vmem:[#allocation2 + $0x21] sm:$0xff] %vm386_vm0, %v557_v18  ;;  %v533_v56 = vmul.f32 %v4769_v1, %v494_v47  ;;  %v534_v57 = vmul.f32 %v4769_v1, %v495_v48  ;;  %v568_v59 = vadd.f32 %v4774_v2, %v529_v50  ;;  %3561 = vmatprep.subr.bf16.mxu0 %v4483_v31  ;;  %v498_v34 = vld [vmem:[%s4779_s24 + $0xa0] sm:$0xff]  ;;  %v499_v35 = vld [vmem:[%s4779_s24 + $0xa8] sm:$0xff]  ;;  %vm435_vm12 = vcmask 58368  }
  0x27   : > { %591 = vst.msk [vmem:[#allocation2 + $0x31] sm:$0xff] %vm386_vm0, %v558_v23  ;;  %592 = vst.msk [vmem:[#allocation2 + $0x39] sm:$0xff] %vm386_vm0, %v559_v30  ;;  %v569_v60 = vadd.f32 %v4774_v2, %v530_v51  ;;  %v570_v61 = vadd.f32 %v4774_v2, %v531_v52  ;;  %v571_v62 = vadd.f32 %v4774_v2, %v532_v55  ;;  %3562 = vmatpush3.bf16.msra.mxu0 %v4483_v31  ;;  %v4485_v36 = vld [vmem:[%s5974_s1 + $0x10] ss:$0 sps:$4 sm:$0x33]   ;;  %v506_v31 = vld [vmem:[%s4779_s24 + $0xe0] sm:$0xff] }
  0x28   : > { %593 = vst.msk [vmem:[#allocation2 + $0x49] sm:$0xff] %vm386_vm0, %v560_v37  ;;  %594 = vst.msk [vmem:[#allocation2 + $0x51] sm:$0xff] %vm386_vm0, %v561_v38  ;;  %v572_v63 = vadd.f32 %v4774_v2, %v533_v56  ;;  %v573_v3 = vadd.f32 %v4774_v2, %v534_v57  ;;  %v535_v7 = vmul.f32 %v4769_v1, %v496_v53  ;;  %3563 = vmatprep.subr.bf16.mxu0 %v4484_v33  ;;  %v502_v56 = vld [vmem:[%s4779_s24 + $0xc0] sm:$0xff]  ;;  %v503_v57 = vld [vmem:[%s4779_s24 + $0xc8] sm:$0xff]  ;;  %vm441_vm13 = vcmask 57344  }
  0x29   : > { %595 = vst.msk [vmem:[#allocation2 + $0x61] sm:$0xff] %vm386_vm0, %v562_v39  ;;  %596 = vst.msk [vmem:[#allocation2 + $0x69] sm:$0xff] %vm386_vm0, %v563_v43  ;;  %v536_v8 = vmul.f32 %v4769_v1, %v497_v58  ;;  %v537_v37 = vmul.f32 %v4769_v1, %v498_v34  ;;  %v538_v38 = vmul.f32 %v4769_v1, %v499_v35  ;;  %v500_v43 = vld [vmem:[%s4779_s24 + $0xb0] sm:$0xff] }
  0x2a   : > { %v686_v12 = vld [vmem:[#allocation2 + $0xa] sm:$0xff]  ;;  %597 = vst.msk [vmem:[#allocation2 + $0x79] sm:$0xff] %vm386_vm0, %v564_v44  ;;  %598 = vst.msk [vmem:[#allocation2 + $0x81] sm:$0xff] %vm386_vm0, %v565_v45  ;;  %v501_v44 = vld [vmem:[%s4779_s24 + $0xb8] sm:$0xff]  ;;  %v2283_v45 = vsel %vm2281_vm4, %v4485_v36, 0  ;;  %v539_v46 = vmul.f32 %v4769_v1, %v500_v43  ;;  %v541_v58 = vmul.f32 %v4769_v1, %v502_v56 }
  0x2b   : > { %v3688_v16 = vpack.i.bf16 %v686_v12, %v685_v6  ;;  %599 = vst.msk [vmem:[#allocation2 + $0x91] sm:$0xff] %vm386_vm0, %v566_v49  ;;  %600 = vst.msk [vmem:[#allocation2 + $0x99] sm:$0xff] %vm386_vm0, %v567_v54  ;;  %v575_v17 = vadd.f32 %v4774_v2, %v536_v8  ;;  %v576_v40 = vadd.f32 %v4774_v2, %v537_v37  ;;  %3564 = vmatpush3.bf16.msra.mxu0 %v4484_v33 }
  0x2c   : > { %601 = vst.msk [vmem:[#allocation2 + $0xa9] sm:$0xff] %vm386_vm0, %v568_v59  ;;  %602 = vst.msk [vmem:[#allocation2 + $0xb1] sm:$0xff] %vm386_vm0, %v569_v60  ;;  %v577_v41 = vadd.f32 %v4774_v2, %v538_v38  ;;  %3627 = vmatprep.subr.msk.bf16.mxu0 %vm2281_vm4, %v4485_v36  ;;  %v540_v47 = vmul.f32 %v4769_v1, %v501_v44  ;;  %v578_v49 = vadd.f32 %v4774_v2, %v539_v46 }
  0x2d   : > { %3689 = vrot.lane.b32.xlu1 %v3688_v16, %s5989_s29  ;;  %v687_v4 = vld [vmem:[#allocation2 + $0x1a] sm:$0xff]  ;;  %v688_v5 = vld [vmem:[#allocation2 + $0x22] sm:$0xff]  ;;  %603 = vst.msk [vmem:[#allocation2 + $0xc1] sm:$0xff] %vm386_vm0, %v570_v61  ;;  %604 = vst.msk [vmem:[#allocation2 + $0xc9] sm:$0xff] %vm386_vm0, %v571_v62  ;;  %v574_v16 = vadd.f32 %v4774_v2, %v535_v7  ;;  %v542_v60 = vmul.f32 %v4769_v1, %v503_v57  ;;  %v545_v33 = vmul.f32 %v4769_v1, %v506_v31 }
  0x2e   : > { %v655_v6 = vld [vmem:[#allocation2 + $0x19] sm:$0xff]  ;;  %v3698_v9 = vpack.i.bf16 %v688_v5, %v687_v4  ;;  %v656_v10 = vld [vmem:[#allocation2 + $0x21] sm:$0xff]  ;;  %v4860_v11 = vld [vmem:[#allocation2 + $0x30] sm:$0xff]  ;;  %605 = vst.msk [vmem:[#allocation2 + $0xd9] sm:$0xff] %vm386_vm0, %v572_v63  ;;  %v579_v50 = vadd.f32 %v4774_v2, %v540_v47  ;;  %v580_v63 = vadd.f32 %v4774_v2, %v541_v58 }
  0x2f   : > { %v4862_v12 = vld [vmem:[#allocation2 + $0x18] sm:$0xff]  ;;  %606 = vst.msk [vmem:[#allocation2 + $0xe1] sm:$0xff] %vm386_vm0, %v573_v3  ;;  %v3693_v13 = vpack.i.bf16 %v656_v10, %v655_v6  ;;  %v4869_v15 = vld [vmem:[#allocation2 + $0x20] sm:$0xff]  ;;  %607 = vst.msk [vmem:[#allocation2 + $0xf1] sm:$0xff] %vm386_vm0, %v574_v16  ;;  %3566 = vmatpush3.bf16.msra.mxu0 %v2283_v45  ;;  %v581_v3 = vadd.f32 %v4774_v2, %v542_v60  ;;  %v584_v38 = vadd.f32 %v4774_v2, %v545_v33 }
  0x30   : > { %v4867_v14 = vld [vmem:[#allocation2 + $0x38] sm:$0xff]  ;;  %v3703_v19 = vpack.i.bf16 %v4869_v15, %v4862_v12  ;;  %608 = vst.msk [vmem:[#allocation2 + $0xf9] sm:$0xff] %vm386_vm0, %v575_v17  ;;  %v4885_v26 = vld [vmem:[#allocation2 + $0x48] sm:$0xff]  ;;  %v4887_v27 = vld [vmem:[#allocation2 + $0x50] sm:$0xff] }
  0x31   : > { %3699 = vrot.lane.b32.xlu1 %v3698_v9, %s5989_s29  ;;  %v3708_v18 = vpack.i.bf16 %v4867_v14, %v4860_v11  ;;  %3694 = vrot.lane.b32.xlu0 %v3693_v13, %s4560_s25  ;;  %v751_v20 = vld [vmem:[#allocation2 + $0x31] sm:$0xff]  ;;  %v752_v21 = vld [vmem:[#allocation2 + $0x39] sm:$0xff]  ;;  %v3738_v28 = vpack.i.bf16 %v4887_v27, %v4885_v26  ;;  %v848_v29 = vld [vmem:[#allocation2 + $0x49] sm:$0xff]  ;;  %609 = vst.msk [vmem:[#allocation2 + $0x109] sm:$0xff] %vm386_vm0, %v576_v40 }
  0x32   : > { %v3718_v22 = vpack.i.bf16 %v752_v21, %v751_v20  ;;  %v783_v23 = vld [vmem:[#allocation2 + $0x32] sm:$0xff]  ;;  %v784_v24 = vld [vmem:[#allocation2 + $0x3a] sm:$0xff]  ;;  %v880_v39 = vld [vmem:[#allocation2 + $0x4a] sm:$0xff]  ;;  %610 = vst.msk [vmem:[#allocation2 + $0x111] sm:$0xff] %vm386_vm0, %v577_v41 }
  0x33   : > { %v3728_v25 = vpack.i.bf16 %v784_v24, %v783_v23  ;;  %v849_v30 = vld [vmem:[#allocation2 + $0x51] sm:$0xff]  ;;  %611 = vst.msk [vmem:[#allocation2 + $0x121] sm:$0xff] %vm386_vm0, %v578_v49  ;;  %612 = vst.msk [vmem:[#allocation2 + $0x129] sm:$0xff] %vm386_vm0, %v579_v50  ;;  %v723_v51 = vld [vmem:[#allocation2 + $0x60] sm:$0xff] }
  0x34   : > { %v3748_v32 = vpack.i.bf16 %v849_v30, %v848_v29  ;;  %v881_v42 = vld [vmem:[#allocation2 + $0x52] sm:$0xff]  ;;  %v724_v52 = vld [vmem:[#allocation2 + $0x68] sm:$0xff]  ;;  %613 = vst.msk [vmem:[#allocation2 + $0x139] sm:$0xff] %vm386_vm0, %v580_v63  ;;  %614 = vst.msk [vmem:[#allocation2 + $0x141] sm:$0xff] %vm386_vm0, %v581_v3 }
  0x35   : > { %3709 = vrot.lane.b32.xlu1 %v3708_v18, %s4562_s30  ;;  %3704 = vrot.lane.b32.xlu0 %v3703_v19, %s4562_s30  ;;  %v3763_v48 = vpack.i.bf16 %v881_v42, %v880_v39  ;;  %v3788_v53 = vpack.i.bf16 %v724_v52, %v723_v51  ;;  %v755_v54 = vld [vmem:[#allocation2 + $0x61] sm:$0xff]  ;;  %v756_v55 = vld [vmem:[#allocation2 + $0x69] sm:$0xff]  ;;  %v820_v5 = vld [vmem:[#allocation2 + $0x78] sm:$0xff]  ;;  %617 = vst.msk [vmem:[#allocation2 + $0x169] sm:$0xff] %vm386_vm0, %v584_v38 }
  0x36   : > { %v3798_v59 = vpack.i.bf16 %v756_v55, %v755_v54  ;;  %v787_v61 = vld [vmem:[#allocation2 + $0x62] sm:$0xff]  ;;  %v788_v62 = vld [vmem:[#allocation2 + $0x6a] sm:$0xff]  ;;  %v852_v8 = vld [vmem:[#allocation2 + $0x79] sm:$0xff]  ;;  %436 = vst.msk [vmem:[#allocation3 + $0x10] sm:$0x3] %vm435_vm12, %v4559_v0 }
  0x37   : > { %v3808_v4 = vpack.i.bf16 %v788_v62, %v787_v61  ;;  %v821_v6 = vld [vmem:[#allocation2 + $0x80] sm:$0xff]  ;;  %v504_v17 = vld [vmem:[%s4779_s24 + $0xd0] sm:$0xff]  ;;  %v824_v41 = vld [vmem:[#allocation2 + $0xa8] sm:$0xff]  ;;  %442 = vst.msk [vmem:[#allocation3] sm:$0x1] %vm441_vm13, %v4559_v0 }
  0x38   : > { %v3818_v7 = vpack.i.bf16 %v821_v6, %v820_v5  ;;  %v885_v16 = vld [vmem:[#allocation2 + $0x82] sm:$0xff]  ;;  %v543_v19 = vmul.f32 %v4769_v1, %v504_v17  ;;  %v727_v24 = vld [vmem:[#allocation2 + $0x90] sm:$0xff]  ;;  %v760_v30 = vld [vmem:[#allocation2 + $0x99] sm:$0xff]  ;;  %443 = vst.msk [vmem:[#allocation3 + $0x18] sm:$0x1] %vm441_vm13, %v4559_v0 }
  0x39   : > { %3719 = vrot.lane.b32.xlu1 %v3718_v22, %s5985_s12  ;;  %3714 = vrot.lane.b32.xlu0 %v3693_v13, %s5985_s12  ;;  %s5993_s12 = smov 32   ;;  %v884_v13 = vld [vmem:[#allocation2 + $0x7a] sm:$0xff]  ;;  %v759_v29 = vld [vmem:[#allocation2 + $0x91] sm:$0xff]  ;;  %v856_v44 = vld [vmem:[#allocation2 + $0xa9] sm:$0xff]  ;;  %444 = vst.msk [vmem:[#allocation3 + $0x30] sm:$0x1] %vm441_vm13, %v4559_v0 }
  0x3a   : > { %v3843_v21 = vpack.i.bf16 %v885_v16, %v884_v13  ;;  %v3878_v34 = vpack.i.bf16 %v760_v30, %v759_v29  ;;  %v791_v36 = vld [vmem:[#allocation2 + $0x92] sm:$0xff]  ;;  %v792_v37 = vld [vmem:[#allocation2 + $0x9a] sm:$0xff]  ;;  %v888_v47 = vld [vmem:[#allocation2 + $0xaa] sm:$0xff]  ;;  %445 = vst.msk [vmem:[#allocation3 + $0x48] sm:$0x1] %vm441_vm13, %v4559_v0 }
  0x3b   : > { %v3888_v40 = vpack.i.bf16 %v792_v37, %v791_v36  ;;  %v825_v42 = vld [vmem:[#allocation2 + $0xb0] sm:$0xff]  ;;  %v509_v50 = vld [vmem:[%s4779_s24 + $0xf8] sm:$0xff]  ;;  %v731_v56 = vld [vmem:[#allocation2 + $0xc0] sm:$0xff]  ;;  %446 = vst.msk [vmem:[#allocation3 + $0x60] sm:$0x1] %vm441_vm13, %v4559_v0 }
  0x3c   : > { %v3898_v43 = vpack.i.bf16 %v825_v42, %v824_v41  ;;  %v857_v45 = vld [vmem:[#allocation2 + $0xb1] sm:$0xff]  ;;  %v548_v52 = vmul.f32 %v4769_v1, %v509_v50  ;;  %v732_v57 = vld [vmem:[#allocation2 + $0xc8] sm:$0xff]  ;;  %v829_v3 = vld [vmem:[#allocation2 + $0xe0] sm:$0xff]  ;;  %447 = vst.msk [vmem:[#allocation3 + $0x78] sm:$0x1] %vm441_vm13, %v4559_v0 }
  0x3d   : > { %3729 = vrot.lane.b32.xlu1 %v3728_v25, %s5987_s13  ;;  %3724 = vrot.lane.b32.xlu0 %v3698_v9, %s5987_s13  ;;  %s6003_s13 = smov 16   ;;  %v853_v9 = vld [vmem:[#allocation2 + $0x81] sm:$0xff]  ;;  %v3908_v46 = vpack.i.bf16 %v857_v45, %v856_v44  ;;  %v508_v49 = vld [vmem:[%s4779_s24 + $0xf0] sm:$0xff]  ;;  %v828_v63 = vld [vmem:[#allocation2 + $0xd8] sm:$0xff]  ;;  %448 = vst.msk [vmem:[#allocation3 + $0x90] sm:$0x1] %vm441_vm13, %v4559_v0 }
  0x3e   : > { %v3828_v10 = vpack.i.bf16 %v853_v9, %v852_v8  ;;  %v547_v51 = vmul.f32 %v4769_v1, %v508_v49  ;;  %v587_v55 = vadd.f32 %v4774_v2, %v548_v52  ;;  %v763_v58 = vld [vmem:[#allocation2 + $0xc1] sm:$0xff]  ;;  %v796_v61 = vld [vmem:[#allocation2 + $0xca] sm:$0xff]  ;;  %v5001_v5 = vpack.i.bf16 %v829_v3, %v828_v63  ;;  %449 = vst.msk [vmem:[#allocation3 + $0xa8] sm:$0x1] %vm441_vm13, %v4559_v0 }
  0x3f   : > { %v795_v60 = vld [vmem:[#allocation2 + $0xc2] sm:$0xff]  ;;  %v892_v17 = vld [vmem:[#allocation2 + $0xda] sm:$0xff]  ;;  %v767_v38 = vld [vmem:[#allocation2 + $0xf1] sm:$0xff]  ;;  %450 = vst.msk [vmem:[#allocation3 + $0xc0] sm:$0x1] %vm441_vm13, %v4559_v0 }
  0x40   : > { %v586_v54 = vadd.f32 %v4774_v2, %v547_v51  ;;  %620 = vst.msk [vmem:[#allocation2 + $0x189] sm:$0xff] %vm386_vm0, %v587_v55  ;;  %v3968_v62 = vpack.i.bf16 %v796_v61, %v795_v60  ;;  %v861_v8 = vld [vmem:[#allocation2 + $0xe1] sm:$0xff] }
  0x41   : > { %3739 = vrot.lane.b32.xlu1 %v3738_v28, %s4565_s16  ;;  %3734 = vrot.lane.b32.xlu0 %v3708_v18, %s4565_s16  ;;  %v505_v18 = vld [vmem:[%s4779_s24 + $0xd8] sm:$0xff]  ;;  %v622_v30 = vld [vmem:[#allocation2 + $0x8] sm:$0xff]  ;;  %v621_v31 = vld [vmem:[#allocation2] sm:$0xff]  ;;  %451 = vst.msk [vmem:[#allocation3 + $0xd8] sm:$0x1] %vm441_vm13, %v4559_v0 }
  0x42   : > { %v544_v20 = vmul.f32 %v4769_v1, %v505_v18  ;;  %619 = vst.msk [vmem:[#allocation2 + $0x181] sm:$0xff] %vm386_vm0, %v586_v54  ;;  %v893_v18 = vld [vmem:[#allocation2 + $0xe2] sm:$0xff] }
  0x43   : > { %452 = vst.msk [vmem:[#allocation3 + $0xf0] sm:$0x1] %vm441_vm13, %v4559_v0  ;;  %453 = vst.msk [vmem:[#allocation3 + $0x108] sm:$0x1] %vm441_vm13, %v4559_v0 }
  0x44   : > { %v583_v23 = vadd.f32 %v4774_v2, %v544_v20  ;;  %v5020_v20 = vpack.i.bf16 %v893_v18, %v892_v17  ;;  %454 = vst.msk [vmem:[#allocation3 + $0x120] sm:$0x1] %vm441_vm13, %v4559_v0  ;;  %455 = vst.msk [vmem:[#allocation3 + $0x138] sm:$0x1] %vm441_vm13, %v4559_v0 }
  0x45   : > { %3749 = vrot.lane.b32.xlu1 %v3748_v32, %s4566_s15  ;;  %3744 = vrot.lane.b32.xlu0 %v3718_v22, %s4566_s15  ;;  %456 = vst.msk [vmem:[#allocation3 + $0x150] sm:$0x1] %vm441_vm13, %v4559_v0  ;;  %457 = vst.msk [vmem:[#allocation3 + $0x168] sm:$0x1] %vm441_vm13, %v4559_v0 }
  0x46   : > { %616 = vst.msk [vmem:[#allocation2 + $0x159] sm:$0xff] %vm386_vm0, %v583_v23  ;;  %v735_v23 = vld [vmem:[#allocation2 + $0xf0] sm:$0xff] }
  0x47   : > { %458 = vst.msk [vmem:[#allocation3 + $0x180] sm:$0x1] %vm441_vm13, %v4559_v0  ;;  %v908_v0 = vld [vmem:[#allocation2 + $0x19a] sm:$0xff] }
  0x49   : > { %3759 = vrot.lane.b32.xlu1 %v3718_v22, %s4560_s25  ;;  %3754 = vrot.lane.b32.xlu0 %v3728_v25, %s5993_s12  ;;  %v582_v22 = vadd.f32 %v4774_v2, %v543_v19 }
  0x4b   : > { %615 = vst.msk [vmem:[#allocation2 + $0x151] sm:$0xff] %vm386_vm0, %v582_v22 }
  0x4d   : > { %3769 = vrot.lane.b32.xlu1 %v3748_v32, %s4560_s25  ;;  %3764 = vrot.lane.b32.xlu0 %v3763_v48, %s5993_s12 }
  0x51   : > { %3779 = vrot.lane.b32.xlu1 %v3763_v48, %s5989_s29  ;;  %3774 = vrot.lane.b32.xlu0 %v3728_v25, %s5989_s29  ;;  %v728_v25 = vld [vmem:[#allocation2 + $0x98] sm:$0xff] }
  0x55   : > { %3789 = vrot.lane.b32.xlu1 %v3788_v53, %s4562_s30  ;;  %3784 = vrot.lane.b32.xlu0 %v3738_v28, %s4562_s30  ;;  %v3868_v28 = vpack.i.bf16 %v728_v25, %v727_v24  ;;  %v736_v24 = vld [vmem:[#allocation2 + $0xf8] sm:$0xff] }
  0x59   : > { %3799 = vrot.lane.b32.xlu1 %v3798_v59, %s6003_s13  ;;  %3794 = vrot.lane.b32.xlu0 %v3748_v32, %s6003_s13  ;;  %v507_v32 = vld [vmem:[%s4779_s24 + $0xe8] sm:$0xff] }
  0x5a   : > { %v546_v35 = vmul.f32 %v4769_v1, %v507_v32  ;;  %v3948_v1 = vpack.i.bf16 %v732_v57, %v731_v56 }
  0x5c   : > { %v585_v39 = vadd.f32 %v4774_v2, %v546_v35  ;;  %v5036_v35 = vpack.i.bf16 %v736_v24, %v735_v23 }
  0x5d   : > { %3809 = vrot.lane.b32.xlu1 %v3808_v4, %s6004_s22  ;;  %3804 = vrot.lane.b32.xlu0 %v3763_v48, %s6004_s22  ;;  %v889_v48 = vld [vmem:[#allocation2 + $0xb2] sm:$0xff] }
  0x5e   : > { %618 = vst.msk [vmem:[#allocation2 + $0x171] sm:$0xff] %vm386_vm0, %v585_v39  ;;  %v768_v39 = vld [vmem:[#allocation2 + $0xf9] sm:$0xff] }
  0x5f   : > { %v5057_v56 = vpack.i.bf16 %v768_v39, %v767_v38 }
  0x61   : > { %3819 = vrot.lane.b32.xlu1 %v3818_v7, %s4565_s16  ;;  %3814 = vrot.lane.b32.xlu0 %v3788_v53, %s4565_s16  ;;  %v3923_v53 = vpack.i.bf16 %v889_v48, %v888_v47  ;;  %v832_v47 = vld [vmem:[#allocation2 + $0x108] sm:$0xff]  ;;  %v833_v48 = vld [vmem:[#allocation2 + $0x110] sm:$0xff] }
  0x65   : > { %3829 = vrot.lane.b32.xlu1 %v3828_v10, %s4566_s15  ;;  %3824 = vrot.lane.b32.xlu0 %v3798_v59, %s4566_s15 }
  0x69   : > { %3839 = vrot.lane.b32.xlu1 %v3798_v59, %s4560_s25  ;;  %3834 = vrot.lane.b32.xlu0 %v3808_v4, %s5993_s12  ;;  %v764_v59 = vld [vmem:[#allocation2 + $0xc9] sm:$0xff] }
  0x6a   : > { %v3958_v2 = vpack.i.bf16 %v764_v59, %v763_v58 }
  0x6d   : > { %3849 = vrot.lane.b32.xlu1 %v3828_v10, %s4560_s25  ;;  %3844 = vrot.lane.b32.xlu0 %v3843_v21, %s5993_s12 }
  0x71   : > { %3859 = vrot.lane.b32.xlu1 %v3843_v21, %s5989_s29  ;;  %3854 = vrot.lane.b32.xlu0 %v3808_v4, %s5989_s29 }
  0x75   : > { %3869 = vrot.lane.b32.xlu1 %v3868_v28, %s4562_s30  ;;  %3864 = vrot.lane.b32.xlu0 %v3818_v7, %s4562_s30  ;;  %v860_v7 = vld [vmem:[#allocation2 + $0xd9] sm:$0xff] }
  0x76   : > { %v5006_v9 = vpack.i.bf16 %v861_v8, %v860_v7 }
  0x79   : > { %3879 = vrot.lane.b32.xlu1 %v3878_v34, %s6003_s13  ;;  %3874 = vrot.lane.b32.xlu0 %v3828_v10, %s6003_s13 }
  0x7d   : > { %3889 = vrot.lane.b32.xlu1 %v3888_v40, %s6004_s22  ;;  %3884 = vrot.lane.b32.xlu0 %v3843_v21, %s6004_s22 }
  0x81   : > { %3899 = vrot.lane.b32.xlu1 %v3898_v43, %s4565_s16  ;;  %3894 = vrot.lane.b32.xlu0 %v3868_v28, %s4565_s16 }
  0x85   : > { %3909 = vrot.lane.b32.xlu1 %v3908_v46, %s4566_s15  ;;  %3904 = vrot.lane.b32.xlu0 %v3878_v34, %s4566_s15 }
  0x89   : > { %3919 = vrot.lane.b32.xlu1 %v3878_v34, %s4560_s25  ;;  %3914 = vrot.lane.b32.xlu0 %v3888_v40, %s5993_s12 }
  0x8d   : > { %3929 = vrot.lane.b32.xlu1 %v3908_v46, %s4560_s25  ;;  %3924 = vrot.lane.b32.xlu0 %v3923_v53, %s5993_s12  ;;  %v3685_v6 = vpop.permute.xlu0 %3684 }
  0x8e   : > { %v3687_v25 = vunpack.i.h.bf16 %v3685_v6  ;;  %v3686_v28 = vunpack.i.l.bf16 %v3685_v6 }
  0x90   : > { %v1935_v41 = vsel %vm386_vm0, %v622_v30, %v3687_v25  ;;  %v1934_v42 = vsel %vm386_vm0, %v621_v31, %v3686_v28 }
  0x91   : > { %3939 = vrot.lane.b32.xlu1 %v3923_v53, %s5989_s29  ;;  %3934 = vrot.lane.b32.xlu0 %v3888_v40, %s5989_s29  ;;  %v799_v40 = vld [vmem:[#allocation2 + $0xf2] sm:$0xff] }
  0x95   : > { %3949 = vrot.lane.b32.xlu1 %v3948_v1, %s4562_s30  ;;  %3944 = vrot.lane.b32.xlu0 %v3898_v43, %s4562_s30 }
  0x99   : > { %3959 = vrot.lane.b32.xlu1 %v3958_v2, %s6003_s13  ;;  %3954 = vrot.lane.b32.xlu0 %v3908_v46, %s6003_s13  ;;  %v800_v46 = vld [vmem:[#allocation2 + $0xfa] sm:$0xff] }
  0x9d   : > { %3969 = vrot.lane.b32.xlu1 %v3968_v62, %s6004_s22  ;;  %3964 = vrot.lane.b32.xlu0 %v3923_v53, %s6004_s22 }
  0x9f   : > { %v4999_v4 = vpop.permute.xlu1 %3689 }
  0xa0   : > { %v3692_v36 = vunpack.i.h.bf16 %v4999_v4  ;;  %v3691_v37 = vunpack.i.l.bf16 %v4999_v4 }
  0xa1   : > { %3979 = vrot.lane.b32.xlu1 %v5001_v5, %s4565_s16  ;;  %3974 = vrot.lane.b32.xlu0 %v3948_v1, %s4565_s16  ;;  %v5065_v1 = vpack.i.bf16 %v833_v48, %v832_v47 }
  0xa2   : > { %v1967_v57 = vsel %vm432_vm3, %v1935_v41, %v3692_v36  ;;  %v864_v36 = vld [vmem:[#allocation2 + $0x109] sm:$0xff] }
  0xa3   : > { %v5009_v10 = vpop.permute.xlu1 %3699  ;;  %v3695_v13 = vpop.permute.xlu0 %3694 }
  0xa4   : > { %v3697_v32 = vunpack.i.h.bf16 %v3695_v13  ;;  %v3696_v33 = vunpack.i.l.bf16 %v3695_v13  ;;  %v3702_v43 = vunpack.i.h.bf16 %v5009_v10  ;;  %v3701_v44 = vunpack.i.l.bf16 %v5009_v10 }
  0xa5   : > { %3989 = vrot.lane.b32.xlu1 %v5006_v9, %s4566_s15  ;;  %3984 = vrot.lane.b32.xlu0 %v3958_v2, %s4566_s15 }
  0xa6   : > { %v1936_v49 = vsel %vm386_vm0, %v4862_v12, %v3696_v33  ;;  %v1937_v50 = vsel %vm386_vm0, %v4869_v15, %v3697_v32  ;;  %v1966_v12 = vsel %vm432_vm3, %v1934_v42, %v3691_v37  ;;  %v5063_v15 = vpack.i.bf16 %v800_v46, %v799_v40  ;;  %v865_v37 = vld [vmem:[#allocation2 + $0x111] sm:$0xff] }
  0xa7   : > { %v5014_v16 = vpop.permute.xlu1 %3709  ;;  %v5016_v19 = vpop.permute.xlu0 %3704  ;;  %v1968_v58 = vsel %vm432_vm3, %v1936_v49, %v3701_v44  ;;  %v1969_v59 = vsel %vm432_vm3, %v1937_v50, %v3702_v43  ;;  %v5109_v50 = vpack.i.bf16 %v865_v37, %v864_v36 }
  0xa8   : > { %v3712_v51 = vunpack.i.h.bf16 %v5014_v16  ;;  %v3711_v52 = vunpack.i.l.bf16 %v5014_v16  ;;  %v3707_v54 = vunpack.i.h.bf16 %v5016_v19  ;;  %v3706_v55 = vunpack.i.l.bf16 %v5016_v19 }
  0xa9   : > { %3999 = vrot.lane.b32.xlu1 %v3958_v2, %s4560_s25  ;;  %3994 = vrot.lane.b32.xlu0 %v3968_v62, %s5993_s12 }
  0xaa   : > { %v2002_v63 = vsel %vm1998_vm5, %v1969_v59, %v3712_v51  ;;  %v2000_v6 = vsel %vm1998_vm5, %v1967_v57, %v3707_v54  ;;  %v1999_v7 = vsel %vm1998_vm5, %v1966_v12, %v3706_v55 }
  0xab   : > { %v5022_v21 = vpop.permute.xlu1 %3719  ;;  %v5024_v22 = vpop.permute.xlu0 %3714 }
  0xac   : > { %v3717_v2 = vunpack.i.h.bf16 %v5024_v22  ;;  %v3716_v60 = vunpack.i.l.bf16 %v5024_v22  ;;  %v3722_v13 = vunpack.i.h.bf16 %v5022_v21  ;;  %v3721_v16 = vunpack.i.l.bf16 %v5022_v21 }
  0xad   : > { %4009 = vrot.lane.b32.xlu1 %v5006_v9, %s4560_s25  ;;  %4004 = vrot.lane.b32.xlu0 %v5020_v20, %s5993_s12 }
  0xae   : > { %v2032_v19 = vsel %vm2031_vm6, %v1999_v7, %v3716_v60  ;;  %v2033_v22 = vsel %vm2031_vm6, %v2000_v6, %v3717_v2  ;;  %v2035_v43 = vsel %vm2031_vm6, %v2002_v63, %v3722_v13  ;;  %v739_v6 = vld [vmem:[#allocation2 + $0x120] sm:$0xff]  ;;  %v740_v7 = vld [vmem:[#allocation2 + $0x128] sm:$0xff] }
  0xaf   : > { %v5030_v29 = vpop.permute.xlu1 %3729  ;;  %v5032_v34 = vpop.permute.xlu0 %3724  ;;  %v772_v13 = vld [vmem:[#allocation2 + $0x129] sm:$0xff] }
  0xb0   : > { %v3727_v3 = vunpack.i.h.bf16 %v5032_v34  ;;  %v3726_v4 = vunpack.i.l.bf16 %v5032_v34  ;;  %v3732_v23 = vunpack.i.h.bf16 %v5030_v29  ;;  %v3731_v24 = vunpack.i.l.bf16 %v5030_v29 }
  0xb1   : > { %4019 = vrot.lane.b32.xlu1 %v5020_v20, %s5989_s29  ;;  %4014 = vrot.lane.b32.xlu0 %v3968_v62, %s5989_s29  ;;  %v2001_v62 = vsel %vm1998_vm5, %v1968_v58, %v3711_v52 }
  0xb2   : > { %v2065_v28 = vsel %vm2064_vm7, %v2032_v19, %v3726_v4  ;;  %v2066_v30 = vsel %vm2064_vm7, %v2033_v22, %v3727_v3  ;;  %v2034_v42 = vsel %vm2031_vm6, %v2001_v62, %v3721_v16  ;;  %v2068_v48 = vsel %vm2064_vm7, %v2035_v43, %v3732_v23  ;;  %v896_v62 = vld [vmem:[#allocation2 + $0x10a] sm:$0xff]  ;;  %v803_v16 = vld [vmem:[#allocation2 + $0x122] sm:$0xff]  ;;  %v836_v23 = vld [vmem:[#allocation2 + $0x138] sm:$0xff] }
  0xb3   : > { %v5045_v45 = vpop.permute.xlu1 %3739  ;;  %v3735_v53 = vpop.permute.xlu0 %3734  ;;  %v2067_v47 = vsel %vm2064_vm7, %v2034_v42, %v3731_v24  ;;  %v5149_v19 = vpack.i.bf16 %v740_v7, %v739_v6  ;;  %v804_v22 = vld [vmem:[#allocation2 + $0x12a] sm:$0xff]  ;;  %v837_v24 = vld [vmem:[#allocation2 + $0x140] sm:$0xff] }
  0xb4   : > { %v3737_v8 = vunpack.i.h.bf16 %v3735_v53  ;;  %v3736_v10 = vunpack.i.l.bf16 %v3735_v53  ;;  %v3742_v21 = vunpack.i.h.bf16 %v5045_v45  ;;  %v3741_v31 = vunpack.i.l.bf16 %v5045_v45 }
  0xb5   : > { %4029 = vrot.lane.b32.xlu1 %v5036_v35, %s4562_s30  ;;  %4024 = vrot.lane.b32.xlu0 %v5001_v5, %s4562_s30 }
  0xb6   : > { %v2098_v34 = vsel %vm2097_vm8, %v2065_v28, %v3736_v10  ;;  %v2099_v29 = vsel %vm2097_vm8, %v2066_v30, %v3737_v8  ;;  %v2100_v51 = vsel %vm2097_vm8, %v2067_v47, %v3741_v31  ;;  %v2101_v52 = vsel %vm2097_vm8, %v2068_v48, %v3742_v21  ;;  %v771_v10 = vld [vmem:[#allocation2 + $0x121] sm:$0xff] }
  0xb7   : > { %v3750_v61 = vpop.permute.xlu1 %3749  ;;  %v3745_v5 = vpop.permute.xlu0 %3744 }
  0xb8   : > { %v3747_v17 = vunpack.i.h.bf16 %v3745_v5  ;;  %v3746_v18 = vunpack.i.l.bf16 %v3745_v5  ;;  %v3752_v38 = vunpack.i.h.bf16 %v3750_v61  ;;  %v3751_v39 = vunpack.i.l.bf16 %v3750_v61 }
  0xb9   : > { %4039 = vrot.lane.b32.xlu1 %v5057_v56, %s6003_s13  ;;  %4034 = vrot.lane.b32.xlu0 %v5006_v9, %s6003_s13 }
  0xba   : > { %v2131_v40 = vsel %vm2130_vm9, %v2098_v34, %v3746_v18  ;;  %v2132_v41 = vsel %vm2130_vm9, %v2099_v29, %v3747_v17  ;;  %v2133_v55 = vsel %vm2130_vm9, %v2100_v51, %v3751_v39  ;;  %v2134_v12 = vsel %vm2130_vm9, %v2101_v52, %v3752_v38 }
  0xbb   : > { %v5087_v25 = vpop.permute.xlu1 %3759  ;;  %v3755_v32 = vpop.permute.xlu0 %3754  ;;  %v5157_v34 = vpack.i.bf16 %v772_v13, %v771_v10  ;;  %v5159_v38 = vpack.i.bf16 %v804_v22, %v803_v16  ;;  %v5161_v39 = vpack.i.bf16 %v837_v24, %v836_v23  ;;  %v869_v13 = vld [vmem:[#allocation2 + $0x141] sm:$0xff] }
  0xbc   : > { %v3757_v9 = vunpack.i.h.bf16 %v3755_v32  ;;  %v3756_v33 = vunpack.i.l.bf16 %v3755_v32  ;;  %v3762_v28 = vunpack.i.h.bf16 %v5087_v25  ;;  %v3761_v30 = vunpack.i.l.bf16 %v5087_v25 }
  0xbd   : > { %4049 = vrot.lane.b32.xlu1 %v5063_v15, %s6004_s22  ;;  %4044 = vrot.lane.b32.xlu0 %v5020_v20, %s6004_s22 }
  0xbe   : > { %v2164_v45 = vsel %vm2163_vm10, %v2131_v40, %v3756_v33  ;;  %v2165_v46 = vsel %vm2163_vm10, %v2132_v41, %v3757_v9  ;;  %v1939_v42 = vsel %vm386_vm0, %v4867_v14, %v3762_v28  ;;  %v1938_v43 = vsel %vm386_vm0, %v4860_v11, %v3761_v30 }
  0xbf   : > { %v5103_v44 = vpop.permute.xlu1 %3769  ;;  %v3765_v49 = vpop.permute.xlu0 %3764  ;;  %v2196_v20 = vpack.c.bf16 %v2165_v46, %v2164_v45 }
  0xc0   : > { %v3767_v53 = vunpack.i.h.bf16 %v3765_v49  ;;  %v3766_v54 = vunpack.i.l.bf16 %v3765_v49  ;;  %v3772_v17 = vunpack.i.h.bf16 %v5103_v44  ;;  %v3771_v18 = vunpack.i.l.bf16 %v5103_v44 }
  0xc1   : > { %4059 = vrot.lane.b32.xlu1 %v5065_v1, %s4565_s16  ;;  %4054 = vrot.lane.b32.xlu0 %v5036_v35, %s4565_s16  ;;  %v897_v35 = vld [vmem:[#allocation2 + $0x112] sm:$0xff] }
  0xc2   : > { %3567 = vmatprep.mubr.msk.bf16.mxu0 %vm2232_vm11, %v2196_v20  ;;  %v2166_v57 = vsel %vm2163_vm10, %v2133_v55, %v3766_v54  ;;  %v2167_v58 = vsel %vm2163_vm10, %v2134_v12, %v3767_v53  ;;  %v5131_v3 = vpack.i.bf16 %v897_v35, %v896_v62  ;;  %v1941_v25 = vsel %vm386_vm0, %v4887_v27, %v3772_v17 }
  0xc3   : > { %v3780_v59 = vpop.permute.xlu1 %3779  ;;  %v3775_v2 = vpop.permute.xlu0 %3774  ;;  %v2197_v60 = vpack.c.bf16 %v2167_v58, %v2166_v57  ;;  %v1940_v40 = vsel %vm386_vm0, %v4885_v26, %v3771_v18 }
  0xc4   : > { %v3782_v21 = vunpack.i.h.bf16 %v3780_v59  ;;  %v3781_v31 = vunpack.i.l.bf16 %v3780_v59  ;;  %v3777_v32 = vunpack.i.h.bf16 %v3775_v2  ;;  %v3776_v9 = vunpack.i.l.bf16 %v3775_v2 }
  0xc5   : > { %4069 = vrot.lane.b32.xlu1 %v5109_v50, %s4566_s15  ;;  %4064 = vrot.lane.b32.xlu0 %v5057_v56, %s4566_s15 }
  0xc6   : > { %3568 = vmatmul.mubr.msk.bf16.vlgmr.msra.gmra.mrb[0].mxu0 %vm2232_vm11, %v2197_v60  ;;  %v1972_v44 = vsel %vm432_vm3, %v1940_v40, %v3781_v31  ;;  %v1973_v45 = vsel %vm432_vm3, %v1941_v25, %v3782_v21  ;;  %v1971_v26 = vsel %vm432_vm3, %v1939_v42, %v3777_v32  ;;  %v1970_v27 = vsel %vm432_vm3, %v1938_v43, %v3776_v9 }
  0xc7   : > { %v3790_v61 = vpop.permute.xlu1 %3789  ;;  %v3785_v63 = vpop.permute.xlu0 %3784 }
  0xc8   : > { %v3792_v29 = vunpack.i.h.bf16 %v3790_v61  ;;  %v3791_v36 = vunpack.i.l.bf16 %v3790_v61  ;;  %v3786_v41 = vunpack.i.l.bf16 %v3785_v63 }
  0xc9   : > { %4079 = vrot.lane.b32.xlu1 %v5057_v56, %s4560_s25  ;;  %4074 = vrot.lane.b32.xlu0 %v5063_v15, %s5993_s12 }
  0xca   : > { %v2005_v14 = vsel %vm1998_vm5, %v1972_v44, %v3791_v36  ;;  %v2006_v11 = vsel %vm1998_vm5, %v1973_v45, %v3792_v29 }
  0xcb   : > { %v5133_v4 = vpop.permute.xlu1 %3799  ;;  %v5135_v5 = vpop.permute.xlu0 %3794 }
  0xcc   : > { %v3797_v46 = vunpack.i.h.bf16 %v5135_v5  ;;  %v3796_v47 = vunpack.i.l.bf16 %v5135_v5  ;;  %v3802_v55 = vunpack.i.h.bf16 %v5133_v4  ;;  %v3801_v12 = vunpack.i.l.bf16 %v5133_v4 }
  0xcd   : > { %4089 = vrot.lane.b32.xlu1 %v5109_v50, %s4560_s25  ;;  %4084 = vrot.lane.b32.xlu0 %v5131_v3, %s5993_s12 }
  0xce   : > { %v2038_v23 = vsel %vm2031_vm6, %v2005_v14, %v3801_v12  ;;  %v2039_v24 = vsel %vm2031_vm6, %v2006_v11, %v3802_v55  ;;  %v743_v11 = vld [vmem:[#allocation2 + $0x150] sm:$0xff]  ;;  %v808_v12 = vld [vmem:[#allocation2 + $0x15a] sm:$0xff] }
  0xcf   : > { %v5141_v8 = vpop.permute.xlu1 %3809  ;;  %v5143_v56 = vpop.permute.xlu0 %3804 }
  0xd0   : > { %v3807_v49 = vunpack.i.h.bf16 %v5143_v56  ;;  %v3806_v20 = vunpack.i.l.bf16 %v5143_v56  ;;  %v3812_v60 = vunpack.i.h.bf16 %v5141_v8  ;;  %v3811_v61 = vunpack.i.l.bf16 %v5141_v8  ;;  %v868_v8 = vld [vmem:[#allocation2 + $0x139] sm:$0xff] }
  0xd1   : > { %4099 = vrot.lane.b32.xlu1 %v5131_v3, %s5989_s29  ;;  %4094 = vrot.lane.b32.xlu0 %v5063_v15, %s5989_s29  ;;  %v3787_v15 = vunpack.i.h.bf16 %v3785_v63  ;;  %v5219_v29 = vpack.i.bf16 %v869_v13, %v868_v8 }
  0xd2   : > { %v2071_v31 = vsel %vm2064_vm7, %v2038_v23, %v3811_v61  ;;  %v2072_v32 = vsel %vm2064_vm7, %v2039_v24, %v3812_v60  ;;  %v631_v60 = vld [vmem:[#allocation2 + $0x78] sm:$0xff]  ;;  %v632_v61 = vld [vmem:[#allocation2 + $0x80] sm:$0xff] }
  0xd3   : > { %v5155_v33 = vpop.permute.xlu1 %3819  ;;  %v3815_v37 = vpop.permute.xlu0 %3814  ;;  %v2004_v52 = vsel %vm1998_vm5, %v1971_v26, %v3787_v15 }
  0xd4   : > { %v3817_v53 = vunpack.i.h.bf16 %v3815_v37  ;;  %v3816_v54 = vunpack.i.l.bf16 %v3815_v37  ;;  %v2037_v2 = vsel %vm2031_vm6, %v2004_v52, %v3797_v46  ;;  %v3822_v4 = vunpack.i.h.bf16 %v5155_v33  ;;  %v807_v52 = vld [vmem:[#allocation2 + $0x152] sm:$0xff] }
  0xd5   : > { %4109 = vrot.lane.b32.xlu1 %v5149_v19, %s4562_s30  ;;  %4104 = vrot.lane.b32.xlu0 %v5065_v1, %s4562_s30  ;;  %v2003_v1 = vsel %vm1998_vm5, %v1970_v27, %v3786_v41  ;;  %v2070_v63 = vsel %vm2064_vm7, %v2037_v2, %v3807_v49  ;;  %v3821_v5 = vunpack.i.l.bf16 %v5155_v33  ;;  %v900_v27 = vld [vmem:[#allocation2 + $0x13a] sm:$0xff] }
  0xd6   : > { %v2036_v59 = vsel %vm2031_vm6, %v2003_v1, %v3796_v47  ;;  %v2103_v7 = vsel %vm2097_vm8, %v2070_v63, %v3817_v53  ;;  %v2105_v36 = vsel %vm2097_vm8, %v2072_v32, %v3822_v4  ;;  %v744_v49 = vld [vmem:[#allocation2 + $0x158] sm:$0xff]  ;;  %v629_v4 = vld [vmem:[#allocation2 + $0x60] sm:$0xff] }
  0xd7   : > { %v3830_v48 = vpop.permute.xlu1 %3829  ;;  %v3825_v51 = vpop.permute.xlu0 %3824  ;;  %v2069_v35 = vsel %vm2064_vm7, %v2036_v59, %v3806_v20  ;;  %v776_v1 = vld [vmem:[#allocation2 + $0x159] sm:$0xff]  ;;  %v5261_v55 = vpack.i.bf16 %v744_v49, %v743_v11 }
  0xd8   : > { %v3827_v57 = vunpack.i.h.bf16 %v3825_v51  ;;  %v3826_v58 = vunpack.i.l.bf16 %v3825_v51  ;;  %v3832_v16 = vunpack.i.h.bf16 %v3830_v48  ;;  %v3831_v17 = vunpack.i.l.bf16 %v3830_v48  ;;  %v775_v51 = vld [vmem:[#allocation2 + $0x151] sm:$0xff] }
  0xd9   : > { %4119 = vrot.lane.b32.xlu1 %v5157_v34, %s6003_s13  ;;  %4114 = vrot.lane.b32.xlu0 %v5109_v50, %s6003_s13  ;;  %v2102_v50 = vsel %vm2097_vm8, %v2069_v35, %v3816_v54 }
  0xda   : > { %v2135_v18 = vsel %vm2130_vm9, %v2102_v50, %v3826_v58  ;;  %v2136_v22 = vsel %vm2130_vm9, %v2103_v7, %v3827_v57  ;;  %v2138_v15 = vsel %vm2130_vm9, %v2105_v36, %v3832_v16  ;;  %v840_v57 = vld [vmem:[#allocation2 + $0x168] sm:$0xff]  ;;  %v841_v58 = vld [vmem:[#allocation2 + $0x170] sm:$0xff]  ;;  %v5271_v16 = vpack.i.bf16 %v808_v12, %v807_v52 }
  0xdb   : > { %v5197_v62 = vpop.permute.xlu1 %3839  ;;  %v3835_v6 = vpop.permute.xlu0 %3834  ;;  %v873_v12 = vld [vmem:[#allocation2 + $0x171] sm:$0xff] }
  0xdc   : > { %v3837_v56 = vunpack.i.h.bf16 %v3835_v6  ;;  %v3836_v10 = vunpack.i.l.bf16 %v3835_v6  ;;  %v3842_v59 = vunpack.i.h.bf16 %v5197_v62  ;;  %v3841_v2 = vunpack.i.l.bf16 %v5197_v62 }
  0xdd   : > { %4129 = vrot.lane.b32.xlu1 %v5159_v38, %s6004_s22  ;;  %4124 = vrot.lane.b32.xlu0 %v5131_v3, %s6004_s22  ;;  %v2104_v3 = vsel %vm2097_vm8, %v2071_v31, %v3821_v5  ;;  %v630_v5 = vld [vmem:[#allocation2 + $0x68] sm:$0xff]  ;;  %v5273_v62 = vpack.i.bf16 %v841_v58, %v840_v57 }
  0xde   : > { %v2168_v28 = vsel %vm2163_vm10, %v2135_v18, %v3836_v10  ;;  %v2169_v30 = vsel %vm2163_vm10, %v2136_v22, %v3837_v56  ;;  %v2137_v40 = vsel %vm2130_vm9, %v2104_v3, %v3831_v17  ;;  %v5269_v56 = vpack.i.bf16 %v776_v1, %v775_v51 }
  0xdf   : > { %v5215_v21 = vpop.permute.xlu1 %3849  ;;  %v3845_v9 = vpop.permute.xlu0 %3844  ;;  %v2198_v33 = vpack.c.bf16 %v2169_v30, %v2168_v28  ;;  %v1943_v23 = vsel %vm386_vm0, %v630_v5, %v3842_v59  ;;  %v1942_v24 = vsel %vm386_vm0, %v629_v4, %v3841_v2 }
  0xe0   : > { %v3847_v37 = vunpack.i.h.bf16 %v3845_v9  ;;  %v3846_v25 = vunpack.i.l.bf16 %v3845_v9  ;;  %v3852_v53 = vunpack.i.h.bf16 %v5215_v21  ;;  %v3851_v54 = vunpack.i.l.bf16 %v5215_v21 }
  0xe1   : > { %4139 = vrot.lane.b32.xlu1 %v5161_v39, %s4565_s16  ;;  %4134 = vrot.lane.b32.xlu0 %v5149_v19, %s4565_s16  ;;  %v901_v19 = vld [vmem:[#allocation2 + $0x142] sm:$0xff] }
  0xe2   : > { %3571 = vmatprep.mubr.msk.bf16.mxu0 %vm2232_vm11, %v2198_v33  ;;  %v2171_v41 = vsel %vm2163_vm10, %v2138_v15, %v3847_v37  ;;  %v2170_v42 = vsel %vm2163_vm10, %v2137_v40, %v3846_v25  ;;  %v5243_v47 = vpack.i.bf16 %v901_v19, %v900_v27  ;;  %v1945_v17 = vsel %vm386_vm0, %v632_v61, %v3852_v53 }
  0xe3   : > { %v3860_v43 = vpop.permute.xlu1 %3859  ;;  %v3855_v44 = vpop.permute.xlu0 %3854  ;;  %v2199_v45 = vpack.c.bf16 %v2171_v41, %v2170_v42  ;;  %v1944_v18 = vsel %vm386_vm0, %v631_v60, %v3851_v54 }
  0xe4   : > { %v3862_v35 = vunpack.i.h.bf16 %v3860_v43  ;;  %v3861_v63 = vunpack.i.l.bf16 %v3860_v43  ;;  %v3857_v6 = vunpack.i.h.bf16 %v3855_v44  ;;  %v3856_v50 = vunpack.i.l.bf16 %v3855_v44 }
  0xe5   : > { %4149 = vrot.lane.b32.xlu1 %v5219_v29, %s4566_s15  ;;  %4144 = vrot.lane.b32.xlu0 %v5157_v34, %s4566_s15 }
  0xe6   : > { %3572 = vmatmul.mubr.msk.bf16.gmra.mrb[4].mxu0 %vm2232_vm11, %v2199_v45  ;;  %v1976_v28 = vsel %vm432_vm3, %v1944_v18, %v3861_v63  ;;  %v1977_v30 = vsel %vm432_vm3, %v1945_v17, %v3862_v35  ;;  %v1975_v21 = vsel %vm432_vm3, %v1943_v23, %v3857_v6  ;;  %v1974_v31 = vsel %vm432_vm3, %v1942_v24, %v3856_v50 }
  0xe7   : > { %v3870_v26 = vpop.permute.xlu1 %3869  ;;  %v5237_v46 = vpop.permute.xlu0 %3864 }
  0xe8   : > { %v3872_v10 = vunpack.i.h.bf16 %v3870_v26  ;;  %v3871_v8 = vunpack.i.l.bf16 %v3870_v26  ;;  %v3866_v22 = vunpack.i.l.bf16 %v5237_v46 }
  0xe9   : > { %4159 = vrot.lane.b32.xlu1 %v5157_v34, %s4560_s25  ;;  %4154 = vrot.lane.b32.xlu0 %v5159_v38, %s5993_s12 }
  0xea   : > { %v2009_v3 = vsel %vm1998_vm5, %v1976_v28, %v3871_v8  ;;  %v2010_v36 = vsel %vm1998_vm5, %v1977_v30, %v3872_v10 }
  0xeb   : > { %v5245_v48 = vpop.permute.xlu1 %3879  ;;  %v5247_v14 = vpop.permute.xlu0 %3874 }
  0xec   : > { %v3877_v32 = vunpack.i.h.bf16 %v5247_v14  ;;  %v3876_v9 = vunpack.i.l.bf16 %v5247_v14  ;;  %v3882_v43 = vunpack.i.h.bf16 %v5245_v48  ;;  %v3881_v44 = vunpack.i.l.bf16 %v5245_v48 }
  0xed   : > { %4169 = vrot.lane.b32.xlu1 %v5219_v29, %s4560_s25  ;;  %4164 = vrot.lane.b32.xlu0 %v5243_v47, %s5993_s12 }
  0xee   : > { %v2042_v60 = vsel %vm2031_vm6, %v2009_v3, %v3881_v44  ;;  %v2043_v61 = vsel %vm2031_vm6, %v2010_v36, %v3882_v43  ;;  %v747_v36 = vld [vmem:[#allocation2 + $0x180] sm:$0xff]  ;;  %v812_v43 = vld [vmem:[#allocation2 + $0x18a] sm:$0xff]  ;;  %v5373_v44 = vld [vmem:[#allocation2 + $0x198] sm:$0xff] }
  0xef   : > { %v5253_v20 = vpop.permute.xlu1 %3889  ;;  %v5255_v34 = vpop.permute.xlu0 %3884 }
  0xf0   : > { %v3887_v37 = vunpack.i.h.bf16 %v5255_v34  ;;  %v3886_v25 = vunpack.i.l.bf16 %v5255_v34  ;;  %v3891_v14 = vunpack.i.l.bf16 %v5253_v20 }
  0xf1   : > { %4179 = vrot.lane.b32.xlu1 %v5243_v47, %s5989_s29  ;;  %4174 = vrot.lane.b32.xlu0 %v5159_v38, %s5989_s29  ;;  %v3867_v38 = vunpack.i.h.bf16 %v5237_v46  ;;  %v3892_v46 = vunpack.i.h.bf16 %v5253_v20  ;;  %v872_v20 = vld [vmem:[#allocation2 + $0x169] sm:$0xff] }
  0xf2   : > { %v2075_v5 = vsel %vm2064_vm7, %v2042_v60, %v3891_v14  ;;  %v5329_v10 = vpack.i.bf16 %v873_v12, %v872_v20 }
  0xf3   : > { %v5267_v7 = vpop.permute.xlu1 %3899  ;;  %v3895_v13 = vpop.permute.xlu0 %3894  ;;  %v2008_v15 = vsel %vm1998_vm5, %v1975_v21, %v3867_v38  ;;  %v2076_v6 = vsel %vm2064_vm7, %v2043_v61, %v3892_v46 }
  0xf4   : > { %v3897_v41 = vunpack.i.h.bf16 %v3895_v13  ;;  %v3896_v42 = vunpack.i.l.bf16 %v3895_v13  ;;  %v2041_v19 = vsel %vm2031_vm6, %v2008_v15, %v3877_v32  ;;  %v3902_v48 = vunpack.i.h.bf16 %v5267_v7 }
  0xf5   : > { %4189 = vrot.lane.b32.xlu1 %v5261_v55, %s4562_s30  ;;  %4184 = vrot.lane.b32.xlu0 %v5161_v39, %s4562_s30  ;;  %v2007_v39 = vsel %vm1998_vm5, %v1974_v31, %v3866_v22  ;;  %v2074_v34 = vsel %vm2064_vm7, %v2041_v19, %v3887_v37  ;;  %v3901_v51 = vunpack.i.l.bf16 %v5267_v7  ;;  %v905_v31 = vld [vmem:[#allocation2 + $0x172] sm:$0xff]  ;;  %v748_v37 = vld [vmem:[#allocation2 + $0x188] sm:$0xff] }
  0xf6   : > { %v2040_v27 = vsel %vm2031_vm6, %v2007_v39, %v3876_v9  ;;  %v2107_v52 = vsel %vm2097_vm8, %v2074_v34, %v3897_v41  ;;  %v2109_v8 = vsel %vm2097_vm8, %v2076_v6, %v3902_v48  ;;  %v811_v39 = vld [vmem:[#allocation2 + $0x182] sm:$0xff]  ;;  %v5381_v14 = vpack.i.bf16 %v748_v37, %v747_v36 }
  0xf7   : > { %v3910_v33 = vpop.permute.xlu1 %3909  ;;  %v3905_v40 = vpop.permute.xlu0 %3904  ;;  %v2073_v49 = vsel %vm2064_vm7, %v2040_v27, %v3886_v25  ;;  %v634_v27 = vld [vmem:[#allocation2 + $0x98] sm:$0xff] }
  0xf8   : > { %v3907_v45 = vunpack.i.h.bf16 %v3905_v40  ;;  %v3906_v26 = vunpack.i.l.bf16 %v3905_v40  ;;  %v3912_v57 = vunpack.i.h.bf16 %v3910_v33  ;;  %v3911_v58 = vunpack.i.l.bf16 %v3910_v33  ;;  %v780_v40 = vld [vmem:[#allocation2 + $0x189] sm:$0xff] }
  0xf9   : > { %4199 = vrot.lane.b32.xlu1 %v5269_v56, %s6003_s13  ;;  %4194 = vrot.lane.b32.xlu0 %v5219_v29, %s6003_s13  ;;  %v2106_v29 = vsel %vm2097_vm8, %v2073_v49, %v3896_v42  ;;  %v635_v49 = vld [vmem:[#allocation2 + $0xa8] sm:$0xff] }
  0xfa   : > { %v2139_v59 = vsel %vm2130_vm9, %v2106_v29, %v3906_v26  ;;  %v2140_v2 = vsel %vm2130_vm9, %v2107_v52, %v3907_v45  ;;  %v2142_v38 = vsel %vm2130_vm9, %v2109_v8, %v3912_v57  ;;  %v5375_v45 = vld [vmem:[#allocation2 + $0x1a0] sm:$0xff]  ;;  %v633_v26 = vld [vmem:[#allocation2 + $0x90] sm:$0xff] }
  0xfb   : > { %v5307_v11 = vpop.permute.xlu1 %3919  ;;  %v3915_v1 = vpop.permute.xlu0 %3914 }
  0xfc   : > { %v3917_v53 = vunpack.i.h.bf16 %v3915_v1  ;;  %v3916_v54 = vunpack.i.l.bf16 %v3915_v1  ;;  %v3922_v15 = vunpack.i.h.bf16 %v5307_v11  ;;  %v3921_v41 = vunpack.i.l.bf16 %v5307_v11  ;;  %v636_v11 = vld [vmem:[#allocation2 + $0xb0] sm:$0xff] }
  0xfd   : > { %4209 = vrot.lane.b32.xlu1 %v5271_v16, %s6004_s22  ;;  %4204 = vrot.lane.b32.xlu0 %v5243_v47, %s6004_s22  ;;  %v2108_v47 = vsel %vm2097_vm8, %v2075_v5, %v3901_v51 }
  0xfe   : > { %v2172_v35 = vsel %vm2163_vm10, %v2139_v59, %v3916_v54  ;;  %v2173_v63 = vsel %vm2163_vm10, %v2140_v2, %v3917_v53  ;;  %v2141_v18 = vsel %vm2130_vm9, %v2108_v47, %v3911_v58  ;;  %v5391_v53 = vpack.i.bf16 %v812_v43, %v811_v39 }
  0xff   : > { %v5325_v4 = vpop.permute.xlu1 %3929  ;;  %v3925_v50 = vpop.permute.xlu0 %3924  ;;  %v2200_v7 = vpack.c.bf16 %v2173_v63, %v2172_v35  ;;  %v4298_v54 = vpack.i.bf16 %v5375_v45, %v5373_v44  ;;  %v1947_v20 = vsel %vm386_vm0, %v634_v27, %v3922_v15  ;;  %v1946_v12 = vsel %vm386_vm0, %v633_v26, %v3921_v41  ;;  %v877_v27 = vld [vmem:[#allocation2 + $0x1a1] sm:$0xff] }
 0x100   : > { %v3927_v13 = vunpack.i.h.bf16 %v3925_v50  ;;  %v3926_v17 = vunpack.i.l.bf16 %v3925_v50  ;;  %v3932_v19 = vunpack.i.h.bf16 %v5325_v4  ;;  %v3931_v46 = vunpack.i.l.bf16 %v5325_v4 }
 0x101   : > { %4219 = vrot.lane.b32.xlu1 %v5273_v62, %s4565_s16  ;;  %4214 = vrot.lane.b32.xlu0 %v5261_v55, %s4565_s16  ;;  %v904_v55 = vld [vmem:[#allocation2 + $0x16a] sm:$0xff] }
 0x102   : > { %3575 = vmatprep.mubr.msk.bf16.mxu0 %vm2232_vm11, %v2200_v7  ;;  %v2175_v22 = vsel %vm2163_vm10, %v2142_v38, %v3927_v13  ;;  %v2174_v23 = vsel %vm2163_vm10, %v2141_v18, %v3926_v17  ;;  %v5357_v9 = vpack.i.bf16 %v905_v31, %v904_v55  ;;  %v1949_v59 = vsel %vm386_vm0, %v636_v11, %v3932_v19 }
 0x103   : > { %v3940_v24 = vpop.permute.xlu1 %3939  ;;  %v5342_v28 = vpop.permute.xlu0 %3934  ;;  %v2201_v30 = vpack.c.bf16 %v2175_v22, %v2174_v23  ;;  %v1948_v2 = vsel %vm386_vm0, %v635_v49, %v3931_v46 }
 0x104   : > { %v3942_v34 = vunpack.i.h.bf16 %v3940_v24  ;;  %v3941_v48 = vunpack.i.l.bf16 %v3940_v24  ;;  %v3937_v1 = vunpack.i.h.bf16 %v5342_v28  ;;  %v3936_v29 = vunpack.i.l.bf16 %v5342_v28 }
 0x105   : > { %4229 = vrot.lane.b32.xlu1 %v5329_v10, %s4566_s15  ;;  %4224 = vrot.lane.b32.xlu0 %v5269_v56, %s4566_s15 }
 0x106   : > { %3576 = vmatmul.mubr.msk.bf16.gmra.mrb[8].mxu0 %vm2232_vm11, %v2201_v30  ;;  %v1980_v35 = vsel %vm432_vm3, %v1948_v2, %v3941_v48  ;;  %v1981_v63 = vsel %vm432_vm3, %v1949_v59, %v3942_v34  ;;  %v1979_v6 = vsel %vm432_vm3, %v1947_v20, %v3937_v1  ;;  %v1978_v50 = vsel %vm432_vm3, %v1946_v12, %v3936_v29 }
 0x107   : > { %v5349_v21 = vpop.permute.xlu1 %3949  ;;  %v5351_v32 = vpop.permute.xlu0 %3944 }
 0x108   : > { %v3952_v57 = vunpack.i.h.bf16 %v5349_v21  ;;  %v3947_v60 = vunpack.i.h.bf16 %v5351_v32  ;;  %v3946_v61 = vunpack.i.l.bf16 %v5351_v32 }
 0x109   : > { %4239 = vrot.lane.b32.xlu1 %v5269_v56, %s4560_s25  ;;  %4234 = vrot.lane.b32.xlu0 %v5271_v16, %s5993_s12  ;;  %v779_v56 = vld [vmem:[#allocation2 + $0x181] sm:$0xff] }
 0x10a   : > { %v5385_v51 = vpack.i.bf16 %v780_v40, %v779_v56  ;;  %v2014_v17 = vsel %vm1998_vm5, %v1981_v63, %v3952_v57  ;;  %v2012_v23 = vsel %vm1998_vm5, %v1979_v6, %v3947_v60 }
 0x10b   : > { %v5359_v33 = vpop.permute.xlu1 %3959  ;;  %v5361_v3 = vpop.permute.xlu0 %3954 }
 0x10c   : > { %v3962_v4 = vunpack.i.h.bf16 %v5359_v33  ;;  %v3961_v5 = vunpack.i.l.bf16 %v5359_v33  ;;  %v3957_v7 = vunpack.i.h.bf16 %v5361_v3  ;;  %v3956_v47 = vunpack.i.l.bf16 %v5361_v3 }
 0x10d   : > { %4249 = vrot.lane.b32.xlu1 %v5329_v10, %s4560_s25  ;;  %4244 = vrot.lane.b32.xlu0 %v5357_v9, %s5993_s12  ;;  %s5991_s25 = smov 40  }
 0x10e   : > { %v2045_v33 = vsel %vm2031_vm6, %v2012_v23, %v3957_v7  ;;  %v637_v23 = vld [vmem:[#allocation2 + $0xc0] sm:$0xff] }
 0x10f   : > { %v5367_v25 = vpop.permute.xlu1 %3969  ;;  %v5371_v42 = vpop.permute.xlu0 %3964 }
 0x110   : > { %v3967_v18 = vunpack.i.h.bf16 %v5371_v42  ;;  %v3966_v38 = vunpack.i.l.bf16 %v5371_v42  ;;  %v3972_v3 = vunpack.i.h.bf16 %v5367_v25  ;;  %v3971_v36 = vunpack.i.l.bf16 %v5367_v25  ;;  %v876_v25 = vld [vmem:[#allocation2 + $0x199] sm:$0xff] }
 0x111   : > { %4259 = vrot.lane.b32.xlu1 %v5357_v9, %s5989_s29  ;;  %4254 = vrot.lane.b32.xlu0 %v5271_v16, %s5989_s29  ;;  %v3951_v16 = vunpack.i.l.bf16 %v5349_v21  ;;  %v2047_v21 = vsel %vm2031_vm6, %v2014_v17, %v3962_v4  ;;  %v4308_v57 = vpack.i.bf16 %v877_v27, %v876_v25 }
 0x112   : > { %v2078_v40 = vsel %vm2064_vm7, %v2045_v33, %v3967_v18  ;;  %v639_v18 = vld [vmem:[#allocation2 + $0xd8] sm:$0xff] }
 0x113   : > { %v5389_v52 = vpop.permute.xlu1 %3979  ;;  %v3975_v58 = vpop.permute.xlu0 %3974  ;;  %v2013_v13 = vsel %vm1998_vm5, %v1980_v35, %v3951_v16 }
 0x114   : > { %v3977_v24 = vunpack.i.h.bf16 %v3975_v58  ;;  %v3976_v28 = vunpack.i.l.bf16 %v3975_v58  ;;  %v2046_v30 = vsel %vm2031_vm6, %v2013_v13, %v3961_v5  ;;  %v3982_v39 = vunpack.i.h.bf16 %v5389_v52 }
 0x115   : > { %4269 = vrot.lane.b32.xlu1 %v5381_v14, %s4562_s30  ;;  %4264 = vrot.lane.b32.xlu0 %v5273_v62, %s4562_s30  ;;  %v2011_v62 = vsel %vm1998_vm5, %v1978_v50, %v3946_v61  ;;  %v3981_v15 = vunpack.i.l.bf16 %v5389_v52  ;;  %v2079_v29 = vsel %vm2064_vm7, %v2046_v30, %v3971_v36  ;;  %v2080_v52 = vsel %vm2064_vm7, %v2047_v21, %v3972_v3  ;;  %v909_v61 = vld [vmem:[#allocation2 + $0x1a2] sm:$0xff]  ;;  %s6006_s30 = smov 40  }
 0x116   : > { %v2044_v32 = vsel %vm2031_vm6, %v2011_v62, %v3956_v47  ;;  %v2111_v42 = vsel %vm2097_vm8, %v2078_v40, %v3977_v24  ;;  %v2113_v16 = vsel %vm2097_vm8, %v2080_v52, %v3982_v39  ;;  %v4318_v44 = vpack.i.bf16 %v909_v61, %v908_v0 }
 0x117   : > { %v5415_v8 = vpop.permute.xlu1 %3989  ;;  %v3985_v22 = vpop.permute.xlu0 %3984  ;;  %v2077_v56 = vsel %vm2064_vm7, %v2044_v32, %v3966_v38  ;;  %v640_v38 = vld [vmem:[#allocation2 + $0xe0] sm:$0xff] }
 0x118   : > { %v3987_v55 = vunpack.i.h.bf16 %v3985_v22  ;;  %v3986_v31 = vunpack.i.l.bf16 %v3985_v22  ;;  %v3992_v19 = vunpack.i.h.bf16 %v5415_v8  ;;  %v3991_v46 = vunpack.i.l.bf16 %v5415_v8 }
 0x119   : > { %4279 = vrot.lane.b32.xlu1 %v5385_v51, %s6003_s13  ;;  %4274 = vrot.lane.b32.xlu0 %v5329_v10, %s6003_s13  ;;  %v2110_v10 = vsel %vm2097_vm8, %v2077_v56, %v3976_v28 }
 0x11a   : > { %v2143_v49 = vsel %vm2130_vm9, %v2110_v10, %v3986_v31  ;;  %v2144_v11 = vsel %vm2130_vm9, %v2111_v42, %v3987_v55  ;;  %v2146_v60 = vsel %vm2130_vm9, %v2113_v16, %v3992_v19 }
 0x11b   : > { %v5433_v37 = vpop.permute.xlu1 %3999  ;;  %v3995_v41 = vpop.permute.xlu0 %3994 }
 0x11c   : > { %v3997_v43 = vunpack.i.h.bf16 %v3995_v41  ;;  %v3996_v26 = vunpack.i.l.bf16 %v3995_v41  ;;  %v4001_v17 = vunpack.i.l.bf16 %v5433_v37 }
 0x11d   : > { %4289 = vrot.lane.b32.xlu1 %v5391_v53, %s6004_s22  ;;  %4284 = vrot.lane.b32.xlu0 %v5357_v9, %s6004_s22  ;;  %v2112_v9 = vsel %vm2097_vm8, %v2079_v29, %v3981_v15  ;;  %s5995_s22 = smov 64  }
 0x11e   : > { %v2176_v34 = vsel %vm2163_vm10, %v2143_v49, %v3996_v26  ;;  %v2177_v48 = vsel %vm2163_vm10, %v2144_v11, %v3997_v43  ;;  %v2145_v2 = vsel %vm2130_vm9, %v2112_v9, %v3991_v46  ;;  %v1950_v56 = vsel %vm386_vm0, %v637_v23, %v4001_v17 }
 0x11f   : > { %v5451_v1 = vpop.permute.xlu1 %4009  ;;  %v2202_v20 = vpack.c.bf16 %v2177_v48, %v2176_v34  ;;  %v4005_v12 = vpop.permute.xlu0 %4004 }
 0x120   : > { %v4007_v58 = vunpack.i.h.bf16 %v4005_v12  ;;  %v4006_v59 = vunpack.i.l.bf16 %v4005_v12  ;;  %v4012_v8 = vunpack.i.h.bf16 %v5451_v1  ;;  %v4011_v13 = vunpack.i.l.bf16 %v5451_v1 }
 0x121   : > { %4299 = vrot.lane.b32.xlu1 %v4298_v54, %s4565_s16  ;;  %4294 = vrot.lane.b32.xlu0 %v5381_v14, %s4565_s16 }
 0x122   : > { %3579 = vmatprep.mubr.msk.bf16.mxu0 %vm2232_vm11, %v2202_v20  ;;  %v2179_v35 = vsel %vm2163_vm10, %v2146_v60, %v4007_v58  ;;  %v2178_v63 = vsel %vm2163_vm10, %v2145_v2, %v4006_v59  ;;  %v1953_v32 = vsel %vm386_vm0, %v640_v38, %v4012_v8  ;;  %v1952_v33 = vsel %vm386_vm0, %v639_v18, %v4011_v13 }
 0x123   : > { %v4020_v4 = vpop.permute.xlu1 %4019  ;;  %v2203_v5 = vpack.c.bf16 %v2179_v35, %v2178_v63  ;;  %v4015_v6 = vpop.permute.xlu0 %4014 }
 0x124   : > { %v4022_v22 = vunpack.i.h.bf16 %v4020_v4  ;;  %v4021_v62 = vunpack.i.l.bf16 %v4020_v4  ;;  %v4017_v24 = vunpack.i.h.bf16 %v4015_v6  ;;  %v4016_v28 = vunpack.i.l.bf16 %v4015_v6 }
 0x125   : > { %4309 = vrot.lane.b32.xlu1 %v4308_v57, %s4566_s15  ;;  %4304 = vrot.lane.b32.xlu0 %v5385_v51, %s4566_s15  ;;  %v4002_v51 = vunpack.i.h.bf16 %v5433_v37  ;;  %s4569_s15 = smov 56  }
 0x126   : > { %3580 = vmatmul.mubr.msk.bf16.gmra.mrb[12].mxu0 %vm2232_vm11, %v2203_v5  ;;  %v1984_v40 = vsel %vm432_vm3, %v1952_v33, %v4021_v62  ;;  %v1985_v39 = vsel %vm432_vm3, %v1953_v32, %v4022_v22  ;;  %v1982_v41 = vsel %vm432_vm3, %v1950_v56, %v4016_v28 }
 0x127   : > { %v4030_v45 = vpop.permute.xlu1 %4029  ;;  %v4025_v14 = vpop.permute.xlu0 %4024 }
 0x128   : > { %v4032_v21 = vunpack.i.h.bf16 %v4030_v45  ;;  %v4031_v55 = vunpack.i.l.bf16 %v4030_v45  ;;  %v4027_v3 = vunpack.i.h.bf16 %v4025_v14  ;;  %v4026_v36 = vunpack.i.l.bf16 %v4025_v14 }
 0x129   : > { %4319 = vrot.lane.b32.xlu1 %v4318_v44, %s5993_s12  ;;  %4314 = vrot.lane.b32.xlu0 %v5391_v53, %s5993_s12  ;;  %v638_v53 = vld [vmem:[#allocation2 + $0xc8] sm:$0xff] }
 0x12a   : > { %v1951_v37 = vsel %vm386_vm0, %v638_v53, %v4002_v51  ;;  %v2017_v26 = vsel %vm1998_vm5, %v1984_v40, %v4031_v55  ;;  %v2018_v25 = vsel %vm1998_vm5, %v1985_v39, %v4032_v21  ;;  %v2015_v49 = vsel %vm1998_vm5, %v1982_v41, %v4026_v36 }
 0x12b   : > { %v5510_v54 = vpop.permute.xlu1 %4039  ;;  %v4035_v50 = vpop.permute.xlu0 %4034  ;;  %v1983_v15 = vsel %vm432_vm3, %v1951_v37, %v4017_v24 }
 0x12c   : > { %v4037_v10 = vunpack.i.h.bf16 %v4035_v50  ;;  %v4036_v42 = vunpack.i.l.bf16 %v4035_v50  ;;  %v2016_v11 = vsel %vm1998_vm5, %v1983_v15, %v4027_v3  ;;  %v4042_v1 = vunpack.i.h.bf16 %v5510_v54 }
 0x12d   : > { %v4041_v29 = vunpack.i.l.bf16 %v5510_v54 }
 0x12e   : > { %v2048_v12 = vsel %vm2031_vm6, %v2015_v49, %v4036_v42  ;;  %v2049_v57 = vsel %vm2031_vm6, %v2016_v11, %v4037_v10  ;;  %v2051_v50 = vsel %vm2031_vm6, %v2018_v25, %v4042_v1  ;;  %v643_v10 = vld [vmem:[#allocation2 + $0x108] sm:$0xff]  ;;  %v644_v42 = vld [vmem:[#allocation2 + $0x110] sm:$0xff] }
 0x12f   : > { %v5512_v7 = vpop.permute.xlu1 %4049  ;;  %v4045_v47 = vpop.permute.xlu0 %4044  ;;  %v2050_v54 = vsel %vm2031_vm6, %v2017_v26, %v4041_v29  ;;  %v641_v25 = vld [vmem:[#allocation2 + $0xf0] sm:$0xff] }
 0x130   : > { %v4047_v27 = vunpack.i.h.bf16 %v4045_v47  ;;  %v4046_v19 = vunpack.i.l.bf16 %v4045_v47  ;;  %v4052_v9 = vunpack.i.h.bf16 %v5512_v7  ;;  %v4051_v16 = vunpack.i.l.bf16 %v5512_v7 }
 0x132   : > { %v2081_v59 = vsel %vm2064_vm7, %v2048_v12, %v4046_v19  ;;  %v2082_v2 = vsel %vm2064_vm7, %v2049_v57, %v4047_v27  ;;  %v2083_v13 = vsel %vm2064_vm7, %v2050_v54, %v4051_v16  ;;  %v2084_v51 = vsel %vm2064_vm7, %v2051_v50, %v4052_v9  ;;  %v642_v27 = vld [vmem:[#allocation2 + $0xf8] sm:$0xff] }
 0x133   : > { %v4060_v30 = vpop.permute.xlu1 %4059  ;;  %v4055_v31 = vpop.permute.xlu0 %4054 }
 0x134   : > { %v4057_v34 = vunpack.i.h.bf16 %v4055_v31  ;;  %v4056_v48 = vunpack.i.l.bf16 %v4055_v31  ;;  %v4062_v60 = vunpack.i.h.bf16 %v4060_v30  ;;  %v4061_v0 = vunpack.i.l.bf16 %v4060_v30 }
 0x136   : > { %v2114_v35 = vsel %vm2097_vm8, %v2081_v59, %v4056_v48  ;;  %v2115_v63 = vsel %vm2097_vm8, %v2082_v2, %v4057_v34  ;;  %v2116_v38 = vsel %vm2097_vm8, %v2083_v13, %v4061_v0  ;;  %v2117_v22 = vsel %vm2097_vm8, %v2084_v51, %v4062_v60 }
 0x137   : > { %v4070_v43 = vpop.permute.xlu1 %4069  ;;  %v4065_v46 = vpop.permute.xlu0 %4064 }
 0x138   : > { %v4067_v52 = vunpack.i.h.bf16 %v4065_v46  ;;  %v4066_v20 = vunpack.i.l.bf16 %v4065_v46  ;;  %v4072_v6 = vunpack.i.h.bf16 %v4070_v43  ;;  %v4071_v44 = vunpack.i.l.bf16 %v4070_v43 }
 0x13a   : > { %v2147_v45 = vsel %vm2130_vm9, %v2114_v35, %v4066_v20  ;;  %v2148_v14 = vsel %vm2130_vm9, %v2115_v63, %v4067_v52  ;;  %v2149_v53 = vsel %vm2130_vm9, %v2116_v38, %v4071_v44  ;;  %v2150_v24 = vsel %vm2130_vm9, %v2117_v22, %v4072_v6 }
 0x13b   : > { %v5536_v58 = vpop.permute.xlu1 %4079  ;;  %v4075_v61 = vpop.permute.xlu0 %4074 }
 0x13c   : > { %v4077_v4 = vunpack.i.h.bf16 %v4075_v61  ;;  %v4076_v5 = vunpack.i.l.bf16 %v4075_v61  ;;  %v4082_v15 = vunpack.i.h.bf16 %v5536_v58  ;;  %v4081_v41 = vunpack.i.l.bf16 %v5536_v58 }
 0x13e   : > { %v2180_v7 = vsel %vm2163_vm10, %v2147_v45, %v4076_v5  ;;  %v2181_v47 = vsel %vm2163_vm10, %v2148_v14, %v4077_v4  ;;  %v1955_v12 = vsel %vm386_vm0, %v642_v27, %v4082_v15  ;;  %v1954_v57 = vsel %vm386_vm0, %v641_v25, %v4081_v41 }
 0x13f   : > { %v4090_v8 = vpop.permute.xlu1 %4089  ;;  %v2204_v17 = vpack.c.bf16 %v2181_v47, %v2180_v7  ;;  %v4085_v18 = vpop.permute.xlu0 %4084 }
 0x140   : > { %v4087_v62 = vunpack.i.h.bf16 %v4085_v18  ;;  %v4086_v23 = vunpack.i.l.bf16 %v4085_v18  ;;  %v4092_v40 = vunpack.i.h.bf16 %v4090_v8  ;;  %v4091_v39 = vunpack.i.l.bf16 %v4090_v8 }
 0x141   : > { %3583 = vmatprep.mubr.msk.bf16.mxu0 %vm2232_vm11, %v2204_v17 }
 0x142   : > { %v2183_v28 = vsel %vm2163_vm10, %v2150_v24, %v4087_v62  ;;  %v2182_v30 = vsel %vm2163_vm10, %v2149_v53, %v4086_v23  ;;  %v1957_v1 = vsel %vm386_vm0, %v644_v42, %v4092_v40  ;;  %v1956_v29 = vsel %vm386_vm0, %v643_v10, %v4091_v39 }
 0x143   : > { %v4100_v21 = vpop.permute.xlu1 %4099  ;;  %v2205_v55 = vpack.c.bf16 %v2183_v28, %v2182_v30  ;;  %v4095_v31 = vpop.permute.xlu0 %4094 }
 0x144   : > { %v4102_v43 = vunpack.i.h.bf16 %v4100_v21  ;;  %v4101_v26 = vunpack.i.l.bf16 %v4100_v21  ;;  %v4097_v19 = vunpack.i.h.bf16 %v4095_v31  ;;  %v4096_v46 = vunpack.i.l.bf16 %v4095_v31 }
 0x145   : > { %3584 = vmatmul.mubr.msk.bf16.gmra.mrb[16].mxu0 %vm2232_vm11, %v2205_v55 }
 0x146   : > { %v1988_v9 = vsel %vm432_vm3, %v1956_v29, %v4101_v26  ;;  %v1989_v16 = vsel %vm432_vm3, %v1957_v1, %v4102_v43  ;;  %v1987_v58 = vsel %vm432_vm3, %v1955_v12, %v4097_v19  ;;  %v1986_v59 = vsel %vm432_vm3, %v1954_v57, %v4096_v46 }
 0x147   : > { %v4110_v32 = vpop.permute.xlu1 %4109  ;;  %v4105_v33 = vpop.permute.xlu0 %4104 }
 0x148   : > { %v4112_v11 = vunpack.i.h.bf16 %v4110_v32  ;;  %v4111_v34 = vunpack.i.l.bf16 %v4110_v32  ;;  %v4107_v52 = vunpack.i.h.bf16 %v4105_v33  ;;  %v4106_v20 = vunpack.i.l.bf16 %v4105_v33 }
 0x14a   : > { %v2021_v61 = vsel %vm1998_vm5, %v1988_v9, %v4111_v34  ;;  %v2022_v35 = vsel %vm1998_vm5, %v1989_v16, %v4112_v11  ;;  %v2019_v6 = vsel %vm1998_vm5, %v1986_v59, %v4106_v20  ;;  %v2020_v44 = vsel %vm1998_vm5, %v1987_v58, %v4107_v52 }
 0x14b   : > { %v5558_v3 = vpop.permute.xlu1 %4119  ;;  %v4115_v36 = vpop.permute.xlu0 %4114 }
 0x14c   : > { %v4117_v2 = vunpack.i.h.bf16 %v4115_v36  ;;  %v4116_v60 = vunpack.i.l.bf16 %v4115_v36  ;;  %v4122_v54 = vunpack.i.h.bf16 %v5558_v3  ;;  %v4121_v50 = vunpack.i.l.bf16 %v5558_v3 }
 0x14e   : > { %v2052_v8 = vsel %vm2031_vm6, %v2019_v6, %v4116_v60  ;;  %v2053_v13 = vsel %vm2031_vm6, %v2020_v44, %v4117_v2  ;;  %v2054_v3 = vsel %vm2031_vm6, %v2021_v61, %v4121_v50  ;;  %v2055_v36 = vsel %vm2031_vm6, %v2022_v35, %v4122_v54  ;;  %v647_v2 = vld [vmem:[#allocation2 + $0x138] sm:$0xff]  ;;  %v648_v60 = vld [vmem:[#allocation2 + $0x140] sm:$0xff] }
 0x14f   : > { %v5560_v37 = vpop.permute.xlu1 %4129  ;;  %v4125_v56 = vpop.permute.xlu0 %4124  ;;  %v645_v35 = vld [vmem:[#allocation2 + $0x120] sm:$0xff] }
 0x150   : > { %v4127_v63 = vunpack.i.h.bf16 %v4125_v56  ;;  %v4126_v4 = vunpack.i.l.bf16 %v4125_v56  ;;  %v4132_v51 = vunpack.i.h.bf16 %v5560_v37  ;;  %v4131_v17 = vunpack.i.l.bf16 %v5560_v37 }
 0x152   : > { %v2085_v38 = vsel %vm2064_vm7, %v2052_v8, %v4126_v4  ;;  %v2086_v22 = vsel %vm2064_vm7, %v2053_v13, %v4127_v63  ;;  %v2087_v39 = vsel %vm2064_vm7, %v2054_v3, %v4131_v17  ;;  %v2088_v15 = vsel %vm2064_vm7, %v2055_v36, %v4132_v51  ;;  %v646_v63 = vld [vmem:[#allocation2 + $0x128] sm:$0xff] }
 0x153   : > { %v4140_v49 = vpop.permute.xlu1 %4139  ;;  %v4135_v48 = vpop.permute.xlu0 %4134 }
 0x154   : > { %v4137_v45 = vunpack.i.h.bf16 %v4135_v48  ;;  %v4136_v14 = vunpack.i.l.bf16 %v4135_v48  ;;  %v4142_v62 = vunpack.i.h.bf16 %v4140_v49  ;;  %v4141_v23 = vunpack.i.l.bf16 %v4140_v49 }
 0x156   : > { %v2118_v24 = vsel %vm2097_vm8, %v2085_v38, %v4136_v14  ;;  %v2119_v28 = vsel %vm2097_vm8, %v2086_v22, %v4137_v45  ;;  %v2120_v42 = vsel %vm2097_vm8, %v2087_v39, %v4141_v23  ;;  %v2121_v43 = vsel %vm2097_vm8, %v2088_v15, %v4142_v62 }
 0x157   : > { %v4150_v0 = vpop.permute.xlu1 %4149  ;;  %v4145_v5 = vpop.permute.xlu0 %4144 }
 0x158   : > { %v4147_v7 = vunpack.i.h.bf16 %v4145_v5  ;;  %v4146_v47 = vunpack.i.l.bf16 %v4145_v5  ;;  %v4152_v55 = vunpack.i.h.bf16 %v4150_v0  ;;  %v4151_v31 = vunpack.i.l.bf16 %v4150_v0 }
 0x15a   : > { %v2151_v32 = vsel %vm2130_vm9, %v2118_v24, %v4146_v47  ;;  %v2152_v33 = vsel %vm2130_vm9, %v2119_v28, %v4147_v7  ;;  %v2153_v27 = vsel %vm2130_vm9, %v2120_v42, %v4151_v31  ;;  %v2154_v19 = vsel %vm2130_vm9, %v2121_v43, %v4152_v55 }
 0x15b   : > { %v5582_v18 = vpop.permute.xlu1 %4159  ;;  %v4155_v53 = vpop.permute.xlu0 %4154 }
 0x15c   : > { %v4157_v30 = vunpack.i.h.bf16 %v4155_v53  ;;  %v4156_v21 = vunpack.i.l.bf16 %v4155_v53  ;;  %v4162_v58 = vunpack.i.h.bf16 %v5582_v18  ;;  %v4161_v59 = vunpack.i.l.bf16 %v5582_v18 }
 0x15e   : > { %v2184_v37 = vsel %vm2163_vm10, %v2151_v32, %v4156_v21  ;;  %v2185_v56 = vsel %vm2163_vm10, %v2152_v33, %v4157_v30  ;;  %v1959_v8 = vsel %vm386_vm0, %v646_v63, %v4162_v58  ;;  %v1958_v13 = vsel %vm386_vm0, %v645_v35, %v4161_v59 }
 0x15f   : > { %v4170_v40 = vpop.permute.xlu1 %4169  ;;  %v2206_v41 = vpack.c.bf16 %v2185_v56, %v2184_v37  ;;  %v4165_v10 = vpop.permute.xlu0 %4164 }
 0x160   : > { %v4167_v26 = vunpack.i.h.bf16 %v4165_v10  ;;  %v4166_v25 = vunpack.i.l.bf16 %v4165_v10  ;;  %v4172_v9 = vunpack.i.h.bf16 %v4170_v40  ;;  %v4171_v16 = vunpack.i.l.bf16 %v4170_v40 }
 0x161   : > { %3587 = vmatprep.mubr.msk.bf16.mxu0 %vm2232_vm11, %v2206_v41 }
 0x162   : > { %v2187_v46 = vsel %vm2163_vm10, %v2154_v19, %v4167_v26  ;;  %v2186_v49 = vsel %vm2163_vm10, %v2153_v27, %v4166_v25  ;;  %v1961_v54 = vsel %vm386_vm0, %v648_v60, %v4172_v9  ;;  %v1960_v50 = vsel %vm386_vm0, %v647_v2, %v4171_v16 }
 0x163   : > { %v4180_v11 = vpop.permute.xlu1 %4179  ;;  %v2207_v34 = vpack.c.bf16 %v2187_v46, %v2186_v49  ;;  %v4175_v48 = vpop.permute.xlu0 %4174 }
 0x164   : > { %v4182_v0 = vunpack.i.h.bf16 %v4180_v11  ;;  %v4181_v61 = vunpack.i.l.bf16 %v4180_v11  ;;  %v4177_v4 = vunpack.i.h.bf16 %v4175_v48  ;;  %v4176_v5 = vunpack.i.l.bf16 %v4175_v48 }
 0x165   : > { %3588 = vmatmul.mubr.msk.bf16.gmra.mrb[20].mxu0 %vm2232_vm11, %v2207_v34 }
 0x166   : > { %v1992_v51 = vsel %vm432_vm3, %v1960_v50, %v4181_v61  ;;  %v1993_v17 = vsel %vm432_vm3, %v1961_v54, %v4182_v0  ;;  %v1991_v18 = vsel %vm432_vm3, %v1959_v8, %v4177_v4  ;;  %v1990_v38 = vsel %vm432_vm3, %v1958_v13, %v4176_v5 }
 0x167   : > { %v4190_v1 = vpop.permute.xlu1 %4189  ;;  %v4185_v29 = vpop.permute.xlu0 %4184 }
 0x168   : > { %v4192_v44 = vunpack.i.h.bf16 %v4190_v1  ;;  %v4191_v45 = vunpack.i.l.bf16 %v4190_v1  ;;  %v4187_v7 = vunpack.i.h.bf16 %v4185_v29  ;;  %v4186_v47 = vunpack.i.l.bf16 %v4185_v29 }
 0x16a   : > { %v2025_v53 = vsel %vm1998_vm5, %v1992_v51, %v4191_v45  ;;  %v2026_v24 = vsel %vm1998_vm5, %v1993_v17, %v4192_v44  ;;  %v2023_v55 = vsel %vm1998_vm5, %v1990_v38, %v4186_v47  ;;  %v2024_v31 = vsel %vm1998_vm5, %v1991_v18, %v4187_v7 }
 0x16b   : > { %v5604_v52 = vpop.permute.xlu1 %4199  ;;  %v4195_v20 = vpop.permute.xlu0 %4194 }
 0x16c   : > { %v4197_v22 = vunpack.i.h.bf16 %v4195_v20  ;;  %v4196_v62 = vunpack.i.l.bf16 %v4195_v20  ;;  %v4202_v3 = vunpack.i.h.bf16 %v5604_v52  ;;  %v4201_v36 = vunpack.i.l.bf16 %v5604_v52 }
 0x16e   : > { %v2056_v40 = vsel %vm2031_vm6, %v2023_v55, %v4196_v62  ;;  %v2057_v39 = vsel %vm2031_vm6, %v2024_v31, %v4197_v22  ;;  %v2058_v52 = vsel %vm2031_vm6, %v2025_v53, %v4201_v36  ;;  %v2059_v20 = vsel %vm2031_vm6, %v2026_v24, %v4202_v3  ;;  %v4492_v24 = vld [vmem:[#allocation2 + $0x150] sm:$0xff]  ;;  %v4494_v55 = vld [vmem:[#allocation2 + $0x168] sm:$0xff] }
 0x16f   : > { %v5606_v12 = vpop.permute.xlu1 %4209  ;;  %v4205_v57 = vpop.permute.xlu0 %4204 }
 0x170   : > { %v4207_v28 = vunpack.i.h.bf16 %v4205_v57  ;;  %v4206_v30 = vunpack.i.l.bf16 %v4205_v57  ;;  %v4212_v15 = vunpack.i.h.bf16 %v5606_v12  ;;  %v4211_v41 = vunpack.i.l.bf16 %v5606_v12 }
 0x172   : > { %v2089_v42 = vsel %vm2064_vm7, %v2056_v40, %v4206_v30  ;;  %v2090_v43 = vsel %vm2064_vm7, %v2057_v39, %v4207_v28  ;;  %v2091_v16 = vsel %vm2064_vm7, %v2058_v52, %v4211_v41  ;;  %v2092_v58 = vsel %vm2064_vm7, %v2059_v20, %v4212_v15  ;;  %v4493_v30 = vld [vmem:[#allocation2 + $0x170] sm:$0xff] }
 0x173   : > { %v4220_v6 = vpop.permute.xlu1 %4219  ;;  %v4215_v14 = vpop.permute.xlu0 %4214 }
 0x174   : > { %v4217_v32 = vunpack.i.h.bf16 %v4215_v14  ;;  %v4216_v33 = vunpack.i.l.bf16 %v4215_v14  ;;  %v4222_v26 = vunpack.i.h.bf16 %v4220_v6  ;;  %v4221_v25 = vunpack.i.l.bf16 %v4220_v6 }
 0x176   : > { %v2122_v19 = vsel %vm2097_vm8, %v2089_v42, %v4216_v33  ;;  %v2123_v46 = vsel %vm2097_vm8, %v2090_v43, %v4217_v32  ;;  %v2124_v60 = vsel %vm2097_vm8, %v2091_v16, %v4221_v25  ;;  %v2125_v0 = vsel %vm2097_vm8, %v2092_v58, %v4222_v26 }
 0x177   : > { %v4230_v23 = vpop.permute.xlu1 %4229  ;;  %v4225_v21 = vpop.permute.xlu0 %4224 }
 0x178   : > { %v4227_v37 = vunpack.i.h.bf16 %v4225_v21  ;;  %v4226_v56 = vunpack.i.l.bf16 %v4225_v21  ;;  %v4232_v34 = vunpack.i.h.bf16 %v4230_v23  ;;  %v4231_v48 = vunpack.i.l.bf16 %v4230_v23  ;;  %v4491_v23 = vld [vmem:[#allocation2 + $0x158] sm:$0xff] }
 0x17a   : > { %v2155_v1 = vsel %vm2130_vm9, %v2122_v19, %v4226_v56  ;;  %v2156_v29 = vsel %vm2130_vm9, %v2123_v46, %v4227_v37  ;;  %v2157_v63 = vsel %vm2130_vm9, %v2124_v60, %v4231_v48  ;;  %v2158_v4 = vsel %vm2130_vm9, %v2125_v0, %v4232_v34 }
 0x17b   : > { %v4240_v10 = vpop.permute.xlu1 %4239  ;;  %v4235_v27 = vpop.permute.xlu0 %4234 }
 0x17c   : > { %v4237_v49 = vunpack.i.h.bf16 %v4235_v27  ;;  %v4236_v11 = vunpack.i.l.bf16 %v4235_v27  ;;  %v4242_v7 = vunpack.i.h.bf16 %v4240_v10  ;;  %v4241_v47 = vunpack.i.l.bf16 %v4240_v10 }
 0x17e   : > { %v2188_v12 = vsel %vm2163_vm10, %v2155_v1, %v4236_v11  ;;  %v2189_v57 = vsel %vm2163_vm10, %v2156_v29, %v4237_v49  ;;  %v1963_v53 = vsel %vm386_vm0, %v4491_v23, %v4242_v7  ;;  %v1962_v28 = vsel %vm386_vm0, %v4492_v24, %v4241_v47 }
 0x17f   : > { %v4250_v9 = vpop.permute.xlu1 %4249  ;;  %v2208_v59 = vpack.c.bf16 %v2189_v57, %v2188_v12  ;;  %v4245_v2 = vpop.permute.xlu0 %4244 }
 0x180   : > { %v4247_v61 = vunpack.i.h.bf16 %v4245_v2  ;;  %v4246_v35 = vunpack.i.l.bf16 %v4245_v2  ;;  %v4252_v8 = vunpack.i.h.bf16 %v4250_v9  ;;  %v4251_v13 = vunpack.i.l.bf16 %v4250_v9 }
 0x181   : > { %3591 = vmatprep.mubr.msk.bf16.mxu0 %vm2232_vm11, %v2208_v59 }
 0x182   : > { %v2191_v5 = vsel %vm2163_vm10, %v2158_v4, %v4247_v61  ;;  %v2190_v6 = vsel %vm2163_vm10, %v2157_v63, %v4246_v35  ;;  %v1965_v21 = vsel %vm386_vm0, %v4493_v30, %v4252_v8  ;;  %v1964_v31 = vsel %vm386_vm0, %v4494_v55, %v4251_v13  ;;  %v5671_v63 = vld [vmem:[%s5979_s6] ss:$0 sm:$0xff] }
 0x183   : > { %v4260_v44 = vpop.permute.xlu1 %4259  ;;  %v2209_v45 = vpack.c.bf16 %v2191_v5, %v2190_v6  ;;  %v4255_v14 = vpop.permute.xlu0 %4254 }
 0x184   : > { %v4262_v17 = vunpack.i.h.bf16 %v4260_v44  ;;  %v4261_v18 = vunpack.i.l.bf16 %v4260_v44  ;;  %v4257_v22 = vunpack.i.h.bf16 %v4255_v14  ;;  %v4256_v62 = vunpack.i.l.bf16 %v4255_v14 }
 0x185   : > { %3592 = vmatmul.mubr.msk.bf16.gmra.mrb[24].mxu0 %vm2232_vm11, %v2209_v45 }
 0x186   : > { %v1996_v33 = vsel %vm432_vm3, %v1964_v31, %v4261_v18  ;;  %v1997_v3 = vsel %vm432_vm3, %v1965_v21, %v4262_v17  ;;  %v1995_v40 = vsel %vm432_vm3, %v1963_v53, %v4257_v22  ;;  %v1994_v39 = vsel %vm432_vm3, %v1962_v28, %v4256_v62 }
 0x187   : > { %v4270_v54 = vpop.permute.xlu1 %4269  ;;  %v4265_v50 = vpop.permute.xlu0 %4264 }
 0x188   : > { %v4272_v36 = vunpack.i.h.bf16 %v4270_v54  ;;  %v4271_v37 = vunpack.i.l.bf16 %v4270_v54  ;;  %v4267_v15 = vunpack.i.h.bf16 %v4265_v50  ;;  %v4266_v41 = vunpack.i.l.bf16 %v4265_v50 }
 0x18a   : > { %v2029_v11 = vsel %vm1998_vm5, %v1996_v33, %v4271_v37  ;;  %v2030_v34 = vsel %vm1998_vm5, %v1997_v3, %v4272_v36  ;;  %v2027_v52 = vsel %vm1998_vm5, %v1994_v39, %v4266_v41  ;;  %v2028_v20 = vsel %vm1998_vm5, %v1995_v40, %v4267_v15 }
 0x18b   : > { %v4280_v51 = vpop.permute.xlu1 %4279  ;;  %v4275_v38 = vpop.permute.xlu0 %4274 }
 0x18c   : > { %v4282_v10 = vunpack.i.h.bf16 %v4280_v51  ;;  %v4281_v42 = vunpack.i.l.bf16 %v4280_v51  ;;  %v4277_v43 = vunpack.i.h.bf16 %v4275_v38  ;;  %v4276_v26 = vunpack.i.l.bf16 %v4275_v38 }
 0x18e   : > { %v2062_v9 = vsel %vm2031_vm6, %v2029_v11, %v4281_v42  ;;  %v2063_v16 = vsel %vm2031_vm6, %v2030_v34, %v4282_v10  ;;  %v2060_v58 = vsel %vm2031_vm6, %v2027_v52, %v4276_v26  ;;  %v2061_v59 = vsel %vm2031_vm6, %v2028_v20, %v4277_v43  ;;  %v2598_v42 = vld [vmem:[#allocation3 + $0x1] ss:$2 sm:$0xff] }
 0x18f   : > { %v4290_v32 = vpop.permute.xlu1 %4289  ;;  %v4285_v56 = vpop.permute.xlu0 %4284 }
 0x190   : > { %v4292_v25 = vunpack.i.h.bf16 %v4290_v32  ;;  %v4291_v27 = vunpack.i.l.bf16 %v4290_v32  ;;  %v4287_v19 = vunpack.i.h.bf16 %v4285_v56  ;;  %v4286_v46 = vunpack.i.l.bf16 %v4285_v56 }
 0x192   : > { %v2095_v2 = vsel %vm2064_vm7, %v2062_v9, %v4291_v27  ;;  %v2096_v60 = vsel %vm2064_vm7, %v2063_v16, %v4292_v25  ;;  %v2093_v0 = vsel %vm2064_vm7, %v2060_v58, %v4286_v46  ;;  %v2094_v61 = vsel %vm2064_vm7, %v2061_v59, %v4287_v19  ;;  %v2614_v25 = vld [vmem:[#allocation3 + $0x2] ss:$2 sm:$0xff] }
 0x193   : > { %v4300_v49 = vpop.permute.xlu1 %4299  ;;  %v4295_v29 = vpop.permute.xlu0 %4294 }
 0x194   : > { %v4302_v48 = vunpack.i.h.bf16 %v4300_v49  ;;  %v4301_v1 = vunpack.i.l.bf16 %v4300_v49  ;;  %v4297_v12 = vunpack.i.h.bf16 %v4295_v29  ;;  %v4296_v57 = vunpack.i.l.bf16 %v4295_v29 }
 0x196   : > { %v2128_v4 = vsel %vm2097_vm8, %v2095_v2, %v4301_v1  ;;  %v2129_v5 = vsel %vm2097_vm8, %v2096_v60, %v4302_v48  ;;  %v2126_v14 = vsel %vm2097_vm8, %v2093_v0, %v4296_v57  ;;  %v2127_v54 = vsel %vm2097_vm8, %v2094_v61, %v4297_v12 }
 0x197   : > { %v4310_v35 = vpop.permute.xlu1 %4309  ;;  %v4305_v45 = vpop.permute.xlu0 %4304 }
 0x198   : > { %v4312_v6 = vunpack.i.h.bf16 %v4310_v35  ;;  %v4311_v44 = vunpack.i.l.bf16 %v4310_v35  ;;  %v4307_v50 = vunpack.i.h.bf16 %v4305_v45  ;;  %v4306_v7 = vunpack.i.l.bf16 %v4305_v45 }
 0x199   : > { %v3569_v47 = vpop.f32.mrb[0].mxu0 }
 0x19a   : > { %v2161_v8 = vsel %vm2130_vm9, %v2128_v4, %v4311_v44  ;;  %v2162_v13 = vsel %vm2130_vm9, %v2129_v5, %v4312_v6  ;;  %vm2448_vm14 = vcmp.gt.f32.partialorder %v3569_v47, 0.0  ;;  %v2487_v51 = vmul.f32 %v3569_v47, %v5671_v63  ;;  %v2319_v17 = vpop.f32.mrb[1].mxu0 }
 0x19b   : > { %v2159_v18 = vsel %vm2130_vm9, %v2126_v14, %v4306_v7  ;;  %v2160_v38 = vsel %vm2130_vm9, %v2127_v54, %v4307_v50  ;;  %vm2446_vm15 = vcmp.gt.f32.partialorder %v2319_v17, 0.0  ;;  %v2485_v22 = vmul.f32 %v5671_v63, %v2319_v17  ;;  %v3570_v62 = vpop.f32.mrb[2].mxu0  ;;  %v4320_v23 = vpop.permute.xlu1 %4319 }
 0x19c   : > { %v2519_v53 = vsel %vm2448_vm14, %v3569_v47, %v2487_v51  ;;  %vm2449_vm1 = vcmp.gt.f32.partialorder %v3570_v62, 0.0  ;;  %v2488_v24 = vmul.f32 %v3570_v62, %v5671_v63  ;;  %v4322_v28 = vunpack.i.h.bf16 %v4320_v23  ;;  %v4315_v30 = vpop.permute.xlu0 %4314  ;;  %v2322_v21 = vpop.f32.mrb[3].mxu0 }
 0x19d   : > { %2552 = vst.msk [vmem:[#allocation3 + $0x31] sm:$0xff] %vm432_vm3, %v2519_v53  ;;  %v2517_v55 = vsel %vm2446_vm15, %v2319_v17, %v2485_v22  ;;  %v4321_v31 = vunpack.i.l.bf16 %v4320_v23  ;;  %v4317_v32 = vunpack.i.h.bf16 %v4315_v30  ;;  %v4316_v33 = vunpack.i.l.bf16 %v4315_v30 }
 0x19e   : > { %2550 = vst.msk [vmem:[#allocation3 + $0x19] sm:$0xff] %vm432_vm3, %v2517_v55  ;;  %v2520_v3 = vsel %vm2449_vm1, %v3570_v62, %v2488_v24  ;;  %v2195_v36 = vsel %vm2163_vm10, %v2162_v13, %v4322_v28  ;;  %vm2447_vm2 = vcmp.gt.f32.partialorder %v2322_v21, 0.0  ;;  %v2486_v37 = vmul.f32 %v5671_v63, %v2322_v21 }
 0x19f   : > { %2553 = vst.msk [vmem:[#allocation3 + $0x39] sm:$0xff] %vm432_vm3, %v2520_v3  ;;  %v2194_v56 = vsel %vm2163_vm10, %v2161_v8, %v4321_v31  ;;  %v2192_v40 = vsel %vm2163_vm10, %v2159_v18, %v4316_v33  ;;  %v2193_v39 = vsel %vm2163_vm10, %v2160_v38, %v4317_v32 }
 0x1a0   : > { %v2211_v15 = vpack.c.bf16 %v2195_v36, %v2194_v56  ;;  %v2210_v41 = vpack.c.bf16 %v2193_v39, %v2192_v40  ;;  %v2518_v10 = vsel %vm2447_vm2, %v2322_v21, %v2486_v37 }
 0x1a1   : > { %2551 = vst.msk [vmem:[#allocation3 + $0x21] sm:$0xff] %vm432_vm3, %v2518_v10 }
 0x1a2   : > { %3595 = vmatprep.mubr.msk.bf16.mxu0 %vm2232_vm11, %v2210_v41 }
 0x1a3   : > { %3596 = vmatmul.mubr.msk.bf16.gmra.mrb[28].mxu0 %vm2232_vm11, %v2211_v15 }
 0x1a6   : > { %v2600_v43 = vld [vmem:[#allocation3 + $0x31] ss:$2 sm:$0xff]  ;;  %v2616_v27 = vld [vmem:[#allocation3 + $0x32] ss:$2 sm:$0xff] }
 0x1a7   : > { %v4323_v26 = vpack.i.bf16 %v2600_v43, %v2598_v42  ;;  %v4328_v19 = vpack.i.bf16 %v2616_v27, %v2614_v25  ;;  %v2677_v16 = vld [vmem:[#allocation3 + $0x30] ss:$2 sm:$0xff]  ;;  %v2693_v60 = vld [vmem:[#allocation3 + $0x31] ss:$2 sm:$0xff] }
 0x1a8   : > { %v2709_v35 = vld [vmem:[#allocation3 + $0x32] ss:$2 sm:$0xff]  ;;  %v2645_v14 = vld [vmem:[#allocation3 + $0x19] ss:$2 sm:$0xff] }
 0x1a9   : > { %4324 = vrot.lane.b32.xlu0 %v4323_v26, %s5989_s29  ;;  %v2629_v6 = vld [vmem:[#allocation3 + $0x18] ss:$2 sm:$0xff]  ;;  %v4486_v25 = vld [vmem:[%s5975_s2] sm:$0xff]  }
 0x1aa   : > { %v2661_v13 = vld [vmem:[#allocation3 + $0x1a] ss:$2 sm:$0xff]  ;;  %3599 = vmatprep.subr.bf16.mxu1 %v4486_v25 }
 0x1ab   : > { %3600 = vmatpush3.bf16.msra.mxu1 %v4486_v25 }
 0x1ad   : > { %4329 = vrot.lane.b32.xlu0 %v4328_v19, %s6003_s13  ;;  %v4487_v19 = vld [vmem:[%s5975_s2 + $0x8] sm:$0xff]  }
 0x1ae   : > { %3601 = vmatprep.subr.bf16.mxu1 %v4487_v19 }
 0x1af   : > { %3602 = vmatpush3.bf16.msra.mxu1 %v4487_v19 }
 0x1b9   : > { %v3573_v46 = vpop.f32.mrb[4].mxu0 }
 0x1ba   : > { %vm2452_vm5 = vcmp.gt.f32.partialorder %v3573_v46, 0.0  ;;  %v2491_v49 = vmul.f32 %v3573_v46, %v5671_v63  ;;  %v2335_v11 = vpop.f32.mrb[5].mxu0 }
 0x1bb   : > { %vm2450_vm7 = vcmp.gt.f32.partialorder %v2335_v11, 0.0  ;;  %v2489_v34 = vmul.f32 %v5671_v63, %v2335_v11  ;;  %v3574_v48 = vpop.f32.mrb[6].mxu0 }
 0x1bc   : > { %v2523_v1 = vsel %vm2452_vm5, %v3573_v46, %v2491_v49  ;;  %vm2453_vm9 = vcmp.gt.f32.partialorder %v3574_v48, 0.0  ;;  %v2492_v29 = vmul.f32 %v3574_v48, %v5671_v63  ;;  %v2338_v52 = vpop.f32.mrb[7].mxu0 }
 0x1bd   : > { %2556 = vst.msk [vmem:[#allocation3 + $0x61] sm:$0xff] %vm432_vm3, %v2523_v1  ;;  %v2521_v20 = vsel %vm2450_vm7, %v2335_v11, %v2489_v34  ;;  %vm2451_vm11 = vcmp.gt.f32.partialorder %v2338_v52, 0.0  ;;  %v2490_v12 = vmul.f32 %v5671_v63, %v2338_v52 }
 0x1be   : > { %2554 = vst.msk [vmem:[#allocation3 + $0x49] sm:$0xff] %vm432_vm3, %v2521_v20  ;;  %v2524_v57 = vsel %vm2453_vm9, %v3574_v48, %v2492_v29  ;;  %v4488_v29 = vld [vmem:[%s5975_s2 + $0x10] sm:$0xff]   ;;  %vm3101_vm9 = vcmask 1043456  }
 0x1bf   : > { %2557 = vst.msk [vmem:[#allocation3 + $0x69] sm:$0xff] %vm432_vm3, %v2524_v57  ;;  %v2522_v9 = vsel %vm2451_vm11, %v2338_v52, %v2490_v12  ;;  %3603 = vmatprep.subr.bf16.mxu1 %v4488_v29  ;;  %v4489_v57 = vld [vmem:[%s5975_s2 + $0x18] sm:$0xff]  }
 0x1c0   : > { %2555 = vst.msk [vmem:[#allocation3 + $0x51] sm:$0xff] %vm432_vm3, %v2522_v9  ;;  %3604 = vmatpush3.bf16.msra.mxu1 %v4488_v29 }
 0x1c1   : > { %3605 = vmatprep.subr.bf16.mxu1 %v4489_v57 }
 0x1c4   : > { %3606 = vmatpush3.bf16.msra.mxu1 %v4489_v57 }
 0x1c6   : > { %v2679_v58 = vld [vmem:[#allocation3 + $0x60] ss:$2 sm:$0xff]  ;;  %v2695_v2 = vld [vmem:[#allocation3 + $0x61] ss:$2 sm:$0xff] }
 0x1c7   : > { %v4333_v59 = vpack.i.bf16 %v2679_v58, %v2677_v16  ;;  %v4338_v0 = vpack.i.bf16 %v2695_v2, %v2693_v60  ;;  %v2711_v61 = vld [vmem:[#allocation3 + $0x62] ss:$2 sm:$0xff]  ;;  %v2647_v45 = vld [vmem:[#allocation3 + $0x49] ss:$2 sm:$0xff] }
 0x1c8   : > { %v4343_v4 = vpack.i.bf16 %v2711_v61, %v2709_v35  ;;  %v2631_v5 = vld [vmem:[#allocation3 + $0x48] ss:$2 sm:$0xff]  ;;  %v4353_v54 = vpack.i.bf16 %v2647_v45, %v2645_v14  ;;  %v2602_v30 = vld [vmem:[#allocation3 + $0x61] ss:$2 sm:$0xff] }
 0x1c9   : > { %4334 = vrot.lane.b32.xlu0 %v4333_v59, %s5997_s14  ;;  %v4348_v44 = vpack.i.bf16 %v2631_v5, %v2629_v6  ;;  %v2663_v50 = vld [vmem:[#allocation3 + $0x4a] ss:$2 sm:$0xff] }
 0x1ca   : > { %v4358_v18 = vpack.i.bf16 %v2663_v50, %v2661_v13  ;;  %v2618_v32 = vld [vmem:[#allocation3 + $0x62] ss:$2 sm:$0xff] }
 0x1cb   : > { %v4490_v58 = vld [vmem:[%s5975_s2 + $0x20] ss:$0 sps:$4 sm:$0xff]  }
 0x1cc   : > { %3628 = vmatprep.subr.msk.bf16.mxu1 %vm3101_vm9, %v4490_v58  ;;  %v3103_v2 = vsel %vm3101_vm9, %v4490_v58, 0  ;;  %vm3021_vm9 = vcmask 392192  }
 0x1cd   : > { %4339 = vrot.lane.b32.xlu0 %v4338_v0, %s4569_s15  ;;  %3608 = vmatpush3.bf16.msra.mxu1 %v3103_v2 }
 0x1d1   : > { %4344 = vrot.lane.b32.xlu0 %v4343_v4, %s5995_s22 }
 0x1d5   : > { %4349 = vrot.lane.b32.xlu0 %v4348_v44, %s4565_s16 }
 0x1d9   : > { %4354 = vrot.lane.b32.xlu0 %v4353_v54, %s5993_s12  ;;  %v3577_v7 = vpop.f32.mrb[8].mxu0  ;;  %s6009_s12 = smov 64  }
 0x1da   : > { %vm2456_vm12 = vcmp.gt.f32.partialorder %v3577_v7, 0.0  ;;  %v2495_v47 = vmul.f32 %v3577_v7, %v5671_v63  ;;  %v2351_v8 = vpop.f32.mrb[9].mxu0 }
 0x1db   : > { %vm2454_vm13 = vcmp.gt.f32.partialorder %v2351_v8, 0.0  ;;  %v2493_v51 = vmul.f32 %v5671_v63, %v2351_v8  ;;  %v3578_v17 = vpop.f32.mrb[10].mxu0 }
 0x1dc   : > { %v2527_v38 = vsel %vm2456_vm12, %v3577_v7, %v2495_v47  ;;  %vm2457_vm14 = vcmp.gt.f32.partialorder %v3578_v17, 0.0  ;;  %v2496_v22 = vmul.f32 %v3578_v17, %v5671_v63  ;;  %v2354_v62 = vpop.f32.mrb[11].mxu0 }
 0x1dd   : > { %2560 = vst.msk [vmem:[#allocation3 + $0x91] sm:$0xff] %vm432_vm3, %v2527_v38  ;;  %v2525_v23 = vsel %vm2454_vm13, %v2351_v8, %v2493_v51  ;;  %vm2455_vm15 = vcmp.gt.f32.partialorder %v2354_v62, 0.0  ;;  %v2494_v53 = vmul.f32 %v5671_v63, %v2354_v62  ;;  %4359 = vrot.lane.b32.xlu0 %v4358_v18, %s5991_s25 }
 0x1de   : > { %2558 = vst.msk [vmem:[#allocation3 + $0x79] sm:$0xff] %vm432_vm3, %v2525_v23  ;;  %v2528_v24 = vsel %vm2457_vm14, %v3578_v17, %v2496_v22 }
 0x1df   : > { %2561 = vst.msk [vmem:[#allocation3 + $0x99] sm:$0xff] %vm432_vm3, %v2528_v24  ;;  %v2526_v28 = vsel %vm2455_vm15, %v2354_v62, %v2494_v53 }
 0x1e0   : > { %2559 = vst.msk [vmem:[#allocation3 + $0x81] sm:$0xff] %vm432_vm3, %v2526_v28 }
 0x1e6   : > { %v2604_v21 = vld [vmem:[#allocation3 + $0x91] ss:$2 sm:$0xff]  ;;  %v2620_v31 = vld [vmem:[#allocation3 + $0x92] ss:$2 sm:$0xff] }
 0x1e7   : > { %v4363_v55 = vpack.i.bf16 %v2604_v21, %v2602_v30  ;;  %v4368_v33 = vpack.i.bf16 %v2620_v31, %v2618_v32  ;;  %v2713_v27 = vld [vmem:[#allocation3 + $0x92] ss:$2 sm:$0xff]  ;;  %v2697_v52 = vld [vmem:[#allocation3 + $0x91] ss:$2 sm:$0xff] }
 0x1e8   : > { %v2681_v49 = vld [vmem:[#allocation3 + $0x90] ss:$2 sm:$0xff]  ;;  %v2649_v60 = vld [vmem:[#allocation3 + $0x79] ss:$2 sm:$0xff] }
 0x1e9   : > { %4364 = vrot.lane.b32.xlu1 %v4363_v55, %s5989_s29  ;;  %v2633_v9 = vld [vmem:[#allocation3 + $0x78] ss:$2 sm:$0xff]  ;;  %s6005_s29 = smov 32  }
 0x1ea   : > { %v2665_v35 = vld [vmem:[#allocation3 + $0x7a] ss:$2 sm:$0xff] }
 0x1ed   : > { %4369 = vrot.lane.b32.xlu1 %v4368_v33, %s6003_s13 }
 0x1f9   : > { %v3581_v3 = vpop.f32.mrb[12].mxu0 }
 0x1fa   : > { %vm2460_vm1 = vcmp.gt.f32.partialorder %v3581_v3, 0.0  ;;  %v2499_v36 = vmul.f32 %v3581_v3, %v5671_v63  ;;  %v2367_v37 = vpop.f32.mrb[13].mxu0 }
 0x1fb   : > { %vm2458_vm2 = vcmp.gt.f32.partialorder %v2367_v37, 0.0  ;;  %v2497_v56 = vmul.f32 %v5671_v63, %v2367_v37  ;;  %v3582_v40 = vpop.f32.mrb[14].mxu0 }
 0x1fc   : > { %v2531_v39 = vsel %vm2460_vm1, %v3581_v3, %v2499_v36  ;;  %vm2461_vm5 = vcmp.gt.f32.partialorder %v3582_v40, 0.0  ;;  %v2500_v15 = vmul.f32 %v3582_v40, %v5671_v63  ;;  %v2370_v41 = vpop.f32.mrb[15].mxu0 }
 0x1fd   : > { %2564 = vst.msk [vmem:[#allocation3 + $0xc1] sm:$0xff] %vm432_vm3, %v2531_v39  ;;  %v2529_v10 = vsel %vm2458_vm2, %v2367_v37, %v2497_v56  ;;  %vm2459_vm7 = vcmp.gt.f32.partialorder %v2370_v41, 0.0  ;;  %v2498_v42 = vmul.f32 %v5671_v63, %v2370_v41 }
 0x1fe   : > { %2562 = vst.msk [vmem:[#allocation3 + $0xa9] sm:$0xff] %vm432_vm3, %v2529_v10  ;;  %v2532_v43 = vsel %vm2461_vm5, %v3582_v40, %v2500_v15 }
 0x1ff   : > { %2565 = vst.msk [vmem:[#allocation3 + $0xc9] sm:$0xff] %vm432_vm3, %v2532_v43  ;;  %v2530_v26 = vsel %vm2459_vm7, %v2370_v41, %v2498_v42  ;;  %vm3012_vm7 = vcmask 326656  }
 0x200   : > { %2563 = vst.msk [vmem:[#allocation3 + $0xb1] sm:$0xff] %vm432_vm3, %v2530_v26 }
 0x206   : > { %v2715_v46 = vld [vmem:[#allocation3 + $0xc2] ss:$2 sm:$0xff]  ;;  %v2699_v1 = vld [vmem:[#allocation3 + $0xc1] ss:$2 sm:$0xff] }
 0x207   : > { %v2683_v11 = vld [vmem:[#allocation3 + $0xc0] ss:$2 sm:$0xff]  ;;  %v4383_v34 = vpack.i.bf16 %v2715_v46, %v2713_v27  ;;  %v4378_v20 = vpack.i.bf16 %v2699_v1, %v2697_v52  ;;  %v2651_v59 = vld [vmem:[#allocation3 + $0xa9] ss:$2 sm:$0xff] }
 0x208   : > { %v4373_v48 = vpack.i.bf16 %v2683_v11, %v2681_v49  ;;  %v2635_v12 = vld [vmem:[#allocation3 + $0xa8] ss:$2 sm:$0xff]  ;;  %v4393_v0 = vpack.i.bf16 %v2651_v59, %v2649_v60  ;;  %v2606_v38 = vld [vmem:[#allocation3 + $0xc1] ss:$2 sm:$0xff] }
 0x209   : > { %4384 = vrot.lane.b32.xlu0 %v4383_v34, %s5995_s22  ;;  %v4388_v16 = vpack.i.bf16 %v2635_v12, %v2633_v9  ;;  %v2667_v61 = vld [vmem:[#allocation3 + $0xaa] ss:$2 sm:$0xff]  ;;  %s6008_s22 = smov 48  }
 0x20a   : > { %4374 = vrot.lane.b32.xlu1 %v4373_v48, %s5997_s14  ;;  %v4398_v4 = vpack.i.bf16 %v2667_v61, %v2665_v35  ;;  %v2622_v17 = vld [vmem:[#allocation3 + $0xc2] ss:$2 sm:$0xff]  ;;  %s6007_s14 = smov 8  }
 0x20b   : > { %v2582_v46 = vld [vmem:[#allocation3] ss:$2 sm:$0xff]  ;;  %v2584_v12 = vld [vmem:[#allocation3 + $0x30] ss:$2 sm:$0xff] }
 0x20e   : > { %4379 = vrot.lane.b32.xlu1 %v4378_v20, %s4569_s15 }
 0x212   : > { %4389 = vrot.lane.b32.xlu1 %v4388_v16, %s4565_s16 }
 0x216   : > { %4394 = vrot.lane.b32.xlu1 %v4393_v0, %s6005_s29 }
 0x218   : > { %v3585_v5 = vpop.f32.mrb[16].mxu0 }
 0x219   : > { %vm2464_vm11 = vcmp.gt.f32.partialorder %v3585_v5, 0.0  ;;  %v2503_v6 = vmul.f32 %v3585_v5, %v5671_v63  ;;  %v2383_v44 = vpop.f32.mrb[17].mxu0 }
 0x21a   : > { %4399 = vrot.lane.b32.xlu1 %v4398_v4, %s6006_s30  ;;  %vm2462_vm12 = vcmp.gt.f32.partialorder %v2383_v44, 0.0  ;;  %v2501_v45 = vmul.f32 %v5671_v63, %v2383_v44  ;;  %v3586_v14 = vpop.f32.mrb[18].mxu0 }
 0x21b   : > { %v2535_v54 = vsel %vm2464_vm11, %v3585_v5, %v2503_v6  ;;  %vm2465_vm13 = vcmp.gt.f32.partialorder %v3586_v14, 0.0  ;;  %v2386_v50 = vpop.f32.mrb[19].mxu0  ;;  %v2504_v47 = vmul.f32 %v3586_v14, %v5671_v63  ;;  %v4325_v53 = vpop.permute.xlu0 %4324  ;;  %vm3030_vm11 = vcmask 457728  }
 0x21c   : > { %2568 = vst.msk [vmem:[#allocation3 + $0xf1] sm:$0xff] %vm432_vm3, %v2535_v54  ;;  %v2533_v7 = vsel %vm2462_vm12, %v2383_v44, %v2501_v45  ;;  %vm2463_vm14 = vcmp.gt.f32.partialorder %v2386_v50, 0.0  ;;  %v2502_v8 = vmul.f32 %v5671_v63, %v2386_v50  ;;  %v4327_v27 = vunpack.i.h.bf16 %v4325_v53 }
 0x21d   : > { %2566 = vst.msk [vmem:[#allocation3 + $0xd9] sm:$0xff] %vm432_vm3, %v2533_v7  ;;  %v2536_v13 = vsel %vm2465_vm13, %v3586_v14, %v2504_v47  ;;  %v4326_v19 = vunpack.i.l.bf16 %v4325_v53  ;;  %vm3039_vm12 = vcmask 523264   ;;  %vm3088_vm13 = vcmask 588800  }
 0x21e   : > { %v2534_v51 = vsel %vm2463_vm14, %v2386_v50, %v2502_v8  ;;  %2569 = vst.msk [vmem:[#allocation3 + $0xf9] sm:$0xff] %vm432_vm3, %v2536_v13  ;;  %v2981_v58 = vsel %vm432_vm3, %v2584_v12, %v4327_v27 }
 0x21f   : > { %2567 = vst.msk [vmem:[#allocation3 + $0xe1] sm:$0xff] %vm432_vm3, %v2534_v51  ;;  %v4330_v24 = vpop.permute.xlu0 %4329  ;;  %v2980_v16 = vsel %vm432_vm3, %v2582_v46, %v4326_v19 }
 0x220   : > { %v4332_v49 = vunpack.i.h.bf16 %v4330_v24  ;;  %v4331_v11 = vunpack.i.l.bf16 %v4330_v24 }
 0x222   : > { %v2988_v2 = vsel %vm2031_vm6, %v2980_v16, %v4331_v11  ;;  %v2989_v60 = vsel %vm2031_vm6, %v2981_v58, %v4332_v49 }
 0x225   : > { %v2624_v18 = vld [vmem:[#allocation3 + $0xf2] ss:$2 sm:$0xff]  ;;  %v2608_v22 = vld [vmem:[#allocation3 + $0xf1] ss:$2 sm:$0xff] }
 0x226   : > { %v4408_v62 = vpack.i.bf16 %v2624_v18, %v2622_v17  ;;  %v4403_v23 = vpack.i.bf16 %v2608_v22, %v2606_v38  ;;  %v2685_v42 = vld [vmem:[#allocation3 + $0xf0] ss:$2 sm:$0xff]  ;;  %v2701_v48 = vld [vmem:[#allocation3 + $0xf1] ss:$2 sm:$0xff] }
 0x227   : > { %v2637_v59 = vld [vmem:[#allocation3 + $0xd8] ss:$2 sm:$0xff]  ;;  %v2653_v18 = vld [vmem:[#allocation3 + $0xd9] ss:$2 sm:$0xff] }
 0x228   : > { %4409 = vrot.lane.b32.xlu0 %v4408_v62, %s6003_s13  ;;  %4404 = vrot.lane.b32.xlu1 %v4403_v23, %s6007_s14 }
 0x238   : > { %v3589_v28 = vpop.f32.mrb[20].mxu0 }
 0x239   : > { %vm2468_vm15 = vcmp.gt.f32.partialorder %v3589_v28, 0.0  ;;  %v2507_v30 = vmul.f32 %v3589_v28, %v5671_v63  ;;  %v2399_v21 = vpop.f32.mrb[21].mxu0 }
 0x23a   : > { %vm2466_vm1 = vcmp.gt.f32.partialorder %v2399_v21, 0.0  ;;  %v2505_v55 = vmul.f32 %v5671_v63, %v2399_v21  ;;  %v3590_v32 = vpop.f32.mrb[22].mxu0 }
 0x23b   : > { %v5762_v31 = vpop.permute.xlu0 %4334  ;;  %v2539_v33 = vsel %vm2468_vm15, %v3589_v28, %v2507_v30  ;;  %vm2469_vm2 = vcmp.gt.f32.partialorder %v3590_v32, 0.0  ;;  %v2402_v3 = vpop.f32.mrb[23].mxu0  ;;  %v2508_v37 = vmul.f32 %v3590_v32, %v5671_v63 }
 0x23c   : > { %2572 = vst.msk [vmem:[#allocation3 + $0x121] sm:$0xff] %vm432_vm3, %v2539_v33  ;;  %v2537_v36 = vsel %vm2466_vm1, %v2399_v21, %v2505_v55  ;;  %vm2467_vm5 = vcmp.gt.f32.partialorder %v2402_v3, 0.0  ;;  %v2506_v56 = vmul.f32 %v5671_v63, %v2402_v3  ;;  %v4337_v44 = vunpack.i.h.bf16 %v5762_v31  ;;  %v2669_v55 = vld [vmem:[#allocation3 + $0xda] ss:$2 sm:$0xff] }
 0x23d   : > { %2570 = vst.msk [vmem:[#allocation3 + $0x109] sm:$0xff] %vm432_vm3, %v2537_v36  ;;  %v2540_v40 = vsel %vm2469_vm2, %v3590_v32, %v2508_v37  ;;  %v4336_v45 = vunpack.i.l.bf16 %v5762_v31 }
 0x23e   : > { %v2538_v39 = vsel %vm2467_vm5, %v2402_v3, %v2506_v56  ;;  %2573 = vst.msk [vmem:[#allocation3 + $0x129] sm:$0xff] %vm432_vm3, %v2540_v40  ;;  %v2717_v40 = vld [vmem:[#allocation3 + $0xf2] ss:$2 sm:$0xff] }
 0x23f   : > { %v4340_v15 = vpop.permute.xlu0 %4339  ;;  %2571 = vst.msk [vmem:[#allocation3 + $0x111] sm:$0xff] %vm432_vm3, %v2538_v39 }
 0x240   : > { %v4342_v7 = vunpack.i.h.bf16 %v4340_v15  ;;  %v4341_v47 = vunpack.i.l.bf16 %v4340_v15 }
 0x243   : > { %v4345_v41 = vpop.permute.xlu0 %4344 }
 0x244   : > { %v4347_v51 = vunpack.i.h.bf16 %v4345_v41  ;;  %v4346_v17 = vunpack.i.l.bf16 %v4345_v41 }
 0x245   : > { %v2687_v43 = vld [vmem:[#allocation3 + $0x120] ss:$2 sm:$0xff]  ;;  %v2703_v25 = vld [vmem:[#allocation3 + $0x121] ss:$2 sm:$0xff] }
 0x246   : > { %v4413_v26 = vpack.i.bf16 %v2687_v43, %v2685_v42  ;;  %v4418_v52 = vpack.i.bf16 %v2703_v25, %v2701_v48  ;;  %v2639_v20 = vld [vmem:[#allocation3 + $0x108] ss:$2 sm:$0xff]  ;;  %v2655_v50 = vld [vmem:[#allocation3 + $0x109] ss:$2 sm:$0xff] }
 0x247   : > { %v4350_v10 = vpop.permute.xlu0 %4349  ;;  %v4423_v61 = vpack.i.bf16 %v2639_v20, %v2637_v59  ;;  %v4428_v62 = vpack.i.bf16 %v2655_v50, %v2653_v18  ;;  %v2671_v30 = vld [vmem:[#allocation3 + $0x10a] ss:$2 sm:$0xff]  ;;  %v2610_v27 = vld [vmem:[#allocation3 + $0x121] ss:$2 sm:$0xff] }
 0x248   : > { %4414 = vrot.lane.b32.xlu0 %v4413_v26, %s6008_s22  ;;  %v4352_v1 = vunpack.i.h.bf16 %v4350_v10  ;;  %v4351_v29 = vunpack.i.l.bf16 %v4350_v10  ;;  %v4433_v31 = vpack.i.bf16 %v2671_v30, %v2669_v55  ;;  %v2719_v33 = vld [vmem:[#allocation3 + $0x122] ss:$2 sm:$0xff] }
 0x249   : > { %v4473_v41 = vpack.i.bf16 %v2719_v33, %v2717_v40  ;;  %v2626_v11 = vld [vmem:[#allocation3 + $0x122] ss:$2 sm:$0xff] }
 0x24a   : > { %v2997_v35 = vsel %vm2097_vm8, %v2989_v60, %v4352_v1  ;;  %v2996_v4 = vsel %vm2097_vm8, %v2988_v2, %v4351_v29  ;;  %v2586_v18 = vld [vmem:[#allocation3 + $0x60] ss:$2 sm:$0xff] }
 0x24b   : > { %v4355_v34 = vpop.permute.xlu0 %4354 }
 0x24c   : > { %v4357_v57 = vunpack.i.h.bf16 %v4355_v34  ;;  %v4356_v9 = vunpack.i.l.bf16 %v4355_v34  ;;  %4419 = vrot.lane.b32.xlu0 %v4418_v52, %s4569_s15 }
 0x24e   : > { %v3004_v14 = vsel %vm2163_vm10, %v2996_v4, %v4356_v9  ;;  %v3005_v54 = vsel %vm2163_vm10, %v2997_v35, %v4357_v57 }
 0x24f   : > { %v4360_v0 = vpop.permute.xlu0 %4359 }
 0x250   : > { %v4362_v5 = vunpack.i.h.bf16 %v4360_v0  ;;  %v4361_v6 = vunpack.i.l.bf16 %v4360_v0  ;;  %4424 = vrot.lane.b32.xlu0 %v4423_v61, %s4565_s16 }
 0x252   : > { %v3013_v8 = vsel %vm3012_vm7, %v3004_v14, %v4361_v6  ;;  %v3014_v13 = vsel %vm3012_vm7, %v3005_v54, %v4362_v5 }
 0x253   : > { %v3022_v38 = vsel %vm3021_vm9, %v3013_v8, %v4336_v45  ;;  %v3023_v22 = vsel %vm3021_vm9, %v3014_v13, %v4337_v44 }
 0x254   : > { %v3031_v23 = vsel %vm3030_vm11, %v3022_v38, %v4341_v47  ;;  %v3032_v53 = vsel %vm3030_vm11, %v3023_v22, %v4342_v7  ;;  %4429 = vrot.lane.b32.xlu0 %v4428_v62, %s6005_s29  ;;  %v2588_v38 = vld [vmem:[#allocation3 + $0x90] ss:$2 sm:$0xff] }
 0x255   : > { %v3040_v24 = vsel %vm3039_vm12, %v3031_v23, %v4346_v17  ;;  %v3041_v28 = vsel %vm3039_vm12, %v3032_v53, %v4347_v51 }
 0x256   : > { %v3048_v21 = vpack.c.bf16 %v3041_v28, %v3040_v24 }
 0x258   : > { %3609 = vmatprep.mubr.msk.bf16.mxu1 %vm3088_vm13, %v3048_v21  ;;  %v3593_v32 = vpop.f32.mrb[24].mxu0  ;;  %4434 = vrot.lane.b32.xlu0 %v4433_v31, %s6006_s30 }
 0x259   : > { %vm2472_vm14 = vcmp.gt.f32.partialorder %v3593_v32, 0.0  ;;  %v2511_v3 = vmul.f32 %v3593_v32, %v5671_v63  ;;  %v2415_v36 = vpop.f32.mrb[25].mxu0 }
 0x25a   : > { %vm2470_vm15 = vcmp.gt.f32.partialorder %v2415_v36, 0.0  ;;  %v2509_v37 = vmul.f32 %v5671_v63, %v2415_v36  ;;  %v3594_v56 = vpop.f32.mrb[26].mxu0 }
 0x25b   : > { %v2543_v39 = vsel %vm2472_vm14, %v3593_v32, %v2511_v3  ;;  %vm2473_vm1 = vcmp.gt.f32.partialorder %v3594_v56, 0.0  ;;  %v2418_v15 = vpop.f32.mrb[27].mxu0  ;;  %v2512_v42 = vmul.f32 %v3594_v56, %v5671_v63  ;;  %v4365_v48 = vpop.permute.xlu1 %4364 }
 0x25c   : > { %2576 = vst.msk [vmem:[#allocation3 + $0x151] sm:$0xff] %vm432_vm3, %v2543_v39  ;;  %v2541_v10 = vsel %vm2470_vm15, %v2415_v36, %v2509_v37  ;;  %vm2471_vm2 = vcmp.gt.f32.partialorder %v2418_v15, 0.0  ;;  %v2510_v43 = vmul.f32 %v5671_v63, %v2418_v15  ;;  %4474 = vrot.lane.b32.xlu0 %v4473_v41, %s6009_s12  ;;  %v4367_v14 = vunpack.i.h.bf16 %v4365_v48  ;;  %v3219_v37 = vld [vmem:[%s5976_s3] sm:$0x3] }
 0x25d   : > { %2574 = vst.msk [vmem:[#allocation3 + $0x139] sm:$0xff] %vm432_vm3, %v2541_v10  ;;  %v2544_v26 = vsel %vm2473_vm1, %v3594_v56, %v2512_v42  ;;  %v4366_v54 = vunpack.i.l.bf16 %v4365_v48  ;;  %3629 = vmatprep.subr.msk.bf16.mxu1 %vm2281_vm4, %v3219_v37 }
 0x25e   : > { %v2542_v25 = vsel %vm2471_vm2, %v2418_v15, %v2510_v43  ;;  %2577 = vst.msk [vmem:[#allocation3 + $0x159] sm:$0xff] %vm432_vm3, %v2544_v26  ;;  %v2983_v53 = vsel %vm432_vm3, %v2588_v38, %v4367_v14  ;;  %v2592_v14 = vld [vmem:[#allocation3 + $0xf0] ss:$2 sm:$0xff] }
 0x25f   : > { %2575 = vst.msk [vmem:[#allocation3 + $0x141] sm:$0xff] %vm432_vm3, %v2542_v25  ;;  %v4370_v29 = vpop.permute.xlu1 %4369  ;;  %v2982_v23 = vsel %vm432_vm3, %v2586_v18, %v4366_v54 }
 0x260   : > { %v4371_v50 = vunpack.i.l.bf16 %v4370_v29 }
 0x262   : > { %v2990_v28 = vsel %vm2031_vm6, %v2982_v23, %v4371_v50 }
 0x265   : > { %v2612_v19 = vld [vmem:[#allocation3 + $0x151] ss:$2 sm:$0xff]  ;;  %v2628_v49 = vld [vmem:[#allocation3 + $0x152] ss:$2 sm:$0xff] }
 0x266   : > { %v4438_v46 = vpack.i.bf16 %v2612_v19, %v2610_v27  ;;  %v4443_v34 = vpack.i.bf16 %v2628_v49, %v2626_v11  ;;  %v2689_v5 = vld [vmem:[#allocation3 + $0x150] ss:$2 sm:$0xff]  ;;  %v2705_v47 = vld [vmem:[#allocation3 + $0x151] ss:$2 sm:$0xff] }
 0x267   : > { %v2641_v24 = vld [vmem:[#allocation3 + $0x138] ss:$2 sm:$0xff]  ;;  %v2657_v49 = vld [vmem:[#allocation3 + $0x139] ss:$2 sm:$0xff] }
 0x268   : > { %4439 = vrot.lane.b32.xlu1 %v4438_v46, %s6007_s14 }
 0x26c   : > { %4444 = vrot.lane.b32.xlu1 %v4443_v34, %s6003_s13 }
 0x276   : > { %v3597_v1 = vpop.f32.mrb[28].mxu0 }
 0x277   : > { %vm2476_vm5 = vcmp.gt.f32.partialorder %v3597_v1, 0.0  ;;  %v2515_v52 = vmul.f32 %v3597_v1, %v5671_v63  ;;  %v2431_v20 = vpop.f32.mrb[29].mxu0 }
 0x278   : > { %vm2474_vm14 = vcmp.gt.f32.partialorder %v2431_v20, 0.0  ;;  %v2513_v12 = vmul.f32 %v5671_v63, %v2431_v20  ;;  %v3598_v57 = vpop.f32.mrb[30].mxu0 }
 0x279   : > { %v2547_v9 = vsel %vm2476_vm5, %v3597_v1, %v2515_v52  ;;  %vm2477_vm15 = vcmp.gt.f32.partialorder %v3598_v57, 0.0  ;;  %v2516_v16 = vmul.f32 %v3598_v57, %v5671_v63  ;;  %v2434_v58 = vpop.f32.mrb[31].mxu0 }
 0x27a   : > { %2580 = vst.msk [vmem:[#allocation3 + $0x181] sm:$0xff] %vm432_vm3, %v2547_v9  ;;  %v2545_v59 = vsel %vm2474_vm14, %v2431_v20, %v2513_v12  ;;  %vm2475_vm1 = vcmp.gt.f32.partialorder %v2434_v58, 0.0  ;;  %v2514_v2 = vmul.f32 %v5671_v63, %v2434_v58  ;;  %v4372_v63 = vunpack.i.h.bf16 %v4370_v29 }
 0x27b   : > { %2578 = vst.msk [vmem:[#allocation3 + $0x169] sm:$0xff] %vm432_vm3, %v2545_v59  ;;  %v2548_v60 = vsel %vm2477_vm15, %v3598_v57, %v2516_v16  ;;  %v4385_v31 = vpop.permute.xlu0 %4384  ;;  %v3233_v12 = vsel %vm2281_vm4, %v3219_v37, 0  ;;  %v2673_v57 = vld [vmem:[#allocation3 + $0x13a] ss:$2 sm:$0xff] }
 0x27c   : > { %v4375_v0 = vpop.permute.xlu1 %4374  ;;  %2581 = vst.msk [vmem:[#allocation3 + $0x189] sm:$0xff] %vm432_vm3, %v2548_v60  ;;  %v2546_v61 = vsel %vm2475_vm1, %v2434_v58, %v2514_v2  ;;  %v2991_v30 = vsel %vm2031_vm6, %v2983_v53, %v4372_v63  ;;  %v4387_v25 = vunpack.i.h.bf16 %v4385_v31  ;;  %v4386_v27 = vunpack.i.l.bf16 %v4385_v31  ;;  %v2721_v58 = vld [vmem:[#allocation3 + $0x152] ss:$2 sm:$0xff] }
 0x27d   : > { %2579 = vst.msk [vmem:[#allocation3 + $0x171] sm:$0xff] %vm432_vm3, %v2546_v61  ;;  %v4377_v56 = vunpack.i.h.bf16 %v4375_v0  ;;  %v4376_v40 = vunpack.i.l.bf16 %v4375_v0 }
 0x280   : > { %v4380_v35 = vpop.permute.xlu1 %4379 }
 0x281   : > { %v4382_v10 = vunpack.i.h.bf16 %v4380_v35  ;;  %v4381_v42 = vunpack.i.l.bf16 %v4380_v35 }
 0x283   : > { %v2691_v6 = vld [vmem:[#allocation3 + $0x180] ss:$2 sm:$0xff]  ;;  %v2707_v45 = vld [vmem:[#allocation3 + $0x181] ss:$2 sm:$0xff] }
 0x284   : > { %v4390_v4 = vpop.permute.xlu1 %4389  ;;  %v4448_v44 = vpack.i.bf16 %v2691_v6, %v2689_v5  ;;  %v4453_v51 = vpack.i.bf16 %v2707_v45, %v2705_v47  ;;  %v2643_v17 = vld [vmem:[#allocation3 + $0x168] ss:$2 sm:$0xff]  ;;  %v2659_v41 = vld [vmem:[#allocation3 + $0x169] ss:$2 sm:$0xff] }
 0x285   : > { %v4392_v8 = vunpack.i.h.bf16 %v4390_v4  ;;  %v4391_v13 = vunpack.i.l.bf16 %v4390_v4  ;;  %v4458_v55 = vpack.i.bf16 %v2643_v17, %v2641_v24  ;;  %v4463_v11 = vpack.i.bf16 %v2659_v41, %v2657_v49  ;;  %v2675_v52 = vld [vmem:[#allocation3 + $0x16a] ss:$2 sm:$0xff] }
 0x286   : > { %4449 = vrot.lane.b32.xlu1 %v4448_v44, %s6008_s22  ;;  %v4468_v9 = vpack.i.bf16 %v2675_v52, %v2673_v57  ;;  %v2723_v16 = vld [vmem:[#allocation3 + $0x182] ss:$2 sm:$0xff] }
 0x287   : > { %v2999_v32 = vsel %vm2097_vm8, %v2991_v30, %v4392_v8  ;;  %v2998_v33 = vsel %vm2097_vm8, %v2990_v28, %v4391_v13  ;;  %v4478_v59 = vpack.i.bf16 %v2723_v16, %v2721_v58  ;;  %v2590_v45 = vld [vmem:[#allocation3 + $0xc0] ss:$2 sm:$0xff]  ;;  %v2596_v52 = vld [vmem:[#allocation3 + $0x150] ss:$2 sm:$0xff] }
 0x288   : > { %v4395_v7 = vpop.permute.xlu1 %4394 }
 0x289   : > { %v4397_v22 = vunpack.i.h.bf16 %v4395_v7  ;;  %v4396_v62 = vunpack.i.l.bf16 %v4395_v7 }
 0x28a   : > { %4454 = vrot.lane.b32.xlu1 %v4453_v51, %s4569_s15 }
 0x28b   : > { %v3006_v39 = vsel %vm2163_vm10, %v2998_v33, %v4396_v62  ;;  %v3007_v15 = vsel %vm2163_vm10, %v2999_v32, %v4397_v22 }
 0x28c   : > { %v4400_v21 = vpop.permute.xlu1 %4399 }
 0x28d   : > { %v4402_v3 = vunpack.i.h.bf16 %v4400_v21  ;;  %v4401_v36 = vunpack.i.l.bf16 %v4400_v21 }
 0x28e   : > { %4459 = vrot.lane.b32.xlu1 %v4458_v55, %s4565_s16 }
 0x28f   : > { %v3015_v43 = vsel %vm3012_vm7, %v3006_v39, %v4401_v36  ;;  %v3016_v26 = vsel %vm3012_vm7, %v3007_v15, %v4402_v3 }
 0x290   : > { %v3024_v19 = vsel %vm3021_vm9, %v3015_v43, %v4376_v40  ;;  %v3025_v46 = vsel %vm3021_vm9, %v3016_v26, %v4377_v56 }
 0x291   : > { %v3033_v34 = vsel %vm3030_vm11, %v3024_v19, %v4381_v42  ;;  %v3034_v48 = vsel %vm3030_vm11, %v3025_v46, %v4382_v10 }
 0x292   : > { %v3042_v1 = vsel %vm3039_vm12, %v3033_v34, %v4386_v27  ;;  %v3043_v29 = vsel %vm3039_vm12, %v3034_v48, %v4387_v25  ;;  %4464 = vrot.lane.b32.xlu1 %v4463_v11, %s6005_s29  ;;  %s377_s29 = sand.u32 1, %s4549_s18  }
 0x293   : > { %v3049_v20 = vpack.c.bf16 %v3043_v29, %v3042_v1  ;;  %v2594_v29 = vld [vmem:[#allocation3 + $0x120] ss:$2 sm:$0xff]  ;;  %s3472_s16 = sshll.u32 %s377_s29, 6 }
 0x294   : > { %s5902_s15 = scalar_lea.vmem [#allocation4], %s3472_s16  ;;  %s4572_s16 = smov [#allocation4]  }
 0x295   : > { %3610 = vmatmul.mubr.msk.bf16.vlgmr.msra.gmra.mrb[0].mxu1 %vm3088_vm13, %v3049_v20  ;;  %s3360_s22 = sshll.u32 %s5902_s15, 4  ;;  %s5923_s22 = int_to_ptr.vmem [resolvable:$true] %s3360_s22 }
 0x296   : > { %3618 = vmatpush3.bf16.msra.mxu1 %v3233_v12  ;;  %4469 = vrot.lane.b32.xlu1 %v4468_v9, %s6006_s30  ;;  %s3527_s30 = sshll.u32 %s4655_s21, 10  ;;  %s5931_s21 = scalar_lea.sflag [#allocation5], %s377_s29 }
 0x297   : > { %s5919_s13 = scalar_lea.hbm %s5984_s11, %s3527_s30  ;;  %s4495_s25 = scalar_lea.vmem %s5923_s22, 1024 }
 0x298   : > { %p4496_p11 = scmp.ne.s32.totalorder %s5923_s22, %s4495_s25  ;;  %s4499_s30 = sshll.u32 %s4572_s16, 4  ;;  %s4500_s30 = int_to_ptr.vmem [resolvable:$false] %s4499_s30 }
 0x299   : > { %p4502_p0 = scmp.lt.s32.totalorder %s5923_s22, %s4500_s30 }
 0x29a   : > { %4479 = vrot.lane.b32.xlu1 %v4478_v59, %s6009_s12  ;;  %v4410_v2 = vpop.permute.xlu0 %4409  ;;  %v4405_v61 = vpop.permute.xlu1 %4404  ;;  %p4497_p12 = pnand %p4496_p11, %p4672_p5 }
 0x29b   : > { %v4407_v4 = vunpack.i.h.bf16 %v4405_v61  ;;  %v4406_v5 = vunpack.i.l.bf16 %v4405_v61  ;;  %v4412_v6 = vunpack.i.h.bf16 %v4410_v2  ;;  %v4411_v44 = vunpack.i.l.bf16 %v4410_v2 }
 0x29c   : > { %p4498_p13 = pneg %p4497_p12 }
 0x29d   : > { %v2984_v63 = vsel %vm432_vm3, %v2590_v45, %v4406_v5  ;;  %v2985_v50 = vsel %vm432_vm3, %v2592_v14, %v4407_v4 }
 0x29e   : > { %v2992_v51 = vsel %vm2031_vm6, %v2984_v63, %v4411_v44  ;;  %v2993_v17 = vsel %vm2031_vm6, %v2985_v50, %v4412_v6 }
 0x2ba   : > { %v4415_v60 = vpop.permute.xlu0 %4414 }
 0x2bb   : > { %v4417_v53 = vunpack.i.h.bf16 %v4415_v60  ;;  %v4416_v24 = vunpack.i.l.bf16 %v4415_v60 }
 0x2be   : > { %v4420_v0 = vpop.permute.xlu0 %4419 }
 0x2bf   : > { %v4422_v21 = vunpack.i.h.bf16 %v4420_v0  ;;  %v4421_v55 = vunpack.i.l.bf16 %v4420_v0 }
 0x2c2   : > { %v4425_v35 = vpop.permute.xlu0 %4424 }
 0x2c3   : > { %v4427_v7 = vunpack.i.h.bf16 %v4425_v35  ;;  %v4426_v47 = vunpack.i.l.bf16 %v4425_v35 }
 0x2c5   : > { %v3001_v38 = vsel %vm2097_vm8, %v2993_v17, %v4427_v7  ;;  %v3000_v22 = vsel %vm2097_vm8, %v2992_v51, %v4426_v47  ;;  %v3200_v47 = vld [vmem:[%s4779_s24] ss:$2 sm:$0xff] }
 0x2c6   : > { %v4430_v54 = vpop.permute.xlu0 %4429 }
 0x2c7   : > { %v4432_v8 = vunpack.i.h.bf16 %v4430_v54  ;;  %v4431_v13 = vunpack.i.l.bf16 %v4430_v54 }
 0x2c9   : > { %v3008_v28 = vsel %vm2163_vm10, %v3000_v22, %v4431_v13  ;;  %v3009_v30 = vsel %vm2163_vm10, %v3001_v38, %v4432_v8  ;;  %v3508_v8 = vld [vmem:[%s4779_s24 + $0x20] ss:$2 sm:$0xff] }
 0x2ca   : > { %v4435_v18 = vpop.permute.xlu0 %4434 }
 0x2cb   : > { %v4437_v62 = vunpack.i.h.bf16 %v4435_v18  ;;  %v4436_v23 = vunpack.i.l.bf16 %v4435_v18 }
 0x2cd   : > { %v3017_v31 = vsel %vm3012_vm7, %v3008_v28, %v4436_v23  ;;  %v3018_v32 = vsel %vm3012_vm7, %v3009_v30, %v4437_v62  ;;  %v3215_v62 = vpack.c.bf16 %v3508_v8, %v3200_v47  ;;  %v3511_v28 = vld [vmem:[%s4779_s24 + $0x80] ss:$2 sm:$0xff] }
 0x2ce   : > { %v3026_v33 = vsel %vm3021_vm9, %v3017_v31, %v4416_v24  ;;  %v3027_v3 = vsel %vm3021_vm9, %v3018_v32, %v4417_v53  ;;  %v4475_v36 = vpop.permute.xlu0 %4474  ;;  %v3509_v53 = vld [vmem:[%s4779_s24 + $0x40] ss:$2 sm:$0xff] }
 0x2cf   : > { %v4477_v37 = vunpack.i.h.bf16 %v4475_v36  ;;  %v4476_v56 = vunpack.i.l.bf16 %v4475_v36  ;;  %v3035_v40 = vsel %vm3030_vm11, %v3026_v33, %v4421_v55  ;;  %v3036_v39 = vsel %vm3030_vm11, %v3027_v3, %v4422_v21  ;;  %v3510_v24 = vld [vmem:[%s4779_s24 + $0x60] ss:$2 sm:$0xff] }
 0x2d0   : > { %v3512_v30 = vld [vmem:[%s4779_s24 + $0xa0] ss:$2 sm:$0xff]  ;;  %v3216_v21 = vpack.c.bf16 %v3510_v24, %v3509_v53 }
 0x2d1   : > { %v3044_v15 = vsel %vm3039_vm12, %v3035_v40, %v4476_v56  ;;  %v3045_v41 = vsel %vm3039_vm12, %v3036_v39, %v4477_v37  ;;  %v3217_v55 = vpack.c.bf16 %v3512_v30, %v3511_v28  ;;  %v3513_v31 = vld [vmem:[%s4779_s24 + $0xc0] ss:$2 sm:$0xff] }
 0x2d2   : > { %v3050_v10 = vpack.c.bf16 %v3045_v41, %v3044_v15  ;;  %v3514_v32 = vld [vmem:[%s4779_s24 + $0xe0] ss:$2 sm:$0xff]  ;;  %s4501_s24 = scalar_lea.vmem %s4500_s30, 2048 }
 0x2d3   : > { %v3218_v33 = vpack.c.bf16 %v3514_v32, %v3513_v31  ;;  %p4503_p1 = scmp.lt.s32.totalorder %s4501_s24, %s4495_s25 }
 0x2d4   : > { %3613 = vmatprep.mubr.msk.bf16.mxu1 %vm3088_vm13, %v3050_v10  ;;  %v3506_v10 = vld [vmem:[%s5980_s7] ss:$0 sm:$0xff] }
 0x2d5   : > { %p4504_p2 = por %p4503_p1, %p4502_p0 }
 0x2d7   : > { %p4505_p3 = pnand %p4504_p2, %p4498_p13 }
 0x2da   : > { %v4440_v42 = vpop.permute.xlu1 %4439 }
 0x2db   : > { %v4442_v19 = vunpack.i.h.bf16 %v4440_v42  ;;  %v4441_v46 = vunpack.i.l.bf16 %v4440_v42  ;;  %v3519_v42 = vld [vmem:[%s5982_s9] ss:$0 sm:$0xff] }
 0x2dd   : > { %v2986_v57 = vsel %vm432_vm3, %v2594_v29, %v4441_v46  ;;  %v2987_v9 = vsel %vm432_vm3, %v2596_v52, %v4442_v19  ;;  %v3520_v19 = vld [vmem:[%s5983_s10] ss:$0 sm:$0xff] }
 0x2de   : > { %v4445_v43 = vpop.permute.xlu1 %4444 }
 0x2df   : > { %v4447_v49 = vunpack.i.h.bf16 %v4445_v43  ;;  %v4446_v11 = vunpack.i.l.bf16 %v4445_v43 }
 0x2e1   : > { %v2994_v16 = vsel %vm2031_vm6, %v2986_v57, %v4446_v11  ;;  %v2995_v58 = vsel %vm2031_vm6, %v2987_v9, %v4447_v49 }
 0x2f8   : > { %v4450_v26 = vpop.permute.xlu1 %4449 }
 0x2f9   : > { %v4452_v35 = vunpack.i.h.bf16 %v4450_v26  ;;  %v4451_v4 = vunpack.i.l.bf16 %v4450_v26  ;;  %v3507_v26 = vld [vmem:[%s5981_s8] ss:$0 sm:$0xff] }
 0x2fc   : > { %v4455_v25 = vpop.permute.xlu1 %4454 }
 0x2fd   : > { %v4457_v44 = vunpack.i.h.bf16 %v4455_v25  ;;  %v4456_v45 = vunpack.i.l.bf16 %v4455_v25 }
 0x300   : > { %v4460_v27 = vpop.permute.xlu1 %4459 }
 0x301   : > { %v4462_v48 = vunpack.i.h.bf16 %v4460_v27  ;;  %v4461_v1 = vunpack.i.l.bf16 %v4460_v27 }
 0x303   : > { %v3003_v2 = vsel %vm2097_vm8, %v2995_v58, %v4462_v48  ;;  %v3002_v60 = vsel %vm2097_vm8, %v2994_v16, %v4461_v1 }
 0x304   : > { %v4465_v34 = vpop.permute.xlu1 %4464 }
 0x305   : > { %v4467_v20 = vunpack.i.h.bf16 %v4465_v34  ;;  %v4466_v12 = vunpack.i.l.bf16 %v4465_v34 }
 0x307   : > { %v3010_v5 = vsel %vm2163_vm10, %v3002_v60, %v4466_v12  ;;  %v3011_v6 = vsel %vm2163_vm10, %v3003_v2, %v4467_v20 }
 0x308   : > { %v4470_v59 = vpop.permute.xlu1 %4469 }
 0x309   : > { %v4472_v0 = vunpack.i.h.bf16 %v4470_v59  ;;  %v4471_v61 = vunpack.i.l.bf16 %v4470_v59 }
 0x30b   : > { %v3019_v14 = vsel %vm3012_vm7, %v3010_v5, %v4471_v61  ;;  %v3020_v54 = vsel %vm3012_vm7, %v3011_v6, %v4472_v0 }
 0x30c   : > { %v3028_v63 = vsel %vm3021_vm9, %v3019_v14, %v4451_v4  ;;  %v3029_v50 = vsel %vm3021_vm9, %v3020_v54, %v4452_v35  ;;  %v4480_v7 = vpop.permute.xlu1 %4479 }
 0x30d   : > { %v4482_v13 = vunpack.i.h.bf16 %v4480_v7  ;;  %v4481_v51 = vunpack.i.l.bf16 %v4480_v7  ;;  %v3037_v17 = vsel %vm3030_vm11, %v3028_v63, %v4456_v45  ;;  %v3038_v18 = vsel %vm3030_vm11, %v3029_v50, %v4457_v44 }
 0x30f   : > { %v3046_v38 = vsel %vm3039_vm12, %v3037_v17, %v4481_v51  ;;  %v3047_v22 = vsel %vm3039_vm12, %v3038_v18, %v4482_v13 }
 0x310   : > { %v3051_v23 = vpack.c.bf16 %v3047_v22, %v3046_v38 }
 0x312   : > { %3614 = vmatmul.mubr.msk.bf16.gmra.mrb[4].mxu1 %vm3088_vm13, %v3051_v23 }
 0x313   : > { %3619 = vmatprep.mubr.msk.bf16.mxu1 %vm386_vm0, %v3215_v62 }
 0x31a   : > { %3620 = vmatmul.mubr.msk.bf16.vlgmr.msra.gmra.mrb[8].mxu1 %vm386_vm0, %v3216_v21 }
 0x31b   : > { %3623 = vmatprep.mubr.msk.bf16.mxu1 %vm386_vm0, %v3217_v55 }
 0x322   : > { %3624 = vmatmul.mubr.msk.bf16.gmra.mrb[12].mxu1 %vm386_vm0, %v3218_v33 }
 0x368   : > { %v3611_v3 = vpop.f32.mrb[0].mxu1 }
 0x369   : > { %v3139_v36 = vpop.f32.mrb[1].mxu1  ;;  %v3179_v43 = vmul.f32 %v3611_v3, %v3506_v10 }
 0x36a   : > { %v3612_v37 = vpop.f32.mrb[2].mxu1  ;;  %v3177_v25 = vmul.f32 %v3506_v10, %v3139_v36 }
 0x36b   : > { %v3142_v56 = vpop.f32.mrb[3].mxu1  ;;  %v3180_v46 = vmul.f32 %v3612_v37, %v3506_v10  ;;  %v3194_v29 = vadd.f32 %v3507_v26, %v3179_v43 }
 0x36c   : > { %v3178_v34 = vmul.f32 %v3506_v10, %v3142_v56  ;;  %v3192_v57 = vadd.f32 %v3507_v26, %v3177_v25 }
 0x36d   : > { %v3195_v58 = vadd.f32 %v3507_v26, %v3180_v46 }
 0x36e   : > { %v3193_v60 = vadd.f32 %v3507_v26, %v3178_v34 }
 0x3e5   : > { %v3615_v40 = vpop.f32.mrb[4].mxu1 }
 0x3e6   : > { %v3155_v39 = vpop.f32.mrb[5].mxu1  ;;  %v3183_v35 = vmul.f32 %v3615_v40, %v3506_v10 }
 0x3e7   : > { %v3616_v15 = vpop.f32.mrb[6].mxu1  ;;  %v3181_v5 = vmul.f32 %v3506_v10, %v3155_v39 }
 0x3e8   : > { %v3158_v41 = vpop.f32.mrb[7].mxu1  ;;  %v3184_v45 = vmul.f32 %v3616_v15, %v3506_v10  ;;  %v3198_v47 = vadd.f32 %v3507_v26, %v3183_v35 }
 0x3e9   : > { %v3182_v63 = vmul.f32 %v3506_v10, %v3158_v41  ;;  %v3196_v17 = vadd.f32 %v3507_v26, %v3181_v5 }
 0x3ea   : > { %v3199_v22 = vadd.f32 %v3507_v26, %v3184_v45 }
 0x3eb   : > { %v3197_v53 = vadd.f32 %v3507_v26, %v3182_v63 }
 0x3ed   : > { %v3621_v27 = vpop.f32.mrb[8].mxu1 }
 0x3ee   : > { %v3309_v49 = vmul.f32 %v3621_v27, %v3519_v42  ;;  %v3269_v11 = vpop.f32.mrb[9].mxu1 }
 0x3ef   : > { %v3307_v48 = vmul.f32 %v3519_v42, %v3269_v11  ;;  %v3622_v1 = vpop.f32.mrb[10].mxu1 }
 0x3f0   : > { %v3324_v52 = vadd.f32 %v3520_v19, %v3309_v49  ;;  %v3310_v20 = vmul.f32 %v3622_v1, %v3519_v42  ;;  %v3272_v12 = vpop.f32.mrb[11].mxu1 }
 0x3f1   : > { %v3322_v9 = vadd.f32 %v3520_v19, %v3307_v48  ;;  %v3308_v16 = vmul.f32 %v3519_v42, %v3272_v12 }
 0x3f2   : > { %v3332_v59 = vadd.f32 %v3324_v52, %v3194_v29  ;;  %v3325_v2 = vadd.f32 %v3520_v19, %v3310_v20 }
 0x3f3   : > { %v3330_v0 = vadd.f32 %v3322_v9, %v3192_v57  ;;  %v3323_v61 = vadd.f32 %v3520_v19, %v3308_v16 }
 0x3f4   : > { %3340 = vst.msk [vmem:[%s5902_s15 + $0x10] sm:$0xff] %vm432_vm3, %v3332_v59  ;;  %v3333_v4 = vadd.f32 %v3325_v2, %v3195_v58 }
 0x3f5   : > { %3338 = vst.msk [vmem:[%s5902_s15] sm:$0xff] %vm432_vm3, %v3330_v0  ;;  %v3331_v6 = vadd.f32 %v3323_v61, %v3193_v60  ;;  %v3625_v44 = vpop.f32.mrb[12].mxu1 }
 0x3f6   : > { %3341 = vst.msk [vmem:[%s5902_s15 + $0x18] sm:$0xff] %vm432_vm3, %v3333_v4  ;;  %v3313_v14 = vmul.f32 %v3625_v44, %v3519_v42  ;;  %v3285_v54 = vpop.f32.mrb[13].mxu1 }
 0x3f7   : > { %3339 = vst.msk [vmem:[%s5902_s15 + $0x8] sm:$0xff] %vm432_vm3, %v3331_v6  ;;  %v3311_v50 = vmul.f32 %v3519_v42, %v3285_v54  ;;  %v3626_v7 = vpop.f32.mrb[14].mxu1 }
 0x3f8   : > { %v3328_v8 = vadd.f32 %v3520_v19, %v3313_v14  ;;  %v3314_v13 = vmul.f32 %v3626_v7, %v3519_v42  ;;  %v3288_v51 = vpop.f32.mrb[15].mxu1 }
 0x3f9   : > { %v3326_v18 = vadd.f32 %v3520_v19, %v3311_v50  ;;  %v3312_v38 = vmul.f32 %v3519_v42, %v3288_v51 }
 0x3fa   : > { %v3336_v62 = vadd.f32 %v3328_v8, %v3198_v47  ;;  %v3329_v23 = vadd.f32 %v3520_v19, %v3314_v13 }
 0x3fb   : > { %v3334_v24 = vadd.f32 %v3326_v18, %v3196_v17  ;;  %v3327_v28 = vadd.f32 %v3520_v19, %v3312_v38 }
 0x3fc   : > { %3344 = vst.msk [vmem:[%s5902_s15 + $0x30] sm:$0xff] %vm432_vm3, %v3336_v62  ;;  %v3337_v30 = vadd.f32 %v3329_v23, %v3199_v22 }
 0x3fd   : > { %3342 = vst.msk [vmem:[%s5902_s15 + $0x20] sm:$0xff] %vm432_vm3, %v3334_v24  ;;  %v3335_v21 = vadd.f32 %v3327_v28, %v3197_v53 }
 0x3fe   : > { %3345 = vst.msk [vmem:[%s5902_s15 + $0x38] sm:$0xff] %vm432_vm3, %v3337_v30 }
 0x3ff   : > { %3343 = vst.msk [vmem:[%s5902_s15 + $0x28] sm:$0xff] %vm432_vm3, %v3335_v21 }
 0x400   : > { %4508 = shalt.err (!%p4505_p3)
}
 0x401   : > { %s4509_s29 = scalar_lea.hbm %s5919_s13, 1024  ;;  %s4513_s16 = scalar_lea.hbm %s5984_s11, 2048 }
 0x402   : > { %p4510_p4 = scmp.ne.s32.totalorder %s5919_s13, %s4509_s29  ;;  %p4514_p9 = scmp.lt.u32.totalorder %s5919_s13, %s5984_s11 }
 0x403   : > { %p4515_p10 = scmp.lt.u32.totalorder %s4513_s16, %s4509_s29  ;;  %p4517_p12 = scmp.lt.u32.totalorder %s4509_s29, %s5919_s13 }
 0x404   : > { %p4511_p7 = pnand %p4510_p4, %p4672_p5 }
 0x405   : > { %p4516_p11 = por %p4515_p10, %p4514_p9 }
 0x406   : > { %p4512_p8 = pneg %p4511_p7 }
 0x407   : > { %p4518_p13 = por %p4517_p12, %p4516_p11 }
 0x409   : > { %p4519_p0 = pnand %p4518_p13, %p4512_p8 }
 0x40b   : > { %4522 = shalt.err (!%p4519_p0)
}
 0x40c   : > { %s4573_s25 = smov 128  }
 0x40d   : > { %3630 = dma.vmem_to_hbm [thread:$0]  (%p4672_p5), %s5923_s22, 1024, %s5919_s13, %s5931_s21, %s4573_s25, %s4573_s25, %s6007_s14  }
 0x40e PF: > { %p3636_p1 = scmp.ge.s32.totalorder %s4557_s20, 2  ;;  %s3375_s0 = sand.u32 1, %s4545_s17  }
 0x40f   : > { %s3376_s24 = scalar_lea.sflag [#allocation5], %s3375_s0 }
 0x410   : > { %p3633_p2 = pnand %p3636_p1, %p4676_p6 }
 0x412   : > { %4540 = dma.done.wait (!%p3633_p2), %s3376_s24, 1024  }
 0x413   : > { %4542 = vsyncadd (!%p3633_p2), %s3376_s24, 4294966272  ;;  %p21_p3 = scmp.ge.s32.totalorder %s4659_s23, 4   ;;  %s6010_s17 = smov %s4549_s18 }
 0x414   : > { %s6011_s18 = smov %s4553_s19  ;;  %s6012_s19 = smov %s4670_s26 }
 0x415   : > { %s6013_s20 = smov %s4659_s23  ;;  %23 = sbr.rel (!%p21_p3) target bundleno = 5 (0x5), region = 181 }
 0x41c   :  { %3381 = vsyncpa [#allocation5], 1 }
 0x41d   :  { %3383 = vsyncpa [#allocation5 + $0x1], 1 }

</bundles_post_ra>
